<compile_context>
chip_gen: v7x
topology: tpu7x:2x2x1
jax: 0.10.0
libtpu: 0.0.40
codegen_flags: <defaults>
</compile_context>

<pallas_src>
import math
import functools

import jax
import jax.numpy as jnp
from jax.experimental import pallas as pl
from jax.experimental.pallas import tpu as pltpu

NORM_EPS = 1e-5      # config.norm_eps
MASK_VAL = -1e30     # additive causal-mask value


# --------------------------------------------------------------------------
# helpers
# --------------------------------------------------------------------------
def _vmem_cap_bytes():
    try:
        info = pltpu.get_tpu_info()
        cap = getattr(info, "vmem_capacity_bytes", None)
        if cap:
            return int(cap)
    except Exception:
        pass
    return 128 * 1024 * 1024


def _pick_tile(n, prefs):
    for t in prefs:
        if n % t == 0:
            return t
    return n


# --------------------------------------------------------------------------
# Kernel 1: pre-attention RMSNorm + fused QKV projection + RoPE on Q/K
# (rotate-half form; Q additionally pre-scaled by 1/sqrt(hd)).  bf16 output.
# --------------------------------------------------------------------------
def _rmsnorm_qkv_rope_kernel(x_ref, nw_ref, w_ref, cos_ref, sin_ref, o_ref, *,
                             eps, hd, d_q, d_qk, scale):
    x = x_ref[...]                                            # (tm, D) f32
    ms = jnp.mean(x * x, axis=-1, keepdims=True)
    xn = (x * jax.lax.rsqrt(ms + eps) * nw_ref[...]).astype(jnp.bfloat16)
    y = jnp.dot(xn, w_ref[...], preferred_element_type=jnp.float32)  # (tm, tn)

    tn = y.shape[1]
    reps = tn // hd
    half = hd // 2

    c = cos_ref[...]                                          # (tm, hd) f32
    s_ = sin_ref[...]
    if reps > 1:
        c = jnp.concatenate([c] * reps, axis=-1)
        s_ = jnp.concatenate([s_] * reps, axis=-1)

    # rotate-half per hd-wide head group (weights are pre-de-interleaved, so
    # this is exactly the reference's interleaved-pair rotation).
    rot_parts = []
    for g in range(reps):
        yg = y[:, g * hd:(g + 1) * hd]
        rot_parts.append(jnp.concatenate([-yg[:, half:], yg[:, :half]], axis=-1))
    y_rot = rot_parts[0] if reps == 1 else jnp.concatenate(rot_parts, axis=-1)
    y_rope = y * c + y_rot * s_

    col_ids = (pl.program_id(1) * tn
               + jax.lax.broadcasted_iota(jnp.int32, y.shape, 1))
    out = jnp.where(col_ids < d_qk, y_rope, y)                # V columns: no RoPE
    out = jnp.where(col_ids < d_q, out * scale, out)          # fold 1/sqrt(hd) into Q
    o_ref[...] = out.astype(jnp.bfloat16)


def rmsnorm_qkv_rope(x2d, norm_w, wqkv, cos_m, sin_m, *, tm, tn, hd, d_q,
                     d_qk, scale, vmem_limit, eps=NORM_EPS):
    M, D = x2d.shape
    N = wqkv.shape[1]
    return pl.pallas_call(
        functools.partial(_rmsnorm_qkv_rope_kernel, eps=eps, hd=hd, d_q=d_q,
                          d_qk=d_qk, scale=scale),
        out_shape=jax.ShapeDtypeStruct((M, N), jnp.bfloat16),
        grid=(M // tm, N // tn),
        in_specs=[pl.BlockSpec((tm, D), lambda i, j: (i, 0)),
                  pl.BlockSpec((1, D), lambda i, j: (0, 0)),
                  pl.BlockSpec((D, tn), lambda i, j: (0, j)),
                  pl.BlockSpec((tm, hd), lambda i, j: (i, 0)),
                  pl.BlockSpec((tm, hd), lambda i, j: (i, 0))],
        out_specs=pl.BlockSpec((tm, tn), lambda i, j: (i, j)),
        compiler_params=pltpu.CompilerParams(
            dimension_semantics=("parallel", "parallel"),
            vmem_limit_bytes=vmem_limit),
    )(x2d, norm_w.reshape(1, D), wqkv, cos_m, sin_m)


# --------------------------------------------------------------------------
# Kernel 2: grouped flash attention.  Grid (B, n_kv_heads, q_blocks,
# kv_blocks); the n_rep query heads sharing a KV head are processed together
# (static unroll), causal above-diagonal KV blocks are skipped, and q/k/v are
# column-sliced directly out of the (M, Dq+2Dk) qkv buffer.
# --------------------------------------------------------------------------
def _flash_attn_kernel(q_ref, k_ref, v_ref, o_ref, m_sc, l_sc, acc_sc, *,
                       tq, tk, n_rep, hd):
    qi = pl.program_id(2)
    kvi = pl.program_id(3)

    @pl.when(kvi == 0)
    def _():
        m_sc[...] = jnp.full_like(m_sc, -jnp.inf)
        l_sc[...] = jnp.zeros_like(l_sc)
        acc_sc[...] = jnp.zeros_like(acc_sc)

    # Causal block skipping: KV blocks strictly above the diagonal of this
    # query block are fully masked -> skip their MXU / exp work entirely.
    @pl.when(kvi * tk <= qi * tq + (tq - 1))
    def _():
        k = k_ref[...]                                        # (tk, hd) bf16, RoPE'd
        v = v_ref[...]                                        # (tk, hd) bf16
        q_pos = qi * tq + jax.lax.broadcasted_iota(jnp.int32, (tq, tk), 0)
        k_pos = kvi * tk + jax.lax.broadcasted_iota(jnp.int32, (tq, tk), 1)
        causal = k_pos <= q_pos
        for h in range(n_rep):                                # static unroll over the KV group
            q = q_ref[:, h * hd:(h + 1) * hd]                 # (tq, hd) bf16 (pre-scaled)
            s = jax.lax.dot_general(q, k, (((1,), (1,)), ((), ())),
                                    preferred_element_type=jnp.float32)
            s = jnp.where(causal, s, MASK_VAL)
            m_prev = m_sc[h]
            m_new = jnp.maximum(m_prev, jnp.max(s, axis=-1, keepdims=True))
            alpha = jnp.exp(m_prev - m_new)
            p = jnp.exp(s - m_new)
            l_sc[h] = alpha * l_sc[h] + jnp.sum(p, axis=-1, keepdims=True)
            acc_sc[:, h * hd:(h + 1) * hd] = (
                alpha * acc_sc[:, h * hd:(h + 1) * hd]
                + jnp.dot(p.astype(jnp.bfloat16), v,
                          preferred_element_type=jnp.float32))
            m_sc[h] = m_new

    @pl.when(kvi == pl.num_programs(3) - 1)
    def _():
        for h in range(n_rep):
            inv_l = pl.reciprocal(l_sc[h], approx=True)       # (tq, 1)
            o_ref[:, h * hd:(h + 1) * hd] = (
                acc_sc[:, h * hd:(h + 1) * hd] * inv_l).astype(o_ref.dtype)


def flash_attention_qkv(qkv2, *, B, S, H, Hk, hd, tq, tk, vmem_limit):
    # TODO(synk): KV-cache / start_pos > 0 and the mask=None (non-causal)
    # branch of apply_score_mod are not implemented; the causal mask is built
    # in-kernel from iota.
    n_rep = H // Hk
    M, _ = qkv2.shape
    nq = S // tq
    nkv = S // tk
    Dq = H * hd
    qw = n_rep * hd
    q_spec = pl.BlockSpec((tq, qw), lambda b, g, qi, kvi: (b * nq + qi, g))
    k_spec = pl.BlockSpec((tk, hd), lambda b, g, qi, kvi: (b * nkv + kvi, H + g))
    v_spec = pl.BlockSpec((tk, hd), lambda b, g, qi, kvi: (b * nkv + kvi, H + Hk + g))
    o_spec = pl.BlockSpec((tq, qw), lambda b, g, qi, kvi: (b * nq + qi, g))
    return pl.pallas_call(
        functools.partial(_flash_attn_kernel, tq=tq, tk=tk, n_rep=n_rep, hd=hd),
        out_shape=jax.ShapeDtypeStruct((M, Dq), jnp.bfloat16),
        grid=(B, Hk, nq, nkv),
        in_specs=[q_spec, k_spec, v_spec],
        out_specs=o_spec,
        scratch_shapes=[pltpu.VMEM((n_rep, tq, 1), jnp.float32),
                        pltpu.VMEM((n_rep, tq, 1), jnp.float32),
                        pltpu.VMEM((tq, qw), jnp.float32)],
        compiler_params=pltpu.CompilerParams(
            dimension_semantics=("parallel", "parallel", "parallel", "arbitrary"),
            vmem_limit_bytes=vmem_limit),
    )(qkv2, qkv2, qkv2)


# --------------------------------------------------------------------------
# Kernel 3: wo projection (K-tiled f32 accumulator) + post-attn RMSNorm +
# gated residual, fused.
# --------------------------------------------------------------------------
def _proj_residual_kernel(attn_ref, w_ref, x_ref, g_ref, nw_ref, o_ref,
                          acc_ref, *, eps):
    kidx = pl.program_id(1)

    @pl.when(kidx == 0)
    def _():
        acc_ref[...] = jnp.zeros_like(acc_ref)

    acc_ref[...] += jnp.dot(attn_ref[...], w_ref[...],
                            preferred_element_type=jnp.float32)

    @pl.when(kidx == pl.num_programs(1) - 1)
    def _():
        y = acc_ref[...]                                      # (tm, D) f32
        ms = jnp.mean(y * y, axis=-1, keepdims=True)
        yn = y * jax.lax.rsqrt(ms + eps) * nw_ref[...]
        o_ref[...] = x_ref[...] + g_ref[...] * yn


def proj_residual(x2d, gate2d, attn2d, wo, norm_w, *, tm, tk, vmem_limit,
                  eps=NORM_EPS):
    M, D = x2d.shape
    K = attn2d.shape[1]
    return pl.pallas_call(
        functools.partial(_proj_residual_kernel, eps=eps),
        out_shape=jax.ShapeDtypeStruct((M, D), jnp.float32),
        grid=(M // tm, K // tk),
        in_specs=[pl.BlockSpec((tm, tk), lambda i, kk: (i, kk)),
                  pl.BlockSpec((tk, D), lambda i, kk: (kk, 0)),
                  pl.BlockSpec((tm, D), lambda i, kk: (i, 0)),
                  pl.BlockSpec((tm, 1), lambda i, kk: (i, 0)),
                  pl.BlockSpec((1, D), lambda i, kk: (0, 0))],
        out_specs=pl.BlockSpec((tm, D), lambda i, kk: (i, 0)),
        scratch_shapes=[pltpu.VMEM((tm, D), jnp.float32)],
        compiler_params=pltpu.CompilerParams(
            dimension_semantics=("parallel", "arbitrary"),
            vmem_limit_bytes=vmem_limit),
    )(attn2d, wo, x2d, gate2d, norm_w.reshape(1, D))


# --------------------------------------------------------------------------
# Kernel 4: pre-FFN RMSNorm (computed once per row block into bf16 scratch)
# + SwiGLU (hidden axis chunked into an f32 accumulator) + post-FFN RMSNorm
# + gated residual, fused.
# --------------------------------------------------------------------------
def _ffn_residual_kernel(x_ref, g_ref, nw1_ref, w1_ref, w3_ref, w2_ref,
                         nw2_ref, o_ref, acc_ref, xn_ref, *, eps):
    hidx = pl.program_id(1)

    @pl.when(hidx == 0)
    def _():
        x = x_ref[...]                                        # (tm, D) f32
        ms = jnp.mean(x * x, axis=-1, keepdims=True)
        xn_ref[...] = (x * jax.lax.rsqrt(ms + eps) * nw1_ref[...]).astype(jnp.bfloat16)
        acc_ref[...] = jnp.zeros_like(acc_ref)

    xn = xn_ref[...]                                          # (tm, D) bf16 (reused)
    a = jnp.dot(xn, w1_ref[...], preferred_element_type=jnp.float32)
    b = jnp.dot(xn, w3_ref[...], preferred_element_type=jnp.float32)
    h = (a * jax.nn.sigmoid(a)) * b                           # SiLU(w1 x) * (w3 x)
    acc_ref[...] += jnp.dot(h.astype(jnp.bfloat16), w2_ref[...],
                            preferred_element_type=jnp.float32)

    @pl.when(hidx == pl.num_programs(1) - 1)
    def _():
        y = acc_ref[...]
        ms2 = jnp.mean(y * y, axis=-1, keepdims=True)
        yn = y * jax.lax.rsqrt(ms2 + eps) * nw2_ref[...]
        o_ref[...] = x_ref[...] + g_ref[...] * yn


def ffn_residual(x2d, gate2d, norm1_w, w1, w3, w2, norm2_w, *, tm, th,
                 vmem_limit, eps=NORM_EPS):
    M, D = x2d.shape
    Hn = w1.shape[1]
    return pl.pallas_call(
        functools.partial(_ffn_residual_kernel, eps=eps),
        out_shape=jax.ShapeDtypeStruct((M, D), jnp.float32),
        grid=(M // tm, Hn // th),
        in_specs=[pl.BlockSpec((tm, D), lambda i, hh: (i, 0)),
                  pl.BlockSpec((tm, 1), lambda i, hh: (i, 0)),
                  pl.BlockSpec((1, D), lambda i, hh: (0, 0)),
                  pl.BlockSpec((D, th), lambda i, hh: (0, hh)),
                  pl.BlockSpec((D, th), lambda i, hh: (0, hh)),
                  pl.BlockSpec((th, D), lambda i, hh: (hh, 0)),
                  pl.BlockSpec((1, D), lambda i, hh: (0, 0))],
        out_specs=pl.BlockSpec((tm, D), lambda i, hh: (i, 0)),
        scratch_shapes=[pltpu.VMEM((tm, D), jnp.float32),
                        pltpu.VMEM((tm, D), jnp.bfloat16)],
        compiler_params=pltpu.CompilerParams(
            dimension_semantics=("parallel", "arbitrary"),
            vmem_limit_bytes=vmem_limit),
    )(x2d, gate2d, norm1_w.reshape(1, D), w1, w3, w2, norm2_w.reshape(1, D))


# --------------------------- JAX glue -------------------------------------
def transformer_block(x, gate, rope_ang, params, n_heads, n_kv_heads):
    """x: (B,S,D) f32, gate: (B,S,1) f32, rope_ang: (S, head_dim//2) angles."""
    B, S, D = x.shape
    H, Hk = n_heads, n_kv_heads
    assert D % H == 0 and H % Hk == 0
    hd = D // H
    M = B * S
    Dq, Dk = H * hd, Hk * hd
    Nc = Dq + 2 * Dk
    Hn = params['w1'].shape[1]
    scale = 1.0 / math.sqrt(hd)

    x2 = x.reshape(M, D)
    g2 = gate.reshape(M, 1)

    # ---- per-generation tiling / VMEM budget --------------------------------
    vmem_cap = _vmem_cap_bytes()
    vmem_limit = int(min(vmem_cap * 3 // 4, 100 * 1024 * 1024))
    big_vmem = vmem_cap > 96 * 1024 * 1024                 # v5e/v6e: 128 MiB, v7x: 64 MiB
    wide = (512, 256, 128) if big_vmem else (256, 128)

    tm = _pick_tile(M, (128, 64, 32, 16, 8))
    tn_qkv = _pick_tile(Nc, tuple(t for t in wide if t % hd == 0))
    tq = _pick_tile(S, (256, 128, 64, 32, 16, 8))
    tkv = _pick_tile(S, (256, 128, 64, 32, 16, 8))
    tk_o = _pick_tile(Dq, wide)
    th = _pick_tile(Hn, wide)

    # ---- one-time weight / positional transforms (layout only) --------------
    # De-interleave the (even, odd) RoPE pairs inside every Q and K head of
    # wqkv so the in-kernel rotation is a rotate-half.  Applying the same
    # permutation to both q and k leaves q.k (and hence the block output)
    # exactly unchanged.  In a real model this is folded at weight-load time.
    half = hd // 2
    deint = jnp.concatenate([jnp.arange(0, hd, 2), jnp.arange(1, hd, 2)])
    q_perm = (jnp.arange(H)[:, None] * hd + deint[None, :]).reshape(-1)
    k_perm = Dq + (jnp.arange(Hk)[:, None] * hd + deint[None, :]).reshape(-1)
    v_cols = Dq + Dk + jnp.arange(Dk)
    wqkv_r = params['wqkv'][:, jnp.concatenate([q_perm, k_perm, v_cols])]

    cos2 = jnp.concatenate([jnp.cos(rope_ang), jnp.cos(rope_ang)], axis=-1)  # (S, hd)
    sin2 = jnp.concatenate([jnp.sin(rope_ang), jnp.sin(rope_ang)], axis=-1)
    cos_m = jnp.tile(cos2, (B, 1))                                           # (M, hd)
    sin_m = jnp.tile(sin2, (B, 1))

    # ---- kernel 1: RMSNorm + QKV + RoPE (+ 1/sqrt(hd) folded into Q) --------
    qkv = rmsnorm_qkv_rope(x2, params['pre_attn_norm'], wqkv_r, cos_m, sin_m,
                           tm=tm, tn=tn_qkv, hd=hd, d_q=Dq, d_qk=Dq + Dk,
                           scale=scale, vmem_limit=vmem_limit)

    # ---- kernel 2: grouped, Q-tiled, causally-skipped flash attention -------
    # NOTE: the reference's log(gate) score-mod is a per-query-row constant
    # added before softmax -> softmax row-invariant -> no effect; omitted.
    attn2 = flash_attention_qkv(qkv, B=B, S=S, H=H, Hk=Hk, hd=hd,
                                tq=tq, tk=tkv, vmem_limit=vmem_limit)

    # ---- kernel 3: wo + post-attn RMSNorm + gated residual ------------------
    x2 = proj_residual(x2, g2, attn2, params['wo'], params['post_attn_norm'],
                       tm=tm, tk=tk_o, vmem_limit=vmem_limit)

    # ---- kernel 4: pre-FFN RMSNorm + SwiGLU + post-FFN RMSNorm + residual ---
    out = ffn_residual(x2, g2, params['pre_ffn_norm'], params['w1'],
                       params['w3'], params['w2'], params['post_ffn_norm'],
                       tm=tm, th=th, vmem_limit=vmem_limit)
    return out.reshape(B, S, D)


# --------------------------- main ------------------------------------------
if __name__ == "__main__":
    # Small but TPU-layout-friendly config (head_dim = 128 keeps every lane
    # dimension vreg/MXU aligned, as in Llama-family models).
    B, S = 2, 16
    dim = 256
    n_heads = 2
    n_kv_heads = 1
    head_dim = dim // n_heads                     # 128
    multiple_of = 256
    hidden = int(2 * (4 * dim) / 3)
    hidden = multiple_of * ((hidden + multiple_of - 1) // multiple_of)  # 768

    key = jax.random.PRNGKey(0)
    keys = jax.random.split(key, 10)

    def init(k, shape):
        return jax.random.normal(k, shape, jnp.float32) * 0.02

    wq = init(keys[0], (dim, n_heads * head_dim))
    wk = init(keys[1], (dim, n_kv_heads * head_dim))
    wv = init(keys[2], (dim, n_kv_heads * head_dim))
    params = {
        'wqkv': jnp.concatenate([wq, wk, wv], axis=1).astype(jnp.bfloat16),
        'wo': init(keys[3], (n_heads * head_dim, dim)).astype(jnp.bfloat16),
        'w1': init(keys[4], (dim, hidden)).astype(jnp.bfloat16),
        'w3': init(keys[5], (dim, hidden)).astype(jnp.bfloat16),
        'w2': init(keys[6], (hidden, dim)).astype(jnp.bfloat16),
        'pre_attn_norm': jnp.ones((dim,), jnp.float32),
        'post_attn_norm': jnp.ones((dim,), jnp.float32),
        'pre_ffn_norm': jnp.ones((dim,), jnp.float32),
        'post_ffn_norm': jnp.ones((dim,), jnp.float32),
    }

    x = jax.random.normal(keys[7], (B, S, dim), jnp.float32)
    gate = jax.nn.sigmoid(jax.random.normal(keys[8], (B, S, 1), jnp.float32))

    # rotary angles (freqs_cis equivalent): theta = pos * inv_freq
    theta = 10000.0
    inv_freq = 1.0 / (theta ** (jnp.arange(0, head_dim, 2, dtype=jnp.float32)
                                / head_dim))
    pos = jnp.arange(S, dtype=jnp.float32)
    rope_ang = pos[:, None] * inv_freq[None, :]               # (S, hd//2)

    fwd = jax.jit(functools.partial(transformer_block,
                                    n_heads=n_heads, n_kv_heads=n_kv_heads))
    out = fwd(x, gate, rope_ang, params)
    jax.block_until_ready(out)
    assert out.shape == (B, S, dim) and out.dtype == jnp.float32
    print("KERNEL_OK")
</pallas_src>

<mosaic_0001>
module attributes {stable_mosaic.version = 11 : i64} {
  func.func @_rmsnorm_qkv_rope_kernel(%arg0: i32, %arg1: i32, %arg2: memref<32x256xf32, #tpu.memory_space<vmem>>, %arg3: memref<1x256xf32, #tpu.memory_space<vmem>>, %arg4: memref<256x512xbf16, #tpu.memory_space<vmem>>, %arg5: memref<32x128xf32, #tpu.memory_space<vmem>>, %arg6: memref<32x128xf32, #tpu.memory_space<vmem>>, %arg7: memref<32x512xbf16, #tpu.memory_space<vmem>>) attributes {dimension_semantics = [#tpu.dimension_semantics<parallel>, #tpu.dimension_semantics<parallel>], iteration_bounds = array<i64: 1, 1>, scalar_prefetch = 0 : i64, scratch_operands = 0 : i64, tpu.core_type = #tpu.core_type<tc>, window_params = [{transform_indices = @transform_0, window_bounds = array<i64: 32, 256>}, {pipeline_mode = #tpu.pipeline_mode<synchronous>, transform_indices = @transform_1, window_bounds = array<i64: 1, 256>}, {transform_indices = @transform_2, window_bounds = array<i64: 256, 512>}, {transform_indices = @transform_3, window_bounds = array<i64: 32, 128>}, {transform_indices = @transform_4, window_bounds = array<i64: 32, 128>}, {transform_indices = @transform_5, window_bounds = array<i64: 32, 512>}]} {
    %c0 = arith.constant 0 : index
    %c0_0 = arith.constant 0 : index
    %0 = vector.load %arg2[%c0, %c0_0] : memref<32x256xf32, #tpu.memory_space<vmem>>, vector<32x256xf32>
    %1 = arith.mulf %0, %0 : vector<32x256xf32>
    %cst = arith.constant dense<0.000000e+00> : vector<32xf32>
    %2 = vector.multi_reduction <add>, %1, %cst [1] : vector<32x256xf32> to vector<32xf32>
    %3 = vector.shape_cast %2 : vector<32xf32> to vector<32x1xf32>
    %cst_1 = arith.constant 2.560000e+02 : f32
    %4 = vector.broadcast %cst_1 : f32 to vector<32x1xf32>
    %5 = arith.divf %3, %4 : vector<32x1xf32>
    %cst_2 = arith.constant 9.99999974E-6 : f32
    %6 = vector.broadcast %cst_2 : f32 to vector<32x1xf32>
    %7 = arith.addf %5, %6 : vector<32x1xf32>
    %8 = math.rsqrt %7 : vector<32x1xf32>
    %9 = vector.broadcast %8 : vector<32x1xf32> to vector<32x256xf32>
    %10 = arith.mulf %0, %9 : vector<32x256xf32>
    %c0_3 = arith.constant 0 : index
    %c0_4 = arith.constant 0 : index
    %11 = vector.load %arg3[%c0_3, %c0_4] : memref<1x256xf32, #tpu.memory_space<vmem>>, vector<1x256xf32>
    %12 = vector.broadcast %11 : vector<1x256xf32> to vector<32x256xf32>
    %13 = arith.mulf %10, %12 : vector<32x256xf32>
    %14 = arith.truncf %13 : vector<32x256xf32> to vector<32x256xbf16>
    %c0_5 = arith.constant 0 : index
    %c0_6 = arith.constant 0 : index
    %15 = vector.load %arg4[%c0_5, %c0_6] : memref<256x512xbf16, #tpu.memory_space<vmem>>, vector<256x512xbf16>
    %cst_7 = arith.constant dense<0.000000e+00> : vector<32x512xf32>
    %16 = tpu.matmul %14, %15, %cst_7 {dimension_numbers = #tpu.dot_dimension_numbers<[1], [0], [0], [1], [0, 0, 1, 1], [], []>} : vector<32x256xbf16>, vector<256x512xbf16>, vector<32x512xf32> -> vector<32x512xf32>
    %c0_8 = arith.constant 0 : index
    %c0_9 = arith.constant 0 : index
    %17 = vector.load %arg5[%c0_8, %c0_9] : memref<32x128xf32, #tpu.memory_space<vmem>>, vector<32x128xf32>
    %c0_10 = arith.constant 0 : index
    %c0_11 = arith.constant 0 : index
    %18 = vector.load %arg6[%c0_10, %c0_11] : memref<32x128xf32, #tpu.memory_space<vmem>>, vector<32x128xf32>
    %19 = tpu.concatenate %17, %17, %17, %17 in 1 : vector<32x128xf32>, vector<32x128xf32>, vector<32x128xf32>, vector<32x128xf32> -> vector<32x512xf32>
    %20 = tpu.concatenate %18, %18, %18, %18 in 1 : vector<32x128xf32>, vector<32x128xf32>, vector<32x128xf32>, vector<32x128xf32> -> vector<32x512xf32>
    %21 = vector.extract_strided_slice %16 {offsets = [0, 0], sizes = [32, 128], strides = [1, 1]} : vector<32x512xf32> to vector<32x128xf32>
    %22 = vector.extract_strided_slice %21 {offsets = [0, 64], sizes = [32, 64], strides = [1, 1]} : vector<32x128xf32> to vector<32x64xf32>
    %cst_12 = arith.constant 0.000000e+00 : f32
    %23 = vector.broadcast %cst_12 : f32 to vector<32x64xf32>
    %24 = arith.subf %23, %22 : vector<32x64xf32>
    %25 = vector.extract_strided_slice %21 {offsets = [0, 0], sizes = [32, 64], strides = [1, 1]} : vector<32x128xf32> to vector<32x64xf32>
    %26 = tpu.concatenate %24, %25 in 1 : vector<32x64xf32>, vector<32x64xf32> -> vector<32x128xf32>
    %27 = vector.extract_strided_slice %16 {offsets = [0, 128], sizes = [32, 128], strides = [1, 1]} : vector<32x512xf32> to vector<32x128xf32>
    %28 = vector.extract_strided_slice %27 {offsets = [0, 64], sizes = [32, 64], strides = [1, 1]} : vector<32x128xf32> to vector<32x64xf32>
    %cst_13 = arith.constant 0.000000e+00 : f32
    %29 = vector.broadcast %cst_13 : f32 to vector<32x64xf32>
    %30 = arith.subf %29, %28 : vector<32x64xf32>
    %31 = vector.extract_strided_slice %27 {offsets = [0, 0], sizes = [32, 64], strides = [1, 1]} : vector<32x128xf32> to vector<32x64xf32>
    %32 = tpu.concatenate %30, %31 in 1 : vector<32x64xf32>, vector<32x64xf32> -> vector<32x128xf32>
    %33 = vector.extract_strided_slice %16 {offsets = [0, 256], sizes = [32, 128], strides = [1, 1]} : vector<32x512xf32> to vector<32x128xf32>
    %34 = vector.extract_strided_slice %33 {offsets = [0, 64], sizes = [32, 64], strides = [1, 1]} : vector<32x128xf32> to vector<32x64xf32>
    %cst_14 = arith.constant 0.000000e+00 : f32
    %35 = vector.broadcast %cst_14 : f32 to vector<32x64xf32>
    %36 = arith.subf %35, %34 : vector<32x64xf32>
    %37 = vector.extract_strided_slice %33 {offsets = [0, 0], sizes = [32, 64], strides = [1, 1]} : vector<32x128xf32> to vector<32x64xf32>
    %38 = tpu.concatenate %36, %37 in 1 : vector<32x64xf32>, vector<32x64xf32> -> vector<32x128xf32>
    %39 = vector.extract_strided_slice %16 {offsets = [0, 384], sizes = [32, 128], strides = [1, 1]} : vector<32x512xf32> to vector<32x128xf32>
    %40 = vector.extract_strided_slice %39 {offsets = [0, 64], sizes = [32, 64], strides = [1, 1]} : vector<32x128xf32> to vector<32x64xf32>
    %cst_15 = arith.constant 0.000000e+00 : f32
    %41 = vector.broadcast %cst_15 : f32 to vector<32x64xf32>
    %42 = arith.subf %41, %40 : vector<32x64xf32>
    %43 = vector.extract_strided_slice %39 {offsets = [0, 0], sizes = [32, 64], strides = [1, 1]} : vector<32x128xf32> to vector<32x64xf32>
    %44 = tpu.concatenate %42, %43 in 1 : vector<32x64xf32>, vector<32x64xf32> -> vector<32x128xf32>
    %45 = tpu.concatenate %26, %32, %38, %44 in 1 : vector<32x128xf32>, vector<32x128xf32>, vector<32x128xf32>, vector<32x128xf32> -> vector<32x512xf32>
    %46 = arith.mulf %16, %19 : vector<32x512xf32>
    %47 = arith.mulf %45, %20 : vector<32x512xf32>
    %48 = arith.addf %46, %47 : vector<32x512xf32>
    %c512_i32 = arith.constant 512 : i32
    %49 = arith.muli %arg1, %c512_i32 : i32
    %50 = tpu.iota {dimensions = array<i32: 1>} : vector<32x512xi32>
    %51 = vector.broadcast %49 : i32 to vector<32x512xi32>
    %52 = arith.addi %51, %50 : vector<32x512xi32>
    %c384_i32 = arith.constant 384 : i32
    %53 = vector.broadcast %c384_i32 : i32 to vector<32x512xi32>
    %54 = arith.cmpi slt, %52, %53 : vector<32x512xi32>
    %55 = arith.select %54, %48, %16 : vector<32x512xi1>, vector<32x512xf32>
    %c256_i32 = arith.constant 256 : i32
    %56 = vector.broadcast %c256_i32 : i32 to vector<32x512xi32>
    %57 = arith.cmpi slt, %52, %56 : vector<32x512xi32>
    %cst_16 = arith.constant 0.0883883461 : f32
    %58 = vector.broadcast %cst_16 : f32 to vector<32x512xf32>
    %59 = arith.mulf %55, %58 : vector<32x512xf32>
    %60 = arith.select %57, %59, %55 : vector<32x512xi1>, vector<32x512xf32>
    %61 = arith.truncf %60 : vector<32x512xf32> to vector<32x512xbf16>
    %c0_17 = arith.constant 0 : index
    %c0_18 = arith.constant 0 : index
    %62 = vector.load %arg7[%c0_17, %c0_18] : memref<32x512xbf16, #tpu.memory_space<vmem>>, vector<32x512xbf16>
    tpu.vector_store %arg7[%c0_17, %c0_18], %61 {strides = array<i32>} : memref<32x512xbf16, #tpu.memory_space<vmem>>, vector<32x512xbf16>,
    return
  }
  func.func @transform_0(%arg0: i32, %arg1: i32) -> (i32, i32) {
    %c0_i32 = arith.constant 0 : i32
    %c0_i32_0 = arith.constant 0 : i32
    return %arg0, %c0_i32 : i32, i32
  }
  func.func @transform_1(%arg0: i32, %arg1: i32) -> (i32, i32) {
    %c0_i32 = arith.constant 0 : i32
    %c0_i32_0 = arith.constant 0 : i32
    %c0_i32_1 = arith.constant 0 : i32
    return %c0_i32, %c0_i32_0 : i32, i32
  }
  func.func @transform_2(%arg0: i32, %arg1: i32) -> (i32, i32) {
    %c0_i32 = arith.constant 0 : i32
    %c0_i32_0 = arith.constant 0 : i32
    return %c0_i32, %arg1 : i32, i32
  }
  func.func @transform_3(%arg0: i32, %arg1: i32) -> (i32, i32) {
    %c0_i32 = arith.constant 0 : i32
    %c0_i32_0 = arith.constant 0 : i32
    return %arg0, %c0_i32 : i32, i32
  }
  func.func @transform_4(%arg0: i32, %arg1: i32) -> (i32, i32) {
    %c0_i32 = arith.constant 0 : i32
    %c0_i32_0 = arith.constant 0 : i32
    return %arg0, %c0_i32 : i32, i32
  }
  func.func @transform_5(%arg0: i32, %arg1: i32) -> (i32, i32) {
    %c0_i32 = arith.constant 0 : i32
    return %arg0, %arg1 : i32, i32
  }
}

module attributes {stable_mosaic.version = 11 : i64} {
  func.func @_flash_attn_kernel(%arg0: i32, %arg1: i32, %arg2: i32, %arg3: i32, %arg4: memref<16x256xbf16, #tpu.memory_space<vmem>>, %arg5: memref<16x128xbf16, #tpu.memory_space<vmem>>, %arg6: memref<16x128xbf16, #tpu.memory_space<vmem>>, %arg7: memref<16x256xbf16, #tpu.memory_space<vmem>>, %arg8: memref<2x16x1xf32, #tpu.memory_space<vmem>>, %arg9: memref<2x16x1xf32, #tpu.memory_space<vmem>>, %arg10: memref<16x256xf32, #tpu.memory_space<vmem>>) attributes {dimension_semantics = [#tpu.dimension_semantics<parallel>, #tpu.dimension_semantics<parallel>, #tpu.dimension_semantics<parallel>, #tpu.dimension_semantics<arbitrary>], iteration_bounds = array<i64: 2, 1, 1, 1>, scalar_prefetch = 0 : i64, scratch_operands = 3 : i64, tpu.core_type = #tpu.core_type<tc>, window_params = [{transform_indices = @transform_0, window_bounds = array<i64: 16, 256>}, {transform_indices = @transform_1, window_bounds = array<i64: 16, 128>}, {transform_indices = @transform_2, window_bounds = array<i64: 16, 128>}, {transform_indices = @transform_3, window_bounds = array<i64: 16, 256>}]} {
    %c0_i32 = arith.constant 0 : i32
    %0 = arith.cmpi eq, %arg3, %c0_i32 : i32
    %1 = arith.extui %0 : i1 to i32
    %c0_i32_0 = arith.constant 0 : i32
    %2 = arith.cmpi ne, %1, %c0_i32_0 : i32
    scf.if %2 {
      %cst = arith.constant 0xFF800000 : f32
      %12 = vector.broadcast %cst : f32 to vector<2x16x1xf32>
      %c0 = arith.constant 0 : index
      %c0_5 = arith.constant 0 : index
      %c0_6 = arith.constant 0 : index
      %13 = vector.load %arg8[%c0, %c0_5, %c0_6] : memref<2x16x1xf32, #tpu.memory_space<vmem>>, vector<2x16x1xf32>
      tpu.vector_store %arg8[%c0, %c0_5, %c0_6], %12 {strides = array<i32>} : memref<2x16x1xf32, #tpu.memory_space<vmem>>, vector<2x16x1xf32>,
      %cst_7 = arith.constant 0.000000e+00 : f32
      %14 = vector.broadcast %cst_7 : f32 to vector<2x16x1xf32>
      %c0_8 = arith.constant 0 : index
      %c0_9 = arith.constant 0 : index
      %c0_10 = arith.constant 0 : index
      %15 = vector.load %arg9[%c0_8, %c0_9, %c0_10] : memref<2x16x1xf32, #tpu.memory_space<vmem>>, vector<2x16x1xf32>
      tpu.vector_store %arg9[%c0_8, %c0_9, %c0_10], %14 {strides = array<i32>} : memref<2x16x1xf32, #tpu.memory_space<vmem>>, vector<2x16x1xf32>,
      %cst_11 = arith.constant 0.000000e+00 : f32
      %16 = vector.broadcast %cst_11 : f32 to vector<16x256xf32>
      %c0_12 = arith.constant 0 : index
      %c0_13 = arith.constant 0 : index
      %17 = vector.load %arg10[%c0_12, %c0_13] : memref<16x256xf32, #tpu.memory_space<vmem>>, vector<16x256xf32>
      tpu.vector_store %arg10[%c0_12, %c0_13], %16 {strides = array<i32>} : memref<16x256xf32, #tpu.memory_space<vmem>>, vector<16x256xf32>,
    } else {
    }
    %c16_i32 = arith.constant 16 : i32
    %3 = arith.muli %arg3, %c16_i32 : i32
    %c16_i32_1 = arith.constant 16 : i32
    %4 = arith.muli %arg2, %c16_i32_1 : i32
    %c15_i32 = arith.constant 15 : i32
    %5 = arith.addi %4, %c15_i32 : i32
    %6 = arith.cmpi sle, %3, %5 : i32
    %7 = arith.extui %6 : i1 to i32
    %c0_i32_2 = arith.constant 0 : i32
    %8 = arith.cmpi ne, %7, %c0_i32_2 : i32
    scf.if %8 {
      %c0 = arith.constant 0 : index
      %c0_5 = arith.constant 0 : index
      %12 = vector.load %arg5[%c0, %c0_5] : memref<16x128xbf16, #tpu.memory_space<vmem>>, vector<16x128xbf16>
      %c0_6 = arith.constant 0 : index
      %c0_7 = arith.constant 0 : index
      %13 = vector.load %arg6[%c0_6, %c0_7] : memref<16x128xbf16, #tpu.memory_space<vmem>>, vector<16x128xbf16>
      %c16_i32_8 = arith.constant 16 : i32
      %14 = arith.muli %arg2, %c16_i32_8 : i32
      %15 = tpu.iota {dimensions = array<i32: 0>} : vector<16x16xi32>
      %16 = vector.broadcast %14 : i32 to vector<16x16xi32>
      %17 = arith.addi %16, %15 : vector<16x16xi32>
      %c16_i32_9 = arith.constant 16 : i32
      %18 = arith.muli %arg3, %c16_i32_9 : i32
      %19 = tpu.iota {dimensions = array<i32: 1>} : vector<16x16xi32>
      %20 = vector.broadcast %18 : i32 to vector<16x16xi32>
      %21 = arith.addi %20, %19 : vector<16x16xi32>
      %22 = arith.cmpi sle, %21, %17 : vector<16x16xi32>
      %c0_10 = arith.constant 0 : index
      %c0_11 = arith.constant 0 : index
      %23 = vector.load %arg4[%c0_10, %c0_11] : memref<16x256xbf16, #tpu.memory_space<vmem>>, vector<16x128xbf16>
      %cst = arith.constant dense<0.000000e+00> : vector<16x16xf32>
      %24 = tpu.matmul %23, %12, %cst {dimension_numbers = #tpu.dot_dimension_numbers<[1], [1], [0], [0], [0, 0, 1, 0], [], []>} : vector<16x128xbf16>, vector<16x128xbf16>, vector<16x16xf32> -> vector<16x16xf32>
      %cst_12 = arith.constant -1.000000e+30 : f32
      %25 = vector.broadcast %cst_12 : f32 to vector<16x16xf32>
      %26 = arith.select %22, %24, %25 : vector<16x16xi1>, vector<16x16xf32>
      %c0_13 = arith.constant 0 : index
      %c0_14 = arith.constant 0 : index
      %c0_15 = arith.constant 0 : index
      %27 = vector.load %arg8[%c0_13, %c0_14, %c0_15] : memref<2x16x1xf32, #tpu.memory_space<vmem>>, vector<1x16x1xf32>
      %28 = vector.shape_cast %27 : vector<1x16x1xf32> to vector<16x1xf32>
      %cst_16 = arith.constant dense<0xFF800000> : vector<16xf32>
      %29 = vector.multi_reduction <maximumf>, %26, %cst_16 [1] : vector<16x16xf32> to vector<16xf32>
      %30 = vector.shape_cast %29 : vector<16xf32> to vector<16x1xf32>
      %31 = arith.maximumf %28, %30 : vector<16x1xf32>
      %32 = arith.subf %28, %31 : vector<16x1xf32>
      %33 = math.exp %32 : vector<16x1xf32>
      %34 = vector.broadcast %31 : vector<16x1xf32> to vector<16x16xf32>
      %35 = arith.subf %26, %34 : vector<16x16xf32>
      %36 = math.exp %35 : vector<16x16xf32>
      %c0_17 = arith.constant 0 : index
      %c0_18 = arith.constant 0 : index
      %c0_19 = arith.constant 0 : index
      %37 = vector.load %arg9[%c0_17, %c0_18, %c0_19] : memref<2x16x1xf32, #tpu.memory_space<vmem>>, vector<1x16x1xf32>
      %38 = vector.shape_cast %37 : vector<1x16x1xf32> to vector<16x1xf32>
      %39 = arith.mulf %33, %38 : vector<16x1xf32>
      %cst_20 = arith.constant dense<0.000000e+00> : vector<16xf32>
      %40 = vector.multi_reduction <add>, %36, %cst_20 [1] : vector<16x16xf32> to vector<16xf32>
      %41 = vector.shape_cast %40 : vector<16xf32> to vector<16x1xf32>
      %42 = arith.addf %39, %41 : vector<16x1xf32>
      %c0_21 = arith.constant 0 : index
      %c0_22 = arith.constant 0 : index
      %c0_23 = arith.constant 0 : index
      %43 = vector.load %arg9[%c0_21, %c0_22, %c0_23] : memref<2x16x1xf32, #tpu.memory_space<vmem>>, vector<1x16x1xf32>
      %44 = vector.shape_cast %43 : vector<1x16x1xf32> to vector<16x1xf32>
      %45 = vector.shape_cast %42 : vector<16x1xf32> to vector<1x16x1xf32>
      tpu.vector_store %arg9[%c0_21, %c0_22, %c0_23], %45 {strides = array<i32>} : memref<2x16x1xf32, #tpu.memory_space<vmem>>, vector<1x16x1xf32>,
      %c0_24 = arith.constant 0 : index
      %c0_25 = arith.constant 0 : index
      %46 = vector.load %arg10[%c0_24, %c0_25] : memref<16x256xf32, #tpu.memory_space<vmem>>, vector<16x128xf32>
      %47 = vector.broadcast %33 : vector<16x1xf32> to vector<16x128xf32>
      %48 = arith.mulf %47, %46 : vector<16x128xf32>
      %49 = arith.truncf %36 : vector<16x16xf32> to vector<16x16xbf16>
      %cst_26 = arith.constant dense<0.000000e+00> : vector<16x128xf32>
      %50 = tpu.matmul %49, %13, %cst_26 {dimension_numbers = #tpu.dot_dimension_numbers<[1], [0], [0], [1], [0, 0, 1, 1], [], []>} : vector<16x16xbf16>, vector<16x128xbf16>, vector<16x128xf32> -> vector<16x128xf32>
      %51 = arith.addf %48, %50 : vector<16x128xf32>
      %c0_27 = arith.constant 0 : index
      %c0_28 = arith.constant 0 : index
      %52 = vector.load %arg10[%c0_27, %c0_28] : memref<16x256xf32, #tpu.memory_space<vmem>>, vector<16x128xf32>
      tpu.vector_store %arg10[%c0_27, %c0_28], %51 {strides = array<i32>} : memref<16x256xf32, #tpu.memory_space<vmem>>, vector<16x128xf32>,
      %c0_29 = arith.constant 0 : index
      %c0_30 = arith.constant 0 : index
      %c0_31 = arith.constant 0 : index
      %53 = vector.load %arg8[%c0_29, %c0_30, %c0_31] : memref<2x16x1xf32, #tpu.memory_space<vmem>>, vector<1x16x1xf32>
      %54 = vector.shape_cast %53 : vector<1x16x1xf32> to vector<16x1xf32>
      %55 = vector.shape_cast %31 : vector<16x1xf32> to vector<1x16x1xf32>
      tpu.vector_store %arg8[%c0_29, %c0_30, %c0_31], %55 {strides = array<i32>} : memref<2x16x1xf32, #tpu.memory_space<vmem>>, vector<1x16x1xf32>,
      %c0_32 = arith.constant 0 : index
      %c128 = arith.constant 128 : index
      %56 = vector.load %arg4[%c0_32, %c128] : memref<16x256xbf16, #tpu.memory_space<vmem>>, vector<16x128xbf16>
      %cst_33 = arith.constant dense<0.000000e+00> : vector<16x16xf32>
      %57 = tpu.matmul %56, %12, %cst_33 {dimension_numbers = #tpu.dot_dimension_numbers<[1], [1], [0], [0], [0, 0, 1, 0], [], []>} : vector<16x128xbf16>, vector<16x128xbf16>, vector<16x16xf32> -> vector<16x16xf32>
      %cst_34 = arith.constant -1.000000e+30 : f32
      %58 = vector.broadcast %cst_34 : f32 to vector<16x16xf32>
      %59 = arith.select %22, %57, %58 : vector<16x16xi1>, vector<16x16xf32>
      %c1 = arith.constant 1 : index
      %c0_35 = arith.constant 0 : index
      %c0_36 = arith.constant 0 : index
      %60 = vector.load %arg8[%c1, %c0_35, %c0_36] : memref<2x16x1xf32, #tpu.memory_space<vmem>>, vector<1x16x1xf32>
      %61 = vector.shape_cast %60 : vector<1x16x1xf32> to vector<16x1xf32>
      %cst_37 = arith.constant dense<0xFF800000> : vector<16xf32>
      %62 = vector.multi_reduction <maximumf>, %59, %cst_37 [1] : vector<16x16xf32> to vector<16xf32>
      %63 = vector.shape_cast %62 : vector<16xf32> to vector<16x1xf32>
      %64 = arith.maximumf %61, %63 : vector<16x1xf32>
      %65 = arith.subf %61, %64 : vector<16x1xf32>
      %66 = math.exp %65 : vector<16x1xf32>
      %67 = vector.broadcast %64 : vector<16x1xf32> to vector<16x16xf32>
      %68 = arith.subf %59, %67 : vector<16x16xf32>
      %69 = math.exp %68 : vector<16x16xf32>
      %c1_38 = arith.constant 1 : index
      %c0_39 = arith.constant 0 : index
      %c0_40 = arith.constant 0 : index
      %70 = vector.load %arg9[%c1_38, %c0_39, %c0_40] : memref<2x16x1xf32, #tpu.memory_space<vmem>>, vector<1x16x1xf32>
      %71 = vector.shape_cast %70 : vector<1x16x1xf32> to vector<16x1xf32>
      %72 = arith.mulf %66, %71 : vector<16x1xf32>
      %cst_41 = arith.constant dense<0.000000e+00> : vector<16xf32>
      %73 = vector.multi_reduction <add>, %69, %cst_41 [1] : vector<16x16xf32> to vector<16xf32>
      %74 = vector.shape_cast %73 : vector<16xf32> to vector<16x1xf32>
      %75 = arith.addf %72, %74 : vector<16x1xf32>
      %c1_42 = arith.constant 1 : index
      %c0_43 = arith.constant 0 : index
      %c0_44 = arith.constant 0 : index
      %76 = vector.load %arg9[%c1_42, %c0_43, %c0_44] : memref<2x16x1xf32, #tpu.memory_space<vmem>>, vector<1x16x1xf32>
      %77 = vector.shape_cast %76 : vector<1x16x1xf32> to vector<16x1xf32>
      %78 = vector.shape_cast %75 : vector<16x1xf32> to vector<1x16x1xf32>
      tpu.vector_store %arg9[%c1_42, %c0_43, %c0_44], %78 {strides = array<i32>} : memref<2x16x1xf32, #tpu.memory_space<vmem>>, vector<1x16x1xf32>,
      %c0_45 = arith.constant 0 : index
      %c128_46 = arith.constant 128 : index
      %79 = vector.load %arg10[%c0_45, %c128_46] : memref<16x256xf32, #tpu.memory_space<vmem>>, vector<16x128xf32>
      %80 = vector.broadcast %66 : vector<16x1xf32> to vector<16x128xf32>
      %81 = arith.mulf %80, %79 : vector<16x128xf32>
      %82 = arith.truncf %69 : vector<16x16xf32> to vector<16x16xbf16>
      %cst_47 = arith.constant dense<0.000000e+00> : vector<16x128xf32>
      %83 = tpu.matmul %82, %13, %cst_47 {dimension_numbers = #tpu.dot_dimension_numbers<[1], [0], [0], [1], [0, 0, 1, 1], [], []>} : vector<16x16xbf16>, vector<16x128xbf16>, vector<16x128xf32> -> vector<16x128xf32>
      %84 = arith.addf %81, %83 : vector<16x128xf32>
      %c0_48 = arith.constant 0 : index
      %c128_49 = arith.constant 128 : index
      %85 = vector.load %arg10[%c0_48, %c128_49] : memref<16x256xf32, #tpu.memory_space<vmem>>, vector<16x128xf32>
      tpu.vector_store %arg10[%c0_48, %c128_49], %84 {strides = array<i32>} : memref<16x256xf32, #tpu.memory_space<vmem>>, vector<16x128xf32>,
      %c1_50 = arith.constant 1 : index
      %c0_51 = arith.constant 0 : index
      %c0_52 = arith.constant 0 : index
      %86 = vector.load %arg8[%c1_50, %c0_51, %c0_52] : memref<2x16x1xf32, #tpu.memory_space<vmem>>, vector<1x16x1xf32>
      %87 = vector.shape_cast %86 : vector<1x16x1xf32> to vector<16x1xf32>
      %88 = vector.shape_cast %64 : vector<16x1xf32> to vector<1x16x1xf32>
      tpu.vector_store %arg8[%c1_50, %c0_51, %c0_52], %88 {strides = array<i32>} : memref<2x16x1xf32, #tpu.memory_space<vmem>>, vector<1x16x1xf32>,
    } else {
    }
    %c0_i32_3 = arith.constant 0 : i32
    %9 = arith.cmpi eq, %arg3, %c0_i32_3 : i32
    %10 = arith.extui %9 : i1 to i32
    %c0_i32_4 = arith.constant 0 : i32
    %11 = arith.cmpi ne, %10, %c0_i32_4 : i32
    scf.if %11 {
      %c0 = arith.constant 0 : index
      %c0_5 = arith.constant 0 : index
      %c0_6 = arith.constant 0 : index
      %12 = vector.load %arg9[%c0, %c0_5, %c0_6] : memref<2x16x1xf32, #tpu.memory_space<vmem>>, vector<1x16x1xf32>
      %13 = vector.shape_cast %12 : vector<1x16x1xf32> to vector<16x1xf32>
      %14 = tpu.reciprocal %13 {approx = true} : vector<16x1xf32> -> vector<16x1xf32>
      %c0_7 = arith.constant 0 : index
      %c0_8 = arith.constant 0 : index
      %15 = vector.load %arg10[%c0_7, %c0_8] : memref<16x256xf32, #tpu.memory_space<vmem>>, vector<16x128xf32>
      %16 = vector.broadcast %14 : vector<16x1xf32> to vector<16x128xf32>
      %17 = arith.mulf %15, %16 : vector<16x128xf32>
      %18 = arith.truncf %17 : vector<16x128xf32> to vector<16x128xbf16>
      %c0_9 = arith.constant 0 : index
      %c0_10 = arith.constant 0 : index
      %19 = vector.load %arg7[%c0_9, %c0_10] : memref<16x256xbf16, #tpu.memory_space<vmem>>, vector<16x128xbf16>
      tpu.vector_store %arg7[%c0_9, %c0_10], %18 {strides = array<i32>} : memref<16x256xbf16, #tpu.memory_space<vmem>>, vector<16x128xbf16>,
      %c1 = arith.constant 1 : index
      %c0_11 = arith.constant 0 : index
      %c0_12 = arith.constant 0 : index
      %20 = vector.load %arg9[%c1, %c0_11, %c0_12] : memref<2x16x1xf32, #tpu.memory_space<vmem>>, vector<1x16x1xf32>
      %21 = vector.shape_cast %20 : vector<1x16x1xf32> to vector<16x1xf32>
      %22 = tpu.reciprocal %21 {approx = true} : vector<16x1xf32> -> vector<16x1xf32>
      %c0_13 = arith.constant 0 : index
      %c128 = arith.constant 128 : index
      %23 = vector.load %arg10[%c0_13, %c128] : memref<16x256xf32, #tpu.memory_space<vmem>>, vector<16x128xf32>
      %24 = vector.broadcast %22 : vector<16x1xf32> to vector<16x128xf32>
      %25 = arith.mulf %23, %24 : vector<16x128xf32>
      %26 = arith.truncf %25 : vector<16x128xf32> to vector<16x128xbf16>
      %c0_14 = arith.constant 0 : index
      %c128_15 = arith.constant 128 : index
      %27 = vector.load %arg7[%c0_14, %c128_15] : memref<16x256xbf16, #tpu.memory_space<vmem>>, vector<16x128xbf16>
      tpu.vector_store %arg7[%c0_14, %c128_15], %26 {strides = array<i32>} : memref<16x256xbf16, #tpu.memory_space<vmem>>, vector<16x128xbf16>,
    } else {
    }
    return
  }
  func.func @transform_0(%arg0: i32, %arg1: i32, %arg2: i32, %arg3: i32) -> (i32, i32) {
    %c1_i32 = arith.constant 1 : i32
    %0 = arith.muli %arg0, %c1_i32 : i32
    %1 = arith.addi %0, %arg2 : i32
    %c0_i32 = arith.constant 0 : i32
    return %1, %arg1 : i32, i32
  }
  func.func @transform_1(%arg0: i32, %arg1: i32, %arg2: i32, %arg3: i32) -> (i32, i32) {
    %c1_i32 = arith.constant 1 : i32
    %0 = arith.muli %arg0, %c1_i32 : i32
    %1 = arith.addi %0, %arg3 : i32
    %c2_i32 = arith.constant 2 : i32
    %2 = arith.addi %c2_i32, %arg1 : i32
    %c0_i32 = arith.constant 0 : i32
    return %1, %2 : i32, i32
  }
  func.func @transform_2(%arg0: i32, %arg1: i32, %arg2: i32, %arg3: i32) -> (i32, i32) {
    %c1_i32 = arith.constant 1 : i32
    %0 = arith.muli %arg0, %c1_i32 : i32
    %1 = arith.addi %0, %arg3 : i32
    %c3_i32 = arith.constant 3 : i32
    %2 = arith.addi %c3_i32, %arg1 : i32
    %c0_i32 = arith.constant 0 : i32
    return %1, %2 : i32, i32
  }
  func.func @transform_3(%arg0: i32, %arg1: i32, %arg2: i32, %arg3: i32) -> (i32, i32) {
    %c1_i32 = arith.constant 1 : i32
    %0 = arith.muli %arg0, %c1_i32 : i32
    %1 = arith.addi %0, %arg2 : i32
    %c0_i32 = arith.constant 0 : i32
    return %1, %arg1 : i32, i32
  }
}

module attributes {stable_mosaic.version = 11 : i64} {
  func.func @_proj_residual_kernel(%arg0: i32, %arg1: i32, %arg2: memref<32x256xbf16, #tpu.memory_space<vmem>>, %arg3: memref<256x256xbf16, #tpu.memory_space<vmem>>, %arg4: memref<32x256xf32, #tpu.memory_space<vmem>>, %arg5: memref<32x1xf32, #tpu.memory_space<vmem>>, %arg6: memref<1x256xf32, #tpu.memory_space<vmem>>, %arg7: memref<32x256xf32, #tpu.memory_space<vmem>>, %arg8: memref<32x256xf32, #tpu.memory_space<vmem>>) attributes {dimension_semantics = [#tpu.dimension_semantics<parallel>, #tpu.dimension_semantics<arbitrary>], iteration_bounds = array<i64: 1, 1>, scalar_prefetch = 0 : i64, scratch_operands = 1 : i64, tpu.core_type = #tpu.core_type<tc>, window_params = [{transform_indices = @transform_0, window_bounds = array<i64: 32, 256>}, {transform_indices = @transform_1, window_bounds = array<i64: 256, 256>}, {transform_indices = @transform_2, window_bounds = array<i64: 32, 256>}, {transform_indices = @transform_3, window_bounds = array<i64: 32, 1>}, {pipeline_mode = #tpu.pipeline_mode<synchronous>, transform_indices = @transform_4, window_bounds = array<i64: 1, 256>}, {transform_indices = @transform_5, window_bounds = array<i64: 32, 256>}]} {
    %c0_i32 = arith.constant 0 : i32
    %0 = arith.cmpi eq, %arg1, %c0_i32 : i32
    %1 = arith.extui %0 : i1 to i32
    %c0_i32_0 = arith.constant 0 : i32
    %2 = arith.cmpi ne, %1, %c0_i32_0 : i32
    scf.if %2 {
      %cst_10 = arith.constant 0.000000e+00 : f32
      %12 = vector.broadcast %cst_10 : f32 to vector<32x256xf32>
      %c0_11 = arith.constant 0 : index
      %c0_12 = arith.constant 0 : index
      %13 = vector.load %arg8[%c0_11, %c0_12] : memref<32x256xf32, #tpu.memory_space<vmem>>, vector<32x256xf32>
      tpu.vector_store %arg8[%c0_11, %c0_12], %12 {strides = array<i32>} : memref<32x256xf32, #tpu.memory_space<vmem>>, vector<32x256xf32>,
    } else {
    }
    %c0 = arith.constant 0 : index
    %c0_1 = arith.constant 0 : index
    %3 = vector.load %arg8[%c0, %c0_1] : memref<32x256xf32, #tpu.memory_space<vmem>>, vector<32x256xf32>
    %c0_2 = arith.constant 0 : index
    %c0_3 = arith.constant 0 : index
    %4 = vector.load %arg2[%c0_2, %c0_3] : memref<32x256xbf16, #tpu.memory_space<vmem>>, vector<32x256xbf16>
    %c0_4 = arith.constant 0 : index
    %c0_5 = arith.constant 0 : index
    %5 = vector.load %arg3[%c0_4, %c0_5] : memref<256x256xbf16, #tpu.memory_space<vmem>>, vector<256x256xbf16>
    %cst = arith.constant dense<0.000000e+00> : vector<32x256xf32>
    %6 = tpu.matmul %4, %5, %cst {dimension_numbers = #tpu.dot_dimension_numbers<[1], [0], [0], [1], [0, 0, 1, 1], [], []>} : vector<32x256xbf16>, vector<256x256xbf16>, vector<32x256xf32> -> vector<32x256xf32>
    %7 = arith.addf %3, %6 : vector<32x256xf32>
    %c0_6 = arith.constant 0 : index
    %c0_7 = arith.constant 0 : index
    %8 = vector.load %arg8[%c0_6, %c0_7] : memref<32x256xf32, #tpu.memory_space<vmem>>, vector<32x256xf32>
    tpu.vector_store %arg8[%c0_6, %c0_7], %7 {strides = array<i32>} : memref<32x256xf32, #tpu.memory_space<vmem>>, vector<32x256xf32>,
    %c0_i32_8 = arith.constant 0 : i32
    %9 = arith.cmpi eq, %arg1, %c0_i32_8 : i32
    %10 = arith.extui %9 : i1 to i32
    %c0_i32_9 = arith.constant 0 : i32
    %11 = arith.cmpi ne, %10, %c0_i32_9 : i32
    scf.if %11 {
      %c0_10 = arith.constant 0 : index
      %c0_11 = arith.constant 0 : index
      %12 = vector.load %arg8[%c0_10, %c0_11] : memref<32x256xf32, #tpu.memory_space<vmem>>, vector<32x256xf32>
      %13 = arith.mulf %12, %12 : vector<32x256xf32>
      %cst_12 = arith.constant dense<0.000000e+00> : vector<32xf32>
      %14 = vector.multi_reduction <add>, %13, %cst_12 [1] : vector<32x256xf32> to vector<32xf32>
      %15 = vector.shape_cast %14 : vector<32xf32> to vector<32x1xf32>
      %cst_13 = arith.constant 2.560000e+02 : f32
      %16 = vector.broadcast %cst_13 : f32 to vector<32x1xf32>
      %17 = arith.divf %15, %16 : vector<32x1xf32>
      %cst_14 = arith.constant 9.99999974E-6 : f32
      %18 = vector.broadcast %cst_14 : f32 to vector<32x1xf32>
      %19 = arith.addf %17, %18 : vector<32x1xf32>
      %20 = math.rsqrt %19 : vector<32x1xf32>
      %21 = vector.broadcast %20 : vector<32x1xf32> to vector<32x256xf32>
      %22 = arith.mulf %12, %21 : vector<32x256xf32>
      %c0_15 = arith.constant 0 : index
      %c0_16 = arith.constant 0 : index
      %23 = vector.load %arg6[%c0_15, %c0_16] : memref<1x256xf32, #tpu.memory_space<vmem>>, vector<1x256xf32>
      %24 = vector.broadcast %23 : vector<1x256xf32> to vector<32x256xf32>
      %25 = arith.mulf %22, %24 : vector<32x256xf32>
      %c0_17 = arith.constant 0 : index
      %c0_18 = arith.constant 0 : index
      %26 = vector.load %arg4[%c0_17, %c0_18] : memref<32x256xf32, #tpu.memory_space<vmem>>, vector<32x256xf32>
      %c0_19 = arith.constant 0 : index
      %c0_20 = arith.constant 0 : index
      %27 = vector.load %arg5[%c0_19, %c0_20] : memref<32x1xf32, #tpu.memory_space<vmem>>, vector<32x1xf32>
      %28 = vector.broadcast %27 : vector<32x1xf32> to vector<32x256xf32>
      %29 = arith.mulf %28, %25 : vector<32x256xf32>
      %30 = arith.addf %26, %29 : vector<32x256xf32>
      %c0_21 = arith.constant 0 : index
      %c0_22 = arith.constant 0 : index
      %31 = vector.load %arg7[%c0_21, %c0_22] : memref<32x256xf32, #tpu.memory_space<vmem>>, vector<32x256xf32>
      tpu.vector_store %arg7[%c0_21, %c0_22], %30 {strides = array<i32>} : memref<32x256xf32, #tpu.memory_space<vmem>>, vector<32x256xf32>,
    } else {
    }
    return
  }
  func.func @transform_0(%arg0: i32, %arg1: i32) -> (i32, i32) {
    %c0_i32 = arith.constant 0 : i32
    return %arg0, %arg1 : i32, i32
  }
  func.func @transform_1(%arg0: i32, %arg1: i32) -> (i32, i32) {
    %c0_i32 = arith.constant 0 : i32
    %c0_i32_0 = arith.constant 0 : i32
    return %arg1, %c0_i32 : i32, i32
  }
  func.func @transform_2(%arg0: i32, %arg1: i32) -> (i32, i32) {
    %c0_i32 = arith.constant 0 : i32
    %c0_i32_0 = arith.constant 0 : i32
    return %arg0, %c0_i32 : i32, i32
  }
  func.func @transform_3(%arg0: i32, %arg1: i32) -> (i32, i32) {
    %c0_i32 = arith.constant 0 : i32
    %c0_i32_0 = arith.constant 0 : i32
    return %arg0, %c0_i32 : i32, i32
  }
  func.func @transform_4(%arg0: i32, %arg1: i32) -> (i32, i32) {
    %c0_i32 = arith.constant 0 : i32
    %c0_i32_0 = arith.constant 0 : i32
    %c0_i32_1 = arith.constant 0 : i32
    return %c0_i32, %c0_i32_0 : i32, i32
  }
  func.func @transform_5(%arg0: i32, %arg1: i32) -> (i32, i32) {
    %c0_i32 = arith.constant 0 : i32
    %c0_i32_0 = arith.constant 0 : i32
    return %arg0, %c0_i32 : i32, i32
  }
}

module attributes {stable_mosaic.version = 11 : i64} {
  func.func @_ffn_residual_kernel(%arg0: i32, %arg1: i32, %arg2: memref<32x256xf32, #tpu.memory_space<vmem>>, %arg3: memref<32x1xf32, #tpu.memory_space<vmem>>, %arg4: memref<1x256xf32, #tpu.memory_space<vmem>>, %arg5: memref<256x256xbf16, #tpu.memory_space<vmem>>, %arg6: memref<256x256xbf16, #tpu.memory_space<vmem>>, %arg7: memref<256x256xbf16, #tpu.memory_space<vmem>>, %arg8: memref<1x256xf32, #tpu.memory_space<vmem>>, %arg9: memref<32x256xf32, #tpu.memory_space<vmem>>, %arg10: memref<32x256xf32, #tpu.memory_space<vmem>>, %arg11: memref<32x256xbf16, #tpu.memory_space<vmem>>) attributes {dimension_semantics = [#tpu.dimension_semantics<parallel>, #tpu.dimension_semantics<arbitrary>], iteration_bounds = array<i64: 1, 3>, scalar_prefetch = 0 : i64, scratch_operands = 2 : i64, tpu.core_type = #tpu.core_type<tc>, window_params = [{transform_indices = @transform_0, window_bounds = array<i64: 32, 256>}, {transform_indices = @transform_1, window_bounds = array<i64: 32, 1>}, {pipeline_mode = #tpu.pipeline_mode<synchronous>, transform_indices = @transform_2, window_bounds = array<i64: 1, 256>}, {transform_indices = @transform_3, window_bounds = array<i64: 256, 256>}, {transform_indices = @transform_4, window_bounds = array<i64: 256, 256>}, {transform_indices = @transform_5, window_bounds = array<i64: 256, 256>}, {pipeline_mode = #tpu.pipeline_mode<synchronous>, transform_indices = @transform_6, window_bounds = array<i64: 1, 256>}, {transform_indices = @transform_7, window_bounds = array<i64: 32, 256>}]} {
    %c0_i32 = arith.constant 0 : i32
    %0 = arith.cmpi eq, %arg1, %c0_i32 : i32
    %1 = arith.extui %0 : i1 to i32
    %c0_i32_0 = arith.constant 0 : i32
    %2 = arith.cmpi ne, %1, %c0_i32_0 : i32
    scf.if %2 {
      %c0_16 = arith.constant 0 : index
      %c0_17 = arith.constant 0 : index
      %24 = vector.load %arg2[%c0_16, %c0_17] : memref<32x256xf32, #tpu.memory_space<vmem>>, vector<32x256xf32>
      %25 = arith.mulf %24, %24 : vector<32x256xf32>
      %cst_18 = arith.constant dense<0.000000e+00> : vector<32xf32>
      %26 = vector.multi_reduction <add>, %25, %cst_18 [1] : vector<32x256xf32> to vector<32xf32>
      %27 = vector.shape_cast %26 : vector<32xf32> to vector<32x1xf32>
      %cst_19 = arith.constant 2.560000e+02 : f32
      %28 = vector.broadcast %cst_19 : f32 to vector<32x1xf32>
      %29 = arith.divf %27, %28 : vector<32x1xf32>
      %cst_20 = arith.constant 9.99999974E-6 : f32
      %30 = vector.broadcast %cst_20 : f32 to vector<32x1xf32>
      %31 = arith.addf %29, %30 : vector<32x1xf32>
      %32 = math.rsqrt %31 : vector<32x1xf32>
      %33 = vector.broadcast %32 : vector<32x1xf32> to vector<32x256xf32>
      %34 = arith.mulf %24, %33 : vector<32x256xf32>
      %c0_21 = arith.constant 0 : index
      %c0_22 = arith.constant 0 : index
      %35 = vector.load %arg4[%c0_21, %c0_22] : memref<1x256xf32, #tpu.memory_space<vmem>>, vector<1x256xf32>
      %36 = vector.broadcast %35 : vector<1x256xf32> to vector<32x256xf32>
      %37 = arith.mulf %34, %36 : vector<32x256xf32>
      %38 = arith.truncf %37 : vector<32x256xf32> to vector<32x256xbf16>
      %c0_23 = arith.constant 0 : index
      %c0_24 = arith.constant 0 : index
      %39 = vector.load %arg11[%c0_23, %c0_24] : memref<32x256xbf16, #tpu.memory_space<vmem>>, vector<32x256xbf16>
      tpu.vector_store %arg11[%c0_23, %c0_24], %38 {strides = array<i32>} : memref<32x256xbf16, #tpu.memory_space<vmem>>, vector<32x256xbf16>,
      %cst_25 = arith.constant 0.000000e+00 : f32
      %40 = vector.broadcast %cst_25 : f32 to vector<32x256xf32>
      %c0_26 = arith.constant 0 : index
      %c0_27 = arith.constant 0 : index
      %41 = vector.load %arg10[%c0_26, %c0_27] : memref<32x256xf32, #tpu.memory_space<vmem>>, vector<32x256xf32>
      tpu.vector_store %arg10[%c0_26, %c0_27], %40 {strides = array<i32>} : memref<32x256xf32, #tpu.memory_space<vmem>>, vector<32x256xf32>,
    } else {
    }
    %c0 = arith.constant 0 : index
    %c0_1 = arith.constant 0 : index
    %3 = vector.load %arg11[%c0, %c0_1] : memref<32x256xbf16, #tpu.memory_space<vmem>>, vector<32x256xbf16>
    %c0_2 = arith.constant 0 : index
    %c0_3 = arith.constant 0 : index
    %4 = vector.load %arg5[%c0_2, %c0_3] : memref<256x256xbf16, #tpu.memory_space<vmem>>, vector<256x256xbf16>
    %cst = arith.constant dense<0.000000e+00> : vector<32x256xf32>
    %5 = tpu.matmul %3, %4, %cst {dimension_numbers = #tpu.dot_dimension_numbers<[1], [0], [0], [1], [0, 0, 1, 1], [], []>} : vector<32x256xbf16>, vector<256x256xbf16>, vector<32x256xf32> -> vector<32x256xf32>
    %c0_4 = arith.constant 0 : index
    %c0_5 = arith.constant 0 : index
    %6 = vector.load %arg6[%c0_4, %c0_5] : memref<256x256xbf16, #tpu.memory_space<vmem>>, vector<256x256xbf16>
    %cst_6 = arith.constant dense<0.000000e+00> : vector<32x256xf32>
    %7 = tpu.matmul %3, %6, %cst_6 {dimension_numbers = #tpu.dot_dimension_numbers<[1], [0], [0], [1], [0, 0, 1, 1], [], []>} : vector<32x256xbf16>, vector<256x256xbf16>, vector<32x256xf32> -> vector<32x256xf32>
    %8 = arith.negf %5 : vector<32x256xf32>
    %9 = math.exp %8 : vector<32x256xf32>
    %cst_7 = arith.constant 1.000000e+00 : f32
    %10 = vector.broadcast %cst_7 : f32 to vector<32x256xf32>
    %11 = arith.addf %10, %9 : vector<32x256xf32>
    %12 = arith.divf %10, %11 : vector<32x256xf32>
    %13 = arith.mulf %5, %12 : vector<32x256xf32>
    %14 = arith.mulf %13, %7 : vector<32x256xf32>
    %c0_8 = arith.constant 0 : index
    %c0_9 = arith.constant 0 : index
    %15 = vector.load %arg10[%c0_8, %c0_9] : memref<32x256xf32, #tpu.memory_space<vmem>>, vector<32x256xf32>
    %16 = arith.truncf %14 : vector<32x256xf32> to vector<32x256xbf16>
    %c0_10 = arith.constant 0 : index
    %c0_11 = arith.constant 0 : index
    %17 = vector.load %arg7[%c0_10, %c0_11] : memref<256x256xbf16, #tpu.memory_space<vmem>>, vector<256x256xbf16>
    %cst_12 = arith.constant dense<0.000000e+00> : vector<32x256xf32>
    %18 = tpu.matmul %16, %17, %cst_12 {dimension_numbers = #tpu.dot_dimension_numbers<[1], [0], [0], [1], [0, 0, 1, 1], [], []>} : vector<32x256xbf16>, vector<256x256xbf16>, vector<32x256xf32> -> vector<32x256xf32>
    %19 = arith.addf %15, %18 : vector<32x256xf32>
    %c0_13 = arith.constant 0 : index
    %c0_14 = arith.constant 0 : index
    %20 = vector.load %arg10[%c0_13, %c0_14] : memref<32x256xf32, #tpu.memory_space<vmem>>, vector<32x256xf32>
    tpu.vector_store %arg10[%c0_13, %c0_14], %19 {strides = array<i32>} : memref<32x256xf32, #tpu.memory_space<vmem>>, vector<32x256xf32>,
    %c2_i32 = arith.constant 2 : i32
    %21 = arith.cmpi eq, %arg1, %c2_i32 : i32
    %22 = arith.extui %21 : i1 to i32
    %c0_i32_15 = arith.constant 0 : i32
    %23 = arith.cmpi ne, %22, %c0_i32_15 : i32
    scf.if %23 {
      %c0_16 = arith.constant 0 : index
      %c0_17 = arith.constant 0 : index
      %24 = vector.load %arg10[%c0_16, %c0_17] : memref<32x256xf32, #tpu.memory_space<vmem>>, vector<32x256xf32>
      %25 = arith.mulf %24, %24 : vector<32x256xf32>
      %cst_18 = arith.constant dense<0.000000e+00> : vector<32xf32>
      %26 = vector.multi_reduction <add>, %25, %cst_18 [1] : vector<32x256xf32> to vector<32xf32>
      %27 = vector.shape_cast %26 : vector<32xf32> to vector<32x1xf32>
      %cst_19 = arith.constant 2.560000e+02 : f32
      %28 = vector.broadcast %cst_19 : f32 to vector<32x1xf32>
      %29 = arith.divf %27, %28 : vector<32x1xf32>
      %cst_20 = arith.constant 9.99999974E-6 : f32
      %30 = vector.broadcast %cst_20 : f32 to vector<32x1xf32>
      %31 = arith.addf %29, %30 : vector<32x1xf32>
      %32 = math.rsqrt %31 : vector<32x1xf32>
      %33 = vector.broadcast %32 : vector<32x1xf32> to vector<32x256xf32>
      %34 = arith.mulf %24, %33 : vector<32x256xf32>
      %c0_21 = arith.constant 0 : index
      %c0_22 = arith.constant 0 : index
      %35 = vector.load %arg8[%c0_21, %c0_22] : memref<1x256xf32, #tpu.memory_space<vmem>>, vector<1x256xf32>
      %36 = vector.broadcast %35 : vector<1x256xf32> to vector<32x256xf32>
      %37 = arith.mulf %34, %36 : vector<32x256xf32>
      %c0_23 = arith.constant 0 : index
      %c0_24 = arith.constant 0 : index
      %38 = vector.load %arg2[%c0_23, %c0_24] : memref<32x256xf32, #tpu.memory_space<vmem>>, vector<32x256xf32>
      %c0_25 = arith.constant 0 : index
      %c0_26 = arith.constant 0 : index
      %39 = vector.load %arg3[%c0_25, %c0_26] : memref<32x1xf32, #tpu.memory_space<vmem>>, vector<32x1xf32>
      %40 = vector.broadcast %39 : vector<32x1xf32> to vector<32x256xf32>
      %41 = arith.mulf %40, %37 : vector<32x256xf32>
      %42 = arith.addf %38, %41 : vector<32x256xf32>
      %c0_27 = arith.constant 0 : index
      %c0_28 = arith.constant 0 : index
      %43 = vector.load %arg9[%c0_27, %c0_28] : memref<32x256xf32, #tpu.memory_space<vmem>>, vector<32x256xf32>
      tpu.vector_store %arg9[%c0_27, %c0_28], %42 {strides = array<i32>} : memref<32x256xf32, #tpu.memory_space<vmem>>, vector<32x256xf32>,
    } else {
    }
    return
  }
  func.func @transform_0(%arg0: i32, %arg1: i32) -> (i32, i32) {
    %c0_i32 = arith.constant 0 : i32
    %c0_i32_0 = arith.constant 0 : i32
    return %arg0, %c0_i32 : i32, i32
  }
  func.func @transform_1(%arg0: i32, %arg1: i32) -> (i32, i32) {
    %c0_i32 = arith.constant 0 : i32
    %c0_i32_0 = arith.constant 0 : i32
    return %arg0, %c0_i32 : i32, i32
  }
  func.func @transform_2(%arg0: i32, %arg1: i32) -> (i32, i32) {
    %c0_i32 = arith.constant 0 : i32
    %c0_i32_0 = arith.constant 0 : i32
    %c0_i32_1 = arith.constant 0 : i32
    return %c0_i32, %c0_i32_0 : i32, i32
  }
  func.func @transform_3(%arg0: i32, %arg1: i32) -> (i32, i32) {
    %c0_i32 = arith.constant 0 : i32
    %c0_i32_0 = arith.constant 0 : i32
    return %c0_i32, %arg1 : i32, i32
  }
  func.func @transform_4(%arg0: i32, %arg1: i32) -> (i32, i32) {
    %c0_i32 = arith.constant 0 : i32
    %c0_i32_0 = arith.constant 0 : i32
    return %c0_i32, %arg1 : i32, i32
  }
  func.func @transform_5(%arg0: i32, %arg1: i32) -> (i32, i32) {
    %c0_i32 = arith.constant 0 : i32
    %c0_i32_0 = arith.constant 0 : i32
    return %arg1, %c0_i32 : i32, i32
  }
  func.func @transform_6(%arg0: i32, %arg1: i32) -> (i32, i32) {
    %c0_i32 = arith.constant 0 : i32
    %c0_i32_0 = arith.constant 0 : i32
    %c0_i32_1 = arith.constant 0 : i32
    return %c0_i32, %c0_i32_0 : i32, i32
  }
  func.func @transform_7(%arg0: i32, %arg1: i32) -> (i32, i32) {
    %c0_i32 = arith.constant 0 : i32
    %c0_i32_0 = arith.constant 0 : i32
    return %arg0, %c0_i32 : i32, i32
  }
}

</mosaic_0001>

<bundles_post_ra>
// kernel: transformer_block.5
= control target key start
LH: loop header
LB: loop body
LE: loop exit
PB: predicated region body
PF: predicated region fallthrough
CT: control target
= control target key end

     0   :  { %s1696_s0 = inlined_call_operand.hbm [shape: bf16[32,512], index: 0, kind: input, shape index: {}, may-alias: {0,1,2}]   ;;  %s1697_s1 = inlined_call_operand.hbm [shape: bf16[32,512], index: 1, kind: input, shape index: {}, may-alias: {0,1,2}]   ;;  %s1698_s2 = inlined_call_operand.hbm [shape: bf16[32,512], index: 2, kind: input, shape index: {}, may-alias: {0,1,2}]   ;;  %s1699_s3 = inlined_call_operand.hbm [shape: bf16[32,256], index: 3, kind: output, shape index: {}]  }
   0x1   :  { %1710 = sst [smem:[#allocation19_spill]] %s1696_s0 }
   0x2   :  { %1711 = sst [smem:[#allocation20_spill]] %s1697_s1 }
   0x3   :  { %8 = vsyncpa [#allocation6], 0 }
   0x4   :  { %10 = vsyncpa [#allocation6 + $0x1], 0 }
   0x5   :  { %11 = vsyncpa [#allocation9], 0 }
   0x6   :  { %13 = vsyncpa [#allocation9 + $0x1], 0 }
   0x7   :  { %14 = vsyncpa [#allocation7], 0 }
   0x8   :  { %16 = vsyncpa [#allocation7 + $0x1], 0  ;;  %s1346_s12 = smov 0   ;;  %s1348_s13 = smov 0  }
   0x9   :  { %s1350_s14 = smov 0   ;;  %s1352_s15 = smov 0  }
   0xa   :  { %s1354_s16 = smov 0   ;;  %s1356_s17 = smov 0  }
   0xb LB: > { %1712 = sst [smem:[#allocation15_spill]] %s1297_s14  ;;  %s1377_s18 = sadd.s32 4294967295, %s1309_s17   ;;  %s1309_s17 = sphi %s1356_s17, %s22_s17   ;;  %s1305_s16 = sphi %s1354_s16, %s1737_s16   ;;  %s1301_s15 = sphi %s1352_s15, %s1736_s15   ;;  %s1297_s14 = sphi %s1350_s14, %s1735_s14   ;;  %s1293_s13 = sphi %s1348_s13, %s1739_s13   ;;  %s1289_s12 = sphi %s1346_s12, %s1738_s12  }
   0xc   : > { %1713 = sst [smem:[#allocation16_spill]] %s1305_s16  ;;  %s942_s19 = sadd.s32 4294967294, %s1309_s17  }
   0xd   : > { %s48_s20 = sadd.s32 1, %s1305_s16  ;;  %s59_s21 = sadd.s32 1, %s1297_s14 }
   0xe   : > { %p50_p0 = scmp.ge.s32.totalorder %s48_s20, 2  ;;  %p66_p1 = scmp.ne.s32.totalorder %s1297_s14, %s1293_s13 }
   0xf   : > { %p67_p2 = scmp.eq.s32.totalorder %s1309_s17, 0  ;;  %p72_p3 = scmp.ne.s32.totalorder %s1293_s13, %s1289_s12 }
  0x10   : > { %s1741_s20 = smov (%p50_p0, %s48_s20), 0  ;;  %p73_p5 = scmp.eq.s32.totalorder %s1377_s18, 0 }
  0x11   : > { %1714 = sst [smem:[#allocation17_spill]] %s1741_s20  ;;  %p1389_p4 = por %p67_p2, %p66_p1 }
  0x12   : > { %s54_s23 = ssub.s32 %s1305_s16, %s1741_s20  ;;  %p164_p6 = scmp.eq.s32.totalorder %s1377_s18, 1 }
  0x13   : > { %p57_p7 = scmp.eq.s32.totalorder %s54_s23, 0  ;;  %p1397_p8 = por %p73_p5, %p72_p3 }
  0x14   : > { %p1401_p9 = por %p164_p6, %p66_p1  ;;  %p170_p10 = scmp.eq.s32.totalorder %s942_s19, 1 }
  0x15   : > { %s1716_s24 = scalar_select %p1397_p8, 1, 0 }
  0x16   : > { %s1717_s25 = scalar_select %p1401_p9, 1, 0 }
  0x17   : > { %s1406_s26 = scalar_select %p57_p7, %s1297_s14, %s59_s21  }
  0x18   : > { %p1408_p11 = por %p170_p10, %p72_p3  ;;  %p1040_p13 = scmp.lt.s32.totalorder %s1309_s17, 2 }
  0x19   : > { %1718 = sst [smem:[#allocation18_spill]] %s1406_s26  ;;  %s1415_s28 = sand.u32 1, %s1297_s14  }
  0x1a   : > { %s1719_s27 = scalar_select %p1408_p11, 1, 0 }
  0x1b   : > { %s1418_s29 = sshll.u32 %s1305_s16, 9  ;;  %p1422_p0 = pnand %p1040_p13, %p1389_p4 }
  0x1c   : > { %s215_s4 = sand.u32 1, %s1309_s17   ;;  %s1700_s5 = sshll.u32 %s1415_s28, 3 }
  0x1d   : > { %s1721_s1 = sld [smem:[#allocation20_spill]]  ;;  %s219_s9 = scalar_lea.vmem [#allocation8], %s1700_s5 }
  0x1e   : > { %s230_s10 = sshll.u32 %s219_s9, 4  ;;  %s1438_s19 = scalar_lea.sflag [#allocation9], %s215_s4  ;;  %s1436_s10 = int_to_ptr.vmem [resolvable:$true] %s230_s10 }
  0x1f   : > { %p1443_p2 = pneg %p1422_p0 }
  0x23   : > { %s841_s8 = scalar_lea.hbm %s1721_s1, %s1418_s29  ;;  %s1136_s7 = scalar_lea.hbm %s1721_s1, 1024 }
  0x24   : > { %s1434_s11 = scalar_lea.hbm %s841_s8, 128  ;;  %s1161_s21 = scalar_lea.hbm %s841_s8, 256 }
  0x25   : > { %p1132_p1 = scmp.ne.s32.totalorder %s1434_s11, %s1161_s21  ;;  %p1137_p5 = scmp.lt.u32.totalorder %s1434_s11, %s1721_s1 }
  0x26   : > { %p1138_p6 = scmp.lt.u32.totalorder %s1136_s7, %s1161_s21  ;;  %p1140_p10 = scmp.lt.u32.totalorder %s1161_s21, %s1434_s11 }
  0x27   : > { %p1134_p3 = pnand %p1443_p2, %p1132_p1 }
  0x28   : > { %p1139_p7 = por %p1138_p6, %p1137_p5 }
  0x29   : > { %p1135_p4 = pneg %p1134_p3 }
  0x2a   : > { %p1141_p13 = por %p1140_p10, %p1139_p7 }
  0x2c   : > { %p1142_p12 = pnand %p1141_p13, %p1135_p4 }
  0x2e   : > { %1145 = shalt.err (!%p1142_p12)
}
  0x2f   : > { %s1146_s4 = scalar_lea.vmem %s1436_s10, 128  ;;  %s1311_s8 = smov [#allocation8]  }
  0x30   : > { %p1147_p1 = scmp.ne.s32.totalorder %s1436_s10, %s1146_s4  ;;  %s1151_s23 = sshll.u32 %s1311_s8, 4  ;;  %s1152_s23 = int_to_ptr.vmem [resolvable:$false] %s1151_s23 }
  0x31   : > { %s1153_s5 = scalar_lea.vmem %s1152_s23, 256  ;;  %p1154_p9 = scmp.lt.s32.totalorder %s1436_s10, %s1152_s23 }
  0x32   : > { %p1149_p3 = pnand %p1147_p1, %p1443_p2  ;;  %p1155_p8 = scmp.lt.s32.totalorder %s1153_s5, %s1146_s4 }
  0x34   : > { %p1150_p11 = pneg %p1149_p3  ;;  %p1156_p5 = por %p1155_p8, %p1154_p9 }
  0x36   : > { %p1157_p6 = pnand %p1156_p5, %p1150_p11 }
  0x38   : > { %1160 = shalt.err (!%p1157_p6)
}
  0x39   : > { %s1707_s21 = smov 256   ;;  %s1705_s6 = smov 64  }
  0x3a   : > { %s1706_s7 = smov 4   ;;  %p955_p8 = scmp.ge.s32.totalorder %s1309_s17, 1 }
  0x3b   : > { %1032 = dma.hbm_to_vmem [thread:$0]  (!%p1422_p0), %s1434_s11, 128, %s1436_s10, %s1438_s19, %s1707_s21, %s1705_s6, %s1706_s7  }
  0x3c   : > { %s1723_s9 = sshll.u32 %s1415_s28, 3  ;;  %p263_p9 = scmp.lt.s32.totalorder %s1309_s17, 3 }
  0x3d   : > { %s244_s4 = scalar_lea.vmem [#allocation10], %s1723_s9  ;;  %s945_s5 = sshll.u32 %s1415_s28, 4 }
  0x3e   : > { %s255_s8 = sshll.u32 %s244_s4, 4  ;;  %p1476_p11 = pnand %p955_p8, %p263_p9  ;;  %s1474_s8 = int_to_ptr.vmem [resolvable:$true] %s255_s8 }
  0x3f   : > { %s1725_s0 = sld [smem:[#allocation19_spill]]  ;;  %s194_s10 = scalar_lea.vmem [#allocation5], %s945_s5 }
  0x40   : > { %s1724_s23 = scalar_select %p1476_p11, 1, 0 }
  0x41   : > { %s205_s11 = sshll.u32 %s194_s10, 4  ;;  %s191_s9 = scalar_lea.sflag [#allocation6], %s1415_s28  ;;  %s1487_s11 = int_to_ptr.vmem [resolvable:$true] %s205_s11 }
  0x45   : > { %s1485_s16 = scalar_lea.hbm %s1725_s0, %s1418_s29  ;;  %s1167_s1 = scalar_lea.hbm %s1725_s0, 1024 }
  0x46   : > { %s1162_s4 = scalar_lea.hbm %s1485_s16, 256  ;;  %p1168_p10 = scmp.lt.u32.totalorder %s1485_s16, %s1725_s0 }
  0x47   : > { %p1163_p12 = scmp.ne.s32.totalorder %s1485_s16, %s1162_s4  ;;  %p1169_p13 = scmp.lt.u32.totalorder %s1167_s1, %s1162_s4 }
  0x48   : > { %p1171_p3 = scmp.lt.u32.totalorder %s1162_s4, %s1485_s16 }
  0x49   : > { %p1165_p4 = pnand %p1163_p12, %p1443_p2  ;;  %p1170_p1 = por %p1169_p13, %p1168_p10 }
  0x4b   : > { %p1166_p7 = pneg %p1165_p4  ;;  %p1172_p5 = por %p1171_p3, %p1170_p1 }
  0x4d   : > { %p1173_p6 = pnand %p1172_p5, %p1166_p7 }
  0x4f   : > { %1176 = shalt.err (!%p1173_p6)
}
  0x50   : > { %s1177_s5 = scalar_lea.vmem %s1487_s11, 256  ;;  %s1315_s6 = smov [#allocation5]  }
  0x51   : > { %p1178_p8 = scmp.ne.s32.totalorder %s1487_s11, %s1177_s5  ;;  %s1182_s7 = sshll.u32 %s1315_s6, 4  ;;  %s1183_s7 = int_to_ptr.vmem [resolvable:$false] %s1182_s7 }
  0x52   : > { %s1184_s21 = scalar_lea.vmem %s1183_s7, 512  ;;  %p1185_p4 = scmp.lt.s32.totalorder %s1487_s11, %s1183_s7 }
  0x53   : > { %p1180_p9 = pnand %p1178_p8, %p1443_p2  ;;  %p1186_p11 = scmp.lt.s32.totalorder %s1184_s21, %s1177_s5 }
  0x55   : > { %p1181_p12 = pneg %p1180_p9  ;;  %p1187_p10 = por %p1186_p11, %p1185_p4 }
  0x57   : > { %p1188_p13 = pnand %p1187_p10, %p1181_p12 }
  0x59   : > { %1191 = shalt.err (!%p1188_p13)
}
  0x5a   : > { %s1316_s10 = smov 128   ;;  %s1317_s4 = smov 8  }
  0x5b   : > { %s1726_s1 = smov 256   ;;  %s850_s7 = scalar_lea.hbm %s1698_s2, %s1418_s29 }
  0x5c   : > { %1029 = dma.hbm_to_vmem [thread:$0]  (!%p1422_p0), %s1485_s16, 256, %s1487_s11, %s191_s9, %s1726_s1, %s1316_s10, %s1317_s4  }
  0x5d   : > { %s1518_s5 = scalar_lea.hbm %s850_s7, 192  ;;  %s1222_s21 = scalar_lea.hbm %s850_s7, 320 }
  0x5e   : > { %p1193_p11 = scmp.ne.s32.totalorder %s1518_s5, %s1222_s21  ;;  %s1197_s14 = scalar_lea.hbm %s1698_s2, 1024 }
  0x5f   : > { %p1198_p3 = scmp.lt.u32.totalorder %s1518_s5, %s1698_s2  ;;  %p1199_p5 = scmp.lt.u32.totalorder %s1197_s14, %s1222_s21 }
  0x60   : > { %p1195_p7 = pnand %p1193_p11, %p1443_p2  ;;  %p1201_p8 = scmp.lt.u32.totalorder %s1222_s21, %s1518_s5 }
  0x61   : > { %p1200_p6 = por %p1199_p5, %p1198_p3 }
  0x62   : > { %p1196_p1 = pneg %p1195_p7 }
  0x63   : > { %p1202_p9 = por %p1201_p8, %p1200_p6 }
  0x65   : > { %p1203_p12 = pnand %p1202_p9, %p1196_p1 }
  0x67   : > { %1206 = shalt.err (!%p1203_p12)
}
  0x68   : > { %s1207_s29 = scalar_lea.vmem %s1474_s8, 128  ;;  %s1318_s0 = smov [#allocation10]  }
  0x69   : > { %p1208_p4 = scmp.ne.s32.totalorder %s1474_s8, %s1207_s29  ;;  %s1212_s26 = sshll.u32 %s1318_s0, 4  ;;  %s1213_s26 = int_to_ptr.vmem [resolvable:$false] %s1212_s26 }
  0x6a   : > { %s1214_s11 = scalar_lea.vmem %s1213_s26, 256  ;;  %p1215_p11 = scmp.lt.s32.totalorder %s1474_s8, %s1213_s26 }
  0x6b   : > { %p1210_p10 = pnand %p1208_p4, %p1443_p2  ;;  %p1216_p7 = scmp.lt.s32.totalorder %s1214_s11, %s1207_s29 }
  0x6d   : > { %p1211_p13 = pneg %p1210_p10  ;;  %p1217_p3 = por %p1216_p7, %p1215_p11 }
  0x6f   : > { %p1218_p5 = pnand %p1217_p3, %p1211_p13 }
  0x71   : > { %1221 = shalt.err (!%p1218_p5)
}
  0x72   : > { %s1727_s14 = smov 4   ;;  %s1728_s9 = smov 64  }
  0x73   : > { %1035 = dma.hbm_to_vmem [thread:$0]  (!%p1422_p0), %s1518_s5, 128, %s1474_s8, %s1438_s19, %s1726_s1, %s1728_s9, %s1727_s14  }
  0x74   : > { %p1729_p2 = scmp.ne.s32.totalorder %s1724_s23, 0 }
  0x75   : > { %s1547_s22 = sand.u32 (!%p1729_p2), 1, %s1293_s13   ;;  %p1730_p1 = scmp.ne.s32.totalorder (!%p1729_p2), %s1716_s24, 0 }
  0x76   : > { %267 = sbr.rel (%p1729_p2) target bundleno = 1470 (0x5be), region = 32  ;;  %s956_s10 = sshll.u32 (!%p1729_p2), %s1547_s22, 4 }
  0x77   : > { %s270_s4 = scalar_lea.sflag (!%p1729_p2), [#allocation6], %s1547_s22  ;;  %s1553_s30 = scalar_lea.vmem (!%p1729_p2), [#allocation5], %s956_s10 }
  0x7d   : > { %1276 = dma.done.wait (%p1730_p1), %s270_s4, 256  }
  0x7e   : > { %1278 = vsyncadd (%p1730_p1), %s270_s4, 4294967040  ;;  %s278_s19 = sand.u32 1, %s1377_s18   ;;  %s957_s8 = sshll.u32 %s1547_s22, 3 }
  0x7f   : > { %s279_s23 = scalar_lea.sflag [#allocation9], %s278_s19  ;;  %s282_s1 = scalar_lea.vmem [#allocation8], %s957_s8 }
  0x80   : > { %1280 = dma.done.wait (%p1730_p1), %s279_s23, 256  }
  0x81   : > { %1282 = vsyncadd (%p1730_p1), %s279_s23, 4294967040  ;;  %v1319_v0 = vmov 0.0   ;;  %vm1320_vm0 = vmmov 0   ;;  %v1573_v1 = vld [vmem:[%s282_s1] sm:$0xff]   ;;  %vm341_vm1 = vcmask 7168   ;;  %v1321_v3 = vmov -inf  }
  0x82   : > { %994 = vmatprep.subr.bf16.mxu0 %v1319_v0  ;;  %996 = vmatprep.mubr.msk.bf16.mxu0 %vm1320_vm0, %v1319_v0  ;;  %v1104_v2 = vld [vmem:[%s1553_s30] ss:$8 sps:$4 sm:$0xff]   ;;  %342 = vst.msk [vmem:[#allocation2] sm:$0xff] %vm341_vm1, %v1321_v3  ;;  %343 = vst.msk [vmem:[#allocation2 + $0x8] sm:$0xff] %vm341_vm1, %v1321_v3  ;;  %v365_v4 = vlaneseq  ;;  %vm436_vm3 = vcmask 130048   ;;  %v1322_v16 = vmov 0  }
  0x83   : > { %1000 = vmatprep.subr.bf16.mxu1 %v1319_v0  ;;  %1002 = vmatprep.mubr.msk.bf16.mxu1 %vm1320_vm0, %v1319_v0  ;;  %344 = vst.msk [vmem:[#allocation2 + $0x10] sm:$0xff] %vm341_vm1, %v1321_v3  ;;  %345 = vst.msk [vmem:[#allocation2 + $0x18] sm:$0xff] %vm341_vm1, %v1321_v3  ;;  %s291_s18 = scalar_lea.vmem [#allocation10], %s957_s8  ;;  %v1106_v35 = vld [vmem:[%s1553_s30 + $0x4] ss:$8 sps:$4 sm:$0xff]   ;;  %s323_s24 = scalar_lea.vmem [#allocation11], %s956_s10 }
  0x84   : > { %995 = vmatpush3.bf16.xpose.msra.mxu0 %v1573_v1  ;;  %346 = vst.msk [vmem:[#allocation3] sm:$0xff] %vm341_vm1, %v1319_v0  ;;  %347 = vst.msk [vmem:[#allocation3 + $0x8] sm:$0xff] %vm341_vm1, %v1319_v0  ;;  %v366_v5 = vshrl.u32 %v365_v4, 7  ;;  %v372_v6 = vand.u32 127, %v365_v4  ;;  %1101 = vset.pattern.permute.xlu1 %v1322_v16  ;;  %v1105_v25 = vld [vmem:[%s291_s18] sm:$0xff]   ;;  %s795_s20 = sshll.u32 %s323_s24, 4  ;;  %s1642_s20 = int_to_ptr.vmem [resolvable:$true] %s795_s20 }
  0x85   : > { %1012 = vmatprep.subr.bf16.mxu0 %v1319_v0  ;;  %348 = vst.msk [vmem:[#allocation3 + $0x10] sm:$0xff] %vm341_vm1, %v1319_v0  ;;  %349 = vst.msk [vmem:[#allocation3 + $0x18] sm:$0xff] %vm341_vm1, %v1319_v0  ;;  %1102 = vset.pattern.permute.xlu0 %v1322_v16  ;;  %s985_s6 = sshll.u32 %s1301_s15, 8  ;;  %s778_s28 = scalar_lea.sflag [#allocation7], %s1547_s22 }
  0x86   : > { %v367_v7 = vadd.s32 8, %v366_v5  ;;  %vm375_vm2 = vcmp.le.s32.totalorder %v372_v6, %v366_v5  ;;  %1001 = vmatpush3.bf16.msra.mxu1 %v1105_v25  ;;  %s1647_s21 = scalar_lea.hbm %s1699_s3, %s985_s6  ;;  %s1223_s16 = scalar_lea.vmem %s1642_s20, 256 }
  0x87   : > { %1006 = vmatprep.subr.bf16.mxu1 %v1319_v0  ;;  %p1224_p0 = scmp.ne.s32.totalorder %s1642_s20, %s1223_s16  ;;  %p1731_p6 = scmp.ne.s32.totalorder %s1717_s25, 0 }
  0x88   : > { %vm376_vm4 = vcmp.le.s32.totalorder %v372_v6, %v367_v7  ;;  %s1323_s15 = smov [#allocation11]  }
  0x89   : > { %v1596_v17 = vld [vmem:[#allocation2] sm:$0xff]  ;;  %v435_v20 = vld [vmem:[#allocation2 + $0x8] sm:$0xff]  ;;  %p1225_p8 = pnand %p1224_p0, %p1731_p6  ;;  %s1227_s29 = sshll.u32 %s1323_s15, 4  ;;  %s1228_s29 = int_to_ptr.vmem [resolvable:$false] %s1227_s29 }
  0x8a   : > { %v605_v48 = vld [vmem:[#allocation2 + $0x10] sm:$0xff]  ;;  %v606_v50 = vld [vmem:[#allocation2 + $0x18] sm:$0xff]  ;;  %s1229_s0 = scalar_lea.vmem %s1228_s29, 512  ;;  %p1230_p12 = scmp.lt.s32.totalorder %s1642_s20, %s1228_s29 }
  0x8b   : > { %997 = vmatmul.mubr.bf16.vlgmr.msra.gmra.mrb[0].mxu0 %v1104_v2  ;;  %p1226_p9 = pneg %p1225_p8  ;;  %p1231_p4 = scmp.lt.s32.totalorder %s1229_s0, %s1223_s16 }
  0x8c   : > { %1014 = vmatprep.mubr.msk.bf16.mxu0 %vm1320_vm0, %v1319_v0  ;;  %1013 = vmatpush3.bf16.msra.mxu0 %v1105_v25  ;;  %v638_v25 = vld [vmem:[#allocation3 + $0x10] sm:$0xff] }
  0x8d   : > { %p1232_p10 = por %p1231_p4, %p1230_p12 }
  0x8f   : > { %p1233_p13 = pnand %p1232_p10, %p1226_p9 }
 0x15e   : > { %v425_v8 = vpop.f32.mrb[0].mxu0 }
 0x15f   : > { %v432_v9 = vsel %vm375_vm2, %v425_v8, -1e+30  ;;  %v998_v10 = vpop.f32.mrb[1].mxu0 }
 0x160   : > { %v428_v11 = vpop.f32.mrb[2].mxu0  ;;  %v437_v12 = vsel %vm436_vm3, %v432_v9, -inf }
 0x161   : > { %v433_v13 = vsel %vm376_vm4, %v428_v11, -1e+30  ;;  %438 = vmax.xlane.f32.xlu0 %v437_v12  ;;  %v999_v14 = vpop.f32.mrb[3].mxu0  ;;  %v467_v12 = vld [vmem:[#allocation3] sm:$0xff] }
 0x162   : > { %v440_v15 = vsel %vm436_vm3, %v433_v13, -inf }
 0x165   : > { %441 = vmax.xlane.f32.xlu0 %v440_v15 }
 0x1ee   : > { %v439_v18 = vpop.xlane.xlu0 %438 }
 0x1ef   : > { %v1599_v19 = vmax.f32 %v1596_v17, %v439_v18  ;;  %v468_v18 = vld [vmem:[#allocation3 + $0x8] sm:$0xff] }
 0x1f1   : > { %v445_v21 = vsub.f32 %v1596_v17, %v1599_v19  ;;  %551 = vst.msk [vmem:[#allocation2] sm:$0xff] %vm341_vm1, %v1599_v19  ;;  %453 = vperm.xlu1 %1101, %v1599_v19  }
 0x1f2   : > { %v442_v22 = vpop.xlane.xlu0 %441 }
 0x1f3   : > { %v444_v23 = vmax.f32 %v435_v20, %v442_v22 }
 0x1f5   : > { %v446_v24 = vsub.f32 %v435_v20, %v444_v23  ;;  %552 = vst.msk [vmem:[#allocation2 + $0x8] sm:$0xff] %vm341_vm1, %v444_v23  ;;  %458 = vperm.xlu1 %1101, %v444_v23  }
 0x1f7   : > { %v449_v57 = vmul.f32 1.442695, %v446_v24 }
 0x270   : > { %v454_v26 = vpop.permute.xlu1 %453 }
 0x271   : > { %v461_v27 = vsub.f32 %v432_v9, %v454_v26  ;;  %v447_v9 = vmul.f32 1.442695, %v445_v21 }
 0x273   : > { %v463_v28 = vmul.f32 1.442695, %v461_v27 }
 0x274   : > { %v459_v29 = vpop.permute.xlu1 %458 }
 0x275   : > { %v462_v30 = vsub.f32 %v433_v13, %v459_v29  ;;  %1107 = vpow2.f32 %v463_v28  ;;  %v639_v28 = vld [vmem:[#allocation3 + $0x18] sm:$0xff] }
 0x277   : > { %v465_v31 = vmul.f32 1.442695, %v462_v30 }
 0x279   : > { %1109 = vpow2.f32 %v465_v31 }
 0x27a   : > { %1111 = vpow2.f32 %v449_v57 }
 0x27f   : > { %v1108_v32 = vpop.eup %1107 }
 0x280   : > { %v471_v55 = vsel %vm436_vm3, %v1108_v32, 0.0 }
 0x283   : > { %v1110_v33 = vpop.eup %1109 }
 0x284   : > { %v496_v34 = vpack.c.bf16 %v1110_v33, %v1108_v32  ;;  %v474_v56 = vsel %vm436_vm3, %v1110_v33, 0.0  ;;  %v1112_v60 = vpop.eup %1111 }
 0x285   : > { %v470_v20 = vmul.f32 %v1112_v60, %v468_v18 }
 0x286   : > { %1003 = vmatmul.mubr.msk.bf16.vlgmr.msra.gmra.mrb[0].mxu1 %vm436_vm3, %v496_v34 }
 0x287   : > { %1007 = vmatpush3.bf16.xpose.msra.mxu1 %v1573_v1  ;;  %1008 = vmatprep.mubr.msk.bf16.mxu1 %vm1320_vm0, %v1319_v0 }
 0x28e   : > { %1009 = vmatmul.mubr.bf16.vlgmr.msra.gmra.mrb[4].mxu1 %v1106_v35 }
 0x359   : > { %v1615_v36 = vpop.f32.mrb[0].mxu1 }
 0x35a   : > { %v1004_v37 = vpop.f32.mrb[1].mxu1 }
 0x35b   : > { %v1617_v38 = vpop.f32.mrb[2].mxu1 }
 0x35c   : > { %v1005_v39 = vpop.f32.mrb[3].mxu1 }
 0x361   : > { %v595_v40 = vpop.f32.mrb[4].mxu1 }
 0x362   : > { %v602_v41 = vsel %vm375_vm2, %v595_v40, -1e+30  ;;  %v1010_v42 = vpop.f32.mrb[5].mxu1 }
 0x363   : > { %v598_v43 = vpop.f32.mrb[6].mxu1  ;;  %v607_v44 = vsel %vm436_vm3, %v602_v41, -inf }
 0x364   : > { %v603_v45 = vsel %vm376_vm4, %v598_v43, -1e+30  ;;  %608 = vmax.xlane.f32.xlu0 %v607_v44  ;;  %v1011_v46 = vpop.f32.mrb[7].mxu1 }
 0x365   : > { %v610_v47 = vsel %vm436_vm3, %v603_v45, -inf }
 0x366   : > { %611 = vmax.xlane.f32.xlu1 %v610_v47 }
 0x3f1   : > { %v609_v49 = vpop.xlane.xlu0 %608 }
 0x3f2   : > { %v613_v51 = vmax.f32 %v605_v48, %v609_v49 }
 0x3f3   : > { %v612_v52 = vpop.xlane.xlu1 %611 }
 0x3f4   : > { %715 = vst.msk [vmem:[#allocation2 + $0x10] sm:$0xff] %vm341_vm1, %v613_v51  ;;  %v614_v53 = vmax.f32 %v606_v50, %v612_v52  ;;  %623 = vperm.xlu0 %1102, %v613_v51   ;;  %v615_v58 = vsub.f32 %v605_v48, %v613_v51 }
 0x3f6   : > { %v616_v54 = vsub.f32 %v606_v50, %v614_v53  ;;  %716 = vst.msk [vmem:[#allocation2 + $0x18] sm:$0xff] %vm341_vm1, %v614_v53  ;;  %628 = vperm.xlu1 %1101, %v614_v53   ;;  %v617_v59 = vmul.f32 1.442695, %v615_v58 }
 0x3f8   : > { %1113 = vpow2.f32 %v617_v59  ;;  %v619_v10 = vmul.f32 1.442695, %v616_v54 }
 0x402   : > { %v1114_v61 = vpop.eup %1113 }
 0x403   : > { %v640_v26 = vmul.f32 %v1114_v61, %v638_v25 }
 0x413   : > { %472 = vadd.xlane.f32.xlu0 %v471_v55 }
 0x41a   : > { %475 = vadd.xlane.f32.xlu1 %v474_v56 }
 0x42b   : > { %491 = vperm.xlu1 %1101, %v1112_v60  }
 0x42f   : > { %656 = vperm.xlu1 %1101, %v1114_v61  }
 0x473   : > { %v624_v62 = vpop.permute.xlu0 %623 }
 0x474   : > { %v631_v63 = vsub.f32 %v602_v41, %v624_v62 }
 0x475   : > { %v629_v0 = vpop.permute.xlu1 %628 }
 0x476   : > { %v633_v1 = vmul.f32 1.442695, %v631_v63  ;;  %v632_v2 = vsub.f32 %v603_v45, %v629_v0 }
 0x478   : > { %1115 = vpow2.f32 %v633_v1  ;;  %v635_v3 = vmul.f32 1.442695, %v632_v2 }
 0x47a   : > { %1117 = vpow2.f32 %v635_v3 }
 0x47b   : > { %1119 = vpow2.f32 %v447_v9 }
 0x47c   : > { %1121 = vpow2.f32 %v619_v10 }
 0x482   : > { %v1116_v4 = vpop.eup %1115 }
 0x483   : > { %v642_v5 = vsel %vm436_vm3, %v1116_v4, 0.0 }
 0x484   : > { %v1118_v6 = vpop.eup %1117  ;;  %643 = vadd.xlane.f32.xlu0 %v642_v5 }
 0x485   : > { %v666_v7 = vpack.c.bf16 %v1118_v6, %v1116_v4  ;;  %v645_v8 = vsel %vm436_vm3, %v1118_v6, 0.0  ;;  %v1120_v11 = vpop.eup %1119 }
 0x486   : > { %v469_v13 = vmul.f32 %v1120_v11, %v467_v12  ;;  %v1122_v15 = vpop.eup %1121 }
 0x487   : > { %1015 = vmatmul.mubr.msk.bf16.vlgmr.msra.gmra.mrb[4].mxu0 %vm436_vm3, %v666_v7  ;;  %v641_v30 = vmul.f32 %v1122_v15, %v639_v28 }
 0x488   : > { %646 = vadd.xlane.f32.xlu0 %v645_v8 }
 0x49e   : > { %486 = vperm.xlu0 %1102, %v1120_v11  }
 0x4a0   : > { %v473_v14 = vpop.xlane.xlu0 %472 }
 0x4a1   : > { %v477_v16 = vadd.f32 %v473_v14, %v469_v13 }
 0x4a2   : > { %661 = vperm.xlu0 %1102, %v1122_v15  }
 0x4a3   : > { %480 = vst.msk [vmem:[#allocation3] sm:$0xff] %vm341_vm1, %v477_v16 }
 0x4a7   : > { %v476_v22 = vpop.xlane.xlu1 %475 }
 0x4a8   : > { %v478_v23 = vadd.f32 %v476_v22, %v470_v20 }
 0x4aa   : > { %481 = vst.msk [vmem:[#allocation3 + $0x8] sm:$0xff] %vm341_vm1, %v478_v23  ;;  %v720_v17 = vld [vmem:[#allocation3] sm:$0xff] }
 0x4ab   : > { %1123 = vrcp.f32 %v720_v17  ;;  %v492_v39 = vpop.permute.xlu1 %491 }
 0x4ac   : > { %v495_v46 = vmul.f32 0.0, %v492_v39 }
 0x4ae   : > { %v548_v49 = vadd.f32 %v1617_v38, %v495_v46 }
 0x4af   : > { %v657_v42 = vpop.permute.xlu1 %656 }
 0x4b0   : > { %v664_v58 = vmul.f32 0.0, %v657_v42 }
 0x4b1   : > { %v721_v19 = vld [vmem:[#allocation3 + $0x8] sm:$0xff] }
 0x4b2   : > { %1125 = vrcp.f32 %v721_v19 }
 0x4b5   : > { %v1124_v21 = vpop.eup %1123 }
 0x4b6   : > { %728 = vperm.xlu1 %1101, %v1124_v21  }
 0x4bc   : > { %v1126_v24 = vpop.eup %1125 }
 0x4bd   : > { %733 = vperm.xlu0 %1102, %v1126_v24  }
 0x511   : > { %v644_v27 = vpop.xlane.xlu0 %643 }
 0x512   : > { %v648_v29 = vadd.f32 %v644_v27, %v640_v26 }
 0x514   : > { %650 = vst.msk [vmem:[#allocation3 + $0x10] sm:$0xff] %vm341_vm1, %v648_v29 }
 0x515   : > { %v647_v31 = vpop.xlane.xlu0 %646 }
 0x516   : > { %v649_v32 = vadd.f32 %v647_v31, %v641_v30 }
 0x518   : > { %651 = vst.msk [vmem:[#allocation3 + $0x18] sm:$0xff] %vm341_vm1, %v649_v32 }
 0x51b   : > { %v749_v33 = vld [vmem:[#allocation3 + $0x10] sm:$0xff] }
 0x51c   : > { %1127 = vrcp.f32 %v749_v33 }
 0x51d   : > { %v487_v40 = vpop.permute.xlu0 %486 }
 0x51e   : > { %v494_v41 = vmul.f32 0.0, %v487_v40 }
 0x51f   : > { %v750_v34 = vld [vmem:[#allocation3 + $0x18] sm:$0xff] }
 0x520   : > { %1129 = vrcp.f32 %v750_v34  ;;  %v547_v43 = vadd.f32 %v1615_v36, %v494_v41 }
 0x521   : > { %v662_v47 = vpop.permute.xlu0 %661 }
 0x522   : > { %v665_v54 = vmul.f32 0.0, %v662_v47 }
 0x526   : > { %v1128_v35 = vpop.eup %1127 }
 0x527   : > { %757 = vperm.xlu1 %1101, %v1128_v35  }
 0x52a   : > { %v1130_v37 = vpop.eup %1129 }
 0x52b   : > { %762 = vperm.xlu0 %1102, %v1130_v37  }
 0x535   : > { %v729_v44 = vpop.permute.xlu1 %728 }
 0x536   : > { %v736_v45 = vmul.f32 %v729_v44, %v547_v43 }
 0x538   : > { %v980_v48 = vpack.c.bf16 %v736_v45, %v736_v45 }
 0x53a   : > { %746 = vst [vmem:[%s323_s24] sm:$0xf] %v980_v48 }
 0x53c   : > { %v734_v50 = vpop.permute.xlu0 %733 }
 0x53d   : > { %v737_v51 = vmul.f32 %v734_v50, %v548_v49 }
 0x53f   : > { %v981_v52 = vpack.c.bf16 %v737_v51, %v737_v51 }
 0x541   : > { %747 = vst [vmem:[%s323_s24 + $0x8] sm:$0xf] %v981_v52 }
 0x55a   : > { %v704_v53 = vpop.f32.mrb[4].mxu0 }
 0x55b   : > { %v1016_v55 = vpop.f32.mrb[5].mxu0  ;;  %v711_v59 = vadd.f32 %v704_v53, %v664_v58 }
 0x55c   : > { %v707_v56 = vpop.f32.mrb[6].mxu0 }
 0x55d   : > { %v712_v36 = vadd.f32 %v707_v56, %v665_v54  ;;  %v1017_v57 = vpop.f32.mrb[7].mxu0 }
 0x5a6   : > { %v758_v60 = vpop.permute.xlu1 %757 }
 0x5a7   : > { %v765_v61 = vmul.f32 %v758_v60, %v711_v59 }
 0x5a9   : > { %v982_v62 = vpack.c.bf16 %v765_v61, %v765_v61 }
 0x5aa   : > { %v763_v38 = vpop.permute.xlu0 %762 }
 0x5ab   : > { %775 = vst [vmem:[%s323_s24 + $0x4] sm:$0xf] %v982_v62  ;;  %v766_v63 = vmul.f32 %v763_v38, %v712_v36 }
 0x5ad   : > { %v983_v0 = vpack.c.bf16 %v766_v63, %v766_v63 }
 0x5af   : > { %776 = vst [vmem:[%s323_s24 + $0xc] sm:$0xf] %v983_v0 }
 0x5b0   : > { %1236 = shalt.err (!%p1233_p13)
}
 0x5b1   : > { %s1237_s26 = scalar_lea.hbm %s1647_s21, 256  ;;  %s1241_s9 = scalar_lea.hbm %s1699_s3, 512 }
 0x5b2   : > { %p1238_p11 = scmp.ne.s32.totalorder %s1647_s21, %s1237_s26  ;;  %p1242_p5 = scmp.lt.u32.totalorder %s1647_s21, %s1699_s3 }
 0x5b3   : > { %p1243_p2 = scmp.lt.u32.totalorder %s1241_s9, %s1237_s26  ;;  %p1245_p0 = scmp.lt.u32.totalorder %s1237_s26, %s1647_s21 }
 0x5b4   : > { %p1239_p7 = pnand %p1238_p11, %p1731_p6 }
 0x5b5   : > { %p1244_p1 = por %p1243_p2, %p1242_p5 }
 0x5b6   : > { %p1240_p3 = pneg %p1239_p7 }
 0x5b7   : > { %p1246_p8 = por %p1245_p0, %p1244_p1 }
 0x5b9   : > { %p1247_p9 = pnand %p1246_p8, %p1240_p3 }
 0x5bb   : > { %1250 = shalt.err (!%p1247_p9)
}
 0x5bc   : > { %s1324_s30 = smov 128   ;;  %s1325_s19 = smov 8  }
 0x5bd   : > { %1024 = dma.vmem_to_hbm [thread:$0]  (%p1731_p6), %s1642_s20, 256, %s1647_s21, %s778_s28, %s1324_s30, %s1324_s30, %s1325_s19  }
 0x5be PF: > { %s810_s8 = sand.u32 1, %s1289_s12   ;;  %p1732_p12 = scmp.ne.s32.totalorder %s1719_s27, 0 }
 0x5bf   : > { %p1733_p4 = scmp.ge.s32.totalorder %s1309_s17, 2  ;;  %s811_s23 = scalar_lea.sflag [#allocation7], %s810_s8 }
 0x5c1   : > { %p1037_p10 = pnand %p1733_p4, %p1732_p12 }
 0x5c3   : > { %1284 = dma.done.wait (!%p1037_p10), %s811_s23, 256  }
 0x5c4   : > { %1286 = vsyncadd (!%p1037_p10), %s811_s23, 4294967040  ;;  %s22_s17 = sadd.s32 1, %s1309_s17   ;;  %s1734_s1 = sld [smem:[#allocation15_spill]] }
 0x5c5   : > { %p19_p13 = scmp.ge.s32.totalorder %s22_s17, 4   ;;  %s1735_s14 = sld [smem:[#allocation18_spill]] }
 0x5c6   : > { %s1736_s15 = sld [smem:[#allocation16_spill]]  ;;  %s1737_s16 = sld [smem:[#allocation17_spill]] }
 0x5c7   : > { %s1738_s12 = smov %s1293_s13  ;;  %21 = sbr.rel (!%p19_p13) target bundleno = 11 (0xb), region = 116 }
 0x5ca   : > { %s1739_s13 = smov %s1734_s1 }
 0x5ce   :  { %816 = vsyncpa [#allocation6], 1 }
 0x5cf   :  { %818 = vsyncpa [#allocation6 + $0x1], 1 }
 0x5d0   :  { %819 = vsyncpa [#allocation9], 1 }
 0x5d1   :  { %821 = vsyncpa [#allocation9 + $0x1], 1 }
 0x5d2   :  { %822 = vsyncpa [#allocation7], 1 }
 0x5d3   :  { %824 = vsyncpa [#allocation7 + $0x1], 1 }

// kernel: transformer_block.6
= control target key start
LH: loop header
LB: loop body
LE: loop exit
PB: predicated region body
PF: predicated region fallthrough
CT: control target
= control target key end

     0   :  { %10 = vsyncpa [#allocation4], 0  ;;  %s974_s0 = inlined_call_operand.hbm [shape: bf16[32,256], index: 0, kind: input, shape index: {}]   ;;  %s975_s1 = inlined_call_operand.hbm [shape: bf16[256,256], index: 1, kind: input, shape index: {}]   ;;  %s976_s2 = inlined_call_operand.hbm [shape: f32[32,256], index: 2, kind: input, shape index: {}]   ;;  %s977_s3 = inlined_call_operand.hbm [shape: f32[32,1], index: 3, kind: input, shape index: {}]   ;;  %s978_s4 = inlined_call_operand.hbm [shape: f32[1,256], index: 4, kind: input, shape index: {}]   ;;  %s979_s5 = inlined_call_operand.hbm [shape: f32[32,256], index: 5, kind: output, shape index: {}]  }
   0x1   :  { %11 = vsyncpa [#allocation7], 0 }
   0x2   :  { %12 = vsyncpa [#allocation10], 0 }
   0x3   :  { %13 = vsyncpa [#allocation5], 0  ;;  %s822_s18 = smov [#allocation6]   ;;  %s823_s20 = smov [#allocation9]  }
   0x4   :  { %s31_s19 = sshll.u32 %s822_s18, 4  ;;  %s55_s21 = sshll.u32 %s823_s20, 4  ;;  %s32_s19 = int_to_ptr.vmem [resolvable:$true] %s31_s19  ;;  %s863_s21 = int_to_ptr.vmem [resolvable:$true] %s55_s21 }
   0x5   :  { %s682_s24 = scalar_lea.hbm %s975_s1, 4096 }
   0x6   :  { %p683_p0 = scmp.ne.s32.totalorder %s975_s1, %s682_s24  ;;  %p686_p1 = scmp.lt.u32.totalorder %s682_s24, %s975_s1 }
   0x8   :  { %p688_p2 = pnand %p686_p1, %p683_p0 }
   0xa   :  { %691 = shalt.err (!%p688_p2)
}
   0xb   :  { %s692_s29 = scalar_lea.vmem %s32_s19, 4096  ;;  %p697_p4 = scmp.lt.s32.totalorder %s32_s19, %s32_s19 }
   0xc   :  { %p693_p3 = scmp.ne.s32.totalorder %s32_s19, %s692_s29  ;;  %p698_p5 = scmp.lt.s32.totalorder %s692_s29, %s692_s29 }
   0xe   :  { %p699_p6 = por %p698_p5, %p697_p4 }
  0x10   :  { %p700_p7 = pnand %p699_p6, %p693_p3 }
  0x12   :  { %703 = shalt.err (!%p700_p7)
}
  0x13   :  { %s824_s30 = smov 128   ;;  %s825_s6 = smov 8  }
  0x14   :  { %37 = dma.hbm_to_vmem [thread:$0]  %s975_s1, 4096, %s32_s19, [#allocation7], %s824_s30, %s824_s30, %s825_s6  }
  0x15   :  { %s704_s11 = scalar_lea.hbm %s977_s3, 512 }
  0x16   :  { %p705_p8 = scmp.ne.s32.totalorder %s977_s3, %s704_s11  ;;  %p708_p9 = scmp.lt.u32.totalorder %s704_s11, %s977_s3 }
  0x18   :  { %p710_p10 = pnand %p708_p9, %p705_p8 }
  0x1a   :  { %713 = shalt.err (!%p710_p10)
}
  0x1b   :  { %s714_s16 = scalar_lea.vmem %s863_s21, 512  ;;  %p719_p12 = scmp.lt.s32.totalorder %s863_s21, %s863_s21 }
  0x1c   :  { %p715_p11 = scmp.ne.s32.totalorder %s863_s21, %s714_s16  ;;  %p720_p13 = scmp.lt.s32.totalorder %s714_s16, %s714_s16 }
  0x1e   :  { %p721_p0 = por %p720_p13, %p719_p12 }
  0x20   :  { %p722_p1 = pnand %p721_p0, %p715_p11 }
  0x22   :  { %725 = shalt.err (!%p722_p1)
}
  0x23   :  { %61 = dma.hbm_to_vmem [thread:$0]  %s977_s3, 512, %s863_s21, [#allocation10], %s824_s30, %s824_s30, %s825_s6  }
  0x24   :  { %s826_s18 = smov [#allocation3]   ;;  %s827_s20 = smov [#allocation8]  }
  0x25   :  { %s19_s19 = sshll.u32 %s826_s18, 4  ;;  %s43_s22 = sshll.u32 %s827_s20, 4  ;;  %s20_s19 = int_to_ptr.vmem [resolvable:$true] %s19_s19  ;;  %s900_s22 = int_to_ptr.vmem [resolvable:$true] %s43_s22 }
  0x26   :  { %s726_s25 = scalar_lea.hbm %s974_s0, 512 }
  0x27   :  { %p727_p2 = scmp.ne.s32.totalorder %s974_s0, %s726_s25  ;;  %p730_p3 = scmp.lt.u32.totalorder %s726_s25, %s974_s0 }
  0x29   :  { %p732_p4 = pnand %p730_p3, %p727_p2 }
  0x2b   :  { %735 = shalt.err (!%p732_p4)
}
  0x2c   :  { %s736_s3 = scalar_lea.vmem %s20_s19, 512  ;;  %p741_p6 = scmp.lt.s32.totalorder %s20_s19, %s20_s19 }
  0x2d   :  { %p737_p5 = scmp.ne.s32.totalorder %s20_s19, %s736_s3  ;;  %p742_p7 = scmp.lt.s32.totalorder %s736_s3, %s736_s3 }
  0x2f   :  { %p743_p8 = por %p742_p7, %p741_p6 }
  0x31   :  { %p744_p9 = pnand %p743_p8, %p737_p5 }
  0x33   :  { %747 = shalt.err (!%p744_p9)
}
  0x34   :  { %25 = dma.hbm_to_vmem [thread:$0]  %s974_s0, 512, %s20_s19, [#allocation4], %s824_s30, %s824_s30, %s825_s6  }
  0x35   :  { %s748_s10 = scalar_lea.hbm %s976_s2, 1024 }
  0x36   :  { %p749_p10 = scmp.ne.s32.totalorder %s976_s2, %s748_s10  ;;  %p752_p11 = scmp.lt.u32.totalorder %s748_s10, %s976_s2 }
  0x38   :  { %p754_p12 = pnand %p752_p11, %p749_p10 }
  0x3a   :  { %757 = shalt.err (!%p754_p12)
}
  0x3b   :  { %s758_s15 = scalar_lea.vmem %s900_s22, 1024  ;;  %p763_p0 = scmp.lt.s32.totalorder %s900_s22, %s900_s22 }
  0x3c   :  { %p759_p13 = scmp.ne.s32.totalorder %s900_s22, %s758_s15  ;;  %p764_p1 = scmp.lt.s32.totalorder %s758_s15, %s758_s15 }
  0x3e   :  { %p765_p2 = por %p764_p1, %p763_p0 }
  0x40   :  { %p766_p3 = pnand %p765_p2, %p759_p13 }
  0x42   :  { %769 = shalt.err (!%p766_p3)
}
  0x43   :  { %s828_s0 = smov 256   ;;  %s829_s30 = smov 16  }
  0x44   :  { %49 = dma.hbm_to_vmem [thread:$0]  %s976_s2, 1024, %s900_s22, [#allocation7], %s828_s0, %s828_s0, %s829_s30  }
  0x45   :  { %s830_s1 = smov [#allocation11]   ;;  %s770_s20 = scalar_lea.hbm %s978_s4, 32 }
  0x46   :  { %s68_s17 = sshll.u32 %s830_s1, 4  ;;  %p771_p4 = scmp.ne.s32.totalorder %s978_s4, %s770_s20  ;;  %s69_s17 = int_to_ptr.vmem [resolvable:$true] %s68_s17 }
  0x47   :  { %p774_p5 = scmp.lt.u32.totalorder %s770_s20, %s978_s4 }
  0x49   :  { %p776_p6 = pnand %p774_p5, %p771_p4 }
  0x4b   :  { %779 = shalt.err (!%p776_p6)
}
  0x4c   :  { %s780_s27 = scalar_lea.vmem %s69_s17, 32  ;;  %p785_p8 = scmp.lt.s32.totalorder %s69_s17, %s69_s17 }
  0x4d   :  { %p781_p7 = scmp.ne.s32.totalorder %s69_s17, %s780_s27  ;;  %p786_p9 = scmp.lt.s32.totalorder %s780_s27, %s780_s27 }
  0x4f   :  { %p787_p10 = por %p786_p9, %p785_p8 }
  0x51   :  { %p788_p11 = pnand %p787_p10, %p781_p7 }
  0x53   :  { %791 = shalt.err (!%p788_p11)
}
  0x54   :  { %71 = dma.hbm_to_vmem [thread:$0]  %s978_s4, 32, %s69_s17, [#allocation10]  }
  0x55   :  { %814 = dma.done.wait [#allocation4], 512  }
  0x56   :  { %815 = vsyncadd [#allocation4], 4294966784 }
  0x57   :  { %816 = dma.done.wait [#allocation7], 5120  }
  0x58   :  { %817 = vsyncadd [#allocation7], 4294962176 }
  0x59   :  { %818 = dma.done.wait [#allocation10], 544  }
  0x5a   :  { %819 = vsyncadd [#allocation10], 4294966752  ;;  %v620_v0 = vld [vmem:[#allocation6 + $0x4] ss:$8 sps:$4 sm:$0xff]   ;;  %v622_v1 = vld [vmem:[#allocation6] ss:$8 sps:$4 sm:$0xff]  }
  0x5b   :  { %323 = vmatprep.subr.bf16.mxu0 %v620_v0  ;;  %575 = vmatprep.subr.bf16.mxu1 %v620_v0  ;;  %v623_v2 = vld [vmem:[#allocation6 + $0x14] ss:$8 sps:$4 sm:$0xff]   ;;  %v625_v3 = vld [vmem:[#allocation6 + $0x10] ss:$8 sps:$4 sm:$0xff]   ;;  %v626_v4 = vld [vmem:[#allocation6 + $0x24] ss:$8 sps:$4 sm:$0xff]  }
  0x5c   :  { %324 = vmatpush1.bf16.msra.mxu0 %v622_v1  ;;  %591 = vmatpush1.bf16.msra.mxu1 %v622_v1  ;;  %v628_v5 = vld [vmem:[#allocation6 + $0x20] ss:$8 sps:$4 sm:$0xff]   ;;  %v629_v6 = vld [vmem:[#allocation6 + $0x34] ss:$8 sps:$4 sm:$0xff]   ;;  %v631_v7 = vld [vmem:[#allocation6 + $0x30] ss:$8 sps:$4 sm:$0xff]   ;;  %v446_v1 = vlaneseq }
  0x5d   :  { %325 = vmatprep.subr.bf16.mxu0 %v623_v2  ;;  %576 = vmatprep.subr.bf16.mxu1 %v623_v2  ;;  %v632_v8 = vld [vmem:[#allocation6 + $0x44] ss:$8 sps:$4 sm:$0xff]   ;;  %v634_v9 = vld [vmem:[#allocation6 + $0x40] ss:$8 sps:$4 sm:$0xff]   ;;  %v635_v10 = vld [vmem:[#allocation6 + $0x54] ss:$8 sps:$4 sm:$0xff]  }
  0x5e   :  { %v637_v11 = vld [vmem:[#allocation6 + $0x50] ss:$8 sps:$4 sm:$0xff]   ;;  %v638_v12 = vld [vmem:[#allocation6 + $0x64] ss:$8 sps:$4 sm:$0xff]   ;;  %v640_v14 = vld [vmem:[#allocation6 + $0x60] ss:$8 sps:$4 sm:$0xff]  }
  0x5f   :  { %v670_v13 = vld [vmem:[#allocation3 + $0x4] ss:$8 sps:$4 sm:$0xff]   ;;  %v673_v15 = vld [vmem:[#allocation3 + $0x14] ss:$8 sps:$4 sm:$0xff]   ;;  %v643_v17 = vld [vmem:[#allocation6 + $0x70] ss:$8 sps:$4 sm:$0xff]  }
  0x60   :  { %326 = vmatpush1.bf16.msra.mxu0 %v625_v3  ;;  %592 = vmatpush1.bf16.msra.mxu1 %v625_v3  ;;  %v641_v16 = vld [vmem:[#allocation6 + $0x74] ss:$8 sps:$4 sm:$0xff]   ;;  %v644_v18 = vld [vmem:[#allocation6 + $0x84] ss:$8 sps:$4 sm:$0xff]   ;;  %v646_v19 = vld [vmem:[#allocation6 + $0x80] ss:$8 sps:$4 sm:$0xff]  }
  0x61   :  { %327 = vmatprep.subr.bf16.mxu0 %v626_v4  ;;  %577 = vmatprep.subr.bf16.mxu1 %v626_v4  ;;  %v647_v20 = vld [vmem:[#allocation6 + $0x94] ss:$8 sps:$4 sm:$0xff]   ;;  %v649_v21 = vld [vmem:[#allocation6 + $0x90] ss:$8 sps:$4 sm:$0xff]   ;;  %v650_v22 = vld [vmem:[#allocation6 + $0xa4] ss:$8 sps:$4 sm:$0xff]  }
  0x62   :  { %355 = vmatprep.mubr.bf16.mxu0 %v670_v13  ;;  %365 = vmatprep.mubr.bf16.mxu1 %v673_v15  ;;  %v652_v23 = vld [vmem:[#allocation6 + $0xa0] ss:$8 sps:$4 sm:$0xff]   ;;  %v653_v24 = vld [vmem:[#allocation6 + $0xb4] ss:$8 sps:$4 sm:$0xff]   ;;  %v655_v25 = vld [vmem:[#allocation6 + $0xb0] ss:$8 sps:$4 sm:$0xff]  }
  0x63   :  { %v656_v26 = vld [vmem:[#allocation6 + $0xc4] ss:$8 sps:$4 sm:$0xff]   ;;  %v658_v27 = vld [vmem:[#allocation6 + $0xc0] ss:$8 sps:$4 sm:$0xff]   ;;  %v659_v28 = vld [vmem:[#allocation6 + $0xd4] ss:$8 sps:$4 sm:$0xff]  }
  0x64   :  { %328 = vmatpush1.bf16.msra.mxu0 %v628_v5  ;;  %593 = vmatpush1.bf16.msra.mxu1 %v628_v5  ;;  %v661_v29 = vld [vmem:[#allocation6 + $0xd0] ss:$8 sps:$4 sm:$0xff]   ;;  %v662_v30 = vld [vmem:[#allocation6 + $0xe4] ss:$8 sps:$4 sm:$0xff]   ;;  %v664_v31 = vld [vmem:[#allocation6 + $0xe0] ss:$8 sps:$4 sm:$0xff]  }
  0x65   :  { %329 = vmatprep.subr.bf16.mxu0 %v629_v6  ;;  %578 = vmatprep.subr.bf16.mxu1 %v629_v6  ;;  %v665_v32 = vld [vmem:[#allocation6 + $0xf4] ss:$8 sps:$4 sm:$0xff]   ;;  %v667_v33 = vld [vmem:[#allocation6 + $0xf0] ss:$8 sps:$4 sm:$0xff]   ;;  %v668_v34 = vld [vmem:[#allocation3] ss:$8 sps:$4 sm:$0xff]  }
  0x66   :  { %v671_v35 = vld [vmem:[#allocation3 + $0x10] ss:$8 sps:$4 sm:$0xff]   ;;  %v831_v36 = vmov 0   ;;  %v473_v57 = vld [vmem:[#allocation9 + $0x8] sm:$0xff]  ;;  %v472_v59 = vld [vmem:[#allocation9] sm:$0xff]  ;;  %v447_v6 = vshrl.u32 %v446_v1, 7 }
  0x67   :  { %619 = vset.pattern.permute.xlu1 %v831_v36  ;;  %618 = vset.pattern.permute.xlu0 %v831_v36  ;;  %v474_v58 = vld [vmem:[#allocation9 + $0x10] sm:$0xff]  ;;  %v475_v60 = vld [vmem:[#allocation9 + $0x18] sm:$0xff]  ;;  %s832_s4 = smov [#allocation12]  }
  0x68   :  { %330 = vmatpush1.bf16.msra.mxu0 %v631_v7  ;;  %594 = vmatpush1.bf16.msra.mxu1 %v631_v7  ;;  %s525_s28 = sshll.u32 %s832_s4, 4  ;;  %s526_s28 = int_to_ptr.vmem [resolvable:$true] %s525_s28 }
  0x69   :  { %331 = vmatprep.subr.bf16.mxu0 %v632_v8  ;;  %579 = vmatprep.subr.bf16.mxu1 %v632_v8  ;;  %v448_v8 = vsub.s32 0, %v447_v6  ;;  %s792_s29 = scalar_lea.vmem %s526_s28, 1024  ;;  %p797_p13 = scmp.lt.s32.totalorder %s526_s28, %s526_s28 }
  0x6a   :  { %p793_p12 = scmp.ne.s32.totalorder %s526_s28, %s792_s29  ;;  %p798_p0 = scmp.lt.s32.totalorder %s792_s29, %s792_s29 }
  0x6c   :  { %332 = vmatpush1.bf16.msra.mxu0 %v634_v9  ;;  %595 = vmatpush1.bf16.msra.mxu1 %v634_v9  ;;  %v452_v9 = vsub.s32 1, %v447_v6  ;;  %p799_p1 = por %p798_p0, %p797_p13 }
  0x6d   :  { %333 = vmatprep.subr.bf16.mxu0 %v635_v10  ;;  %580 = vmatprep.subr.bf16.mxu1 %v635_v10  ;;  %v444_v10 = vld [vmem:[#allocation11] sm:$0x3] }
  0x6e   :  { %v453_v13 = vrot.slane %v444_v10, %v452_v9  ;;  %p800_p2 = pnand %p799_p1, %p793_p12 }
  0x70   :  { %334 = vmatpush1.bf16.msra.mxu0 %v637_v11  ;;  %596 = vmatpush1.bf16.msra.mxu1 %v637_v11 }
  0x71   :  { %335 = vmatprep.subr.bf16.mxu0 %v638_v12  ;;  %581 = vmatprep.subr.bf16.mxu1 %v638_v12  ;;  %v449_v12 = vrot.slane %v444_v10, %v448_v8 }
  0x74   :  { %336 = vmatpush1.bf16.msra.mxu0 %v640_v14  ;;  %597 = vmatpush1.bf16.msra.mxu1 %v640_v14 }
  0x75   :  { %337 = vmatprep.subr.bf16.mxu0 %v641_v16  ;;  %582 = vmatprep.subr.bf16.mxu1 %v641_v16 }
  0x78   :  { %338 = vmatpush1.bf16.msra.mxu0 %v643_v17  ;;  %598 = vmatpush1.bf16.msra.mxu1 %v643_v17 }
  0x79   :  { %339 = vmatprep.subr.bf16.mxu0 %v644_v18  ;;  %583 = vmatprep.subr.bf16.mxu1 %v644_v18 }
  0x7c   :  { %340 = vmatpush1.bf16.msra.mxu0 %v646_v19  ;;  %599 = vmatpush1.bf16.msra.mxu1 %v646_v19 }
  0x7d   :  { %341 = vmatprep.subr.bf16.mxu0 %v647_v20  ;;  %584 = vmatprep.subr.bf16.mxu1 %v647_v20 }
  0x80   :  { %342 = vmatpush1.bf16.msra.mxu0 %v649_v21  ;;  %600 = vmatpush1.bf16.msra.mxu1 %v649_v21 }
  0x81   :  { %343 = vmatprep.subr.bf16.mxu0 %v650_v22  ;;  %585 = vmatprep.subr.bf16.mxu1 %v650_v22 }
  0x84   :  { %344 = vmatpush1.bf16.msra.mxu0 %v652_v23  ;;  %601 = vmatpush1.bf16.msra.mxu1 %v652_v23 }
  0x85   :  { %345 = vmatprep.subr.bf16.mxu0 %v653_v24  ;;  %586 = vmatprep.subr.bf16.mxu1 %v653_v24  ;;  %v468_v24 = vld [vmem:[#allocation8 + $0x20] sm:$0xff] }
  0x88   :  { %346 = vmatpush1.bf16.msra.mxu0 %v655_v25  ;;  %602 = vmatpush1.bf16.msra.mxu1 %v655_v25  ;;  %v469_v25 = vld [vmem:[#allocation8 + $0x28] sm:$0xff] }
  0x89   :  { %347 = vmatprep.subr.bf16.mxu0 %v656_v26  ;;  %587 = vmatprep.subr.bf16.mxu1 %v656_v26 }
  0x8c   :  { %348 = vmatpush1.bf16.msra.mxu0 %v658_v27  ;;  %603 = vmatpush1.bf16.msra.mxu1 %v658_v27 }
  0x8d   :  { %349 = vmatprep.subr.bf16.mxu0 %v659_v28  ;;  %588 = vmatprep.subr.bf16.mxu1 %v659_v28 }
  0x90   :  { %350 = vmatpush1.bf16.msra.mxu0 %v661_v29  ;;  %604 = vmatpush1.bf16.msra.mxu1 %v661_v29 }
  0x91   :  { %351 = vmatprep.subr.bf16.mxu0 %v662_v30  ;;  %589 = vmatprep.subr.bf16.mxu1 %v662_v30 }
  0x94   :  { %352 = vmatpush1.bf16.msra.mxu0 %v664_v31  ;;  %605 = vmatpush1.bf16.msra.mxu1 %v664_v31 }
  0x95   :  { %353 = vmatprep.subr.bf16.mxu0 %v665_v32  ;;  %590 = vmatprep.subr.bf16.mxu1 %v665_v32 }
  0x98   :  { %354 = vmatpush1.bf16.msra.mxu0 %v667_v33  ;;  %606 = vmatpush1.bf16.msra.mxu1 %v667_v33  ;;  %v464_v33 = vld [vmem:[#allocation8] sm:$0xff] }
  0x9b   :  { %356 = vmatmul.mubr.bf16.vlgmr.msra.gmra.mrb[0].mxu0 %v668_v34  ;;  %366 = vmatmul.mubr.bf16.vlgmr.msra.gmra.mrb[0].mxu1 %v671_v35  ;;  %v465_v34 = vld [vmem:[#allocation8 + $0x8] sm:$0xff] }
 0x16e   :  { %v357_v37 = vpop.f32.mrb[0].mxu0  ;;  %v367_v38 = vpop.f32.mrb[0].mxu1 }
 0x16f   :  { %v403_v39 = vmul.f32 %v357_v37, %v357_v37  ;;  %v407_v40 = vmul.f32 %v367_v38, %v367_v38  ;;  %v359_v41 = vpop.f32.mrb[1].mxu0  ;;  %v369_v42 = vpop.f32.mrb[1].mxu1 }
 0x170   :  { %v404_v43 = vmul.f32 %v359_v41, %v359_v41  ;;  %v408_v44 = vmul.f32 %v369_v42, %v369_v42  ;;  %v949_v45 = vpop.f32.mrb[2].mxu1  ;;  %v361_v46 = vpop.f32.mrb[2].mxu0 }
 0x171   :  { %v409_v47 = vmul.f32 %v949_v45, %v949_v45  ;;  %v953_v48 = vpop.f32.mrb[3].mxu1  ;;  %v405_v49 = vmul.f32 %v361_v46, %v361_v46  ;;  %v363_v50 = vpop.f32.mrb[3].mxu0 }
 0x172   :  { %v410_v51 = vmul.f32 %v953_v48, %v953_v48  ;;  %v406_v52 = vmul.f32 %v363_v50, %v363_v50  ;;  %v417_v53 = vadd.f32 %v408_v44, %v407_v40  ;;  %v411_v54 = vadd.f32 %v404_v43, %v403_v39 }
 0x174   :  { %418 = vadd.xlane.f32.xlu1 %v417_v53  ;;  %412 = vadd.xlane.f32.xlu0 %v411_v54  ;;  %v414_v55 = vadd.f32 %v406_v52, %v405_v49  ;;  %v420_v56 = vadd.f32 %v410_v51, %v409_v47 }
 0x178   :  { %415 = vadd.xlane.f32.xlu0 %v414_v55 }
 0x185   :  { %483 = vperm.xlu1 %619, %v473_v57  }
 0x189   :  { %488 = vperm.xlu1 %619, %v474_v58  }
 0x18e   :  { %478 = vperm.xlu0 %618, %v472_v59   ;;  %v470_v59 = vld [vmem:[#allocation8 + $0x30] sm:$0xff] }
 0x1ad   :  { %421 = vadd.xlane.f32.xlu1 %v420_v56 }
 0x1be   :  { %493 = vperm.xlu1 %619, %v475_v60   ;;  %v471_v60 = vld [vmem:[#allocation8 + $0x38] sm:$0xff] }
 0x201   :  { %v419_v61 = vpop.xlane.xlu1 %418  ;;  %v413_v62 = vpop.xlane.xlu0 %412 }
 0x202   :  { %v426_v63 = vmul.f32 0.00390625, %v419_v61  ;;  %v424_v0 = vmul.f32 0.00390625, %v413_v62 }
 0x204   :  { %v430_v2 = vadd.f32 1e-05, %v426_v63  ;;  %v428_v3 = vadd.f32 1e-05, %v424_v0 }
 0x205   :  { %v416_v4 = vpop.xlane.xlu0 %415  ;;  %v484_v11 = vpop.permute.xlu1 %483 }
 0x206   :  { %674 = vrsqrt.f32 %v430_v2  ;;  %v425_v5 = vmul.f32 0.00390625, %v416_v4 }
 0x207   :  { %676 = vrsqrt.f32 %v428_v3 }
 0x208   :  { %v429_v7 = vadd.f32 1e-05, %v425_v5 }
 0x209   :  { %v489_v26 = vpop.permute.xlu1 %488 }
 0x20a   :  { %678 = vrsqrt.f32 %v429_v7 }
 0x20d   :  { %v479_v22 = vpop.permute.xlu0 %478 }
 0x210   :  { %v675_v14 = vpop.eup %674 }
 0x211   :  { %v677_v15 = vpop.eup %676  ;;  %v440_v16 = vmul.f32 %v675_v14, %v367_v38  ;;  %v441_v17 = vmul.f32 %v675_v14, %v369_v42  ;;  %v467_v42 = vld [vmem:[#allocation8 + $0x18] sm:$0xff] }
 0x212   :  { %v436_v18 = vmul.f32 %v677_v15, %v357_v37  ;;  %v437_v19 = vmul.f32 %v677_v15, %v359_v41  ;;  %v466_v41 = vld [vmem:[#allocation8 + $0x10] sm:$0xff] }
 0x213   :  { %v460_v20 = vmul.f32 %v449_v12, %v440_v16  ;;  %v461_v21 = vmul.f32 %v453_v13, %v441_v17 }
 0x214   :  { %v679_v23 = vpop.eup %678  ;;  %v456_v27 = vmul.f32 %v449_v12, %v436_v18  ;;  %v457_v28 = vmul.f32 %v453_v13, %v437_v19 }
 0x215   :  { %v438_v29 = vmul.f32 %v679_v23, %v361_v46  ;;  %v439_v30 = vmul.f32 %v679_v23, %v363_v50  ;;  %v500_v31 = vmul.f32 %v489_v26, %v460_v20  ;;  %v501_v32 = vmul.f32 %v489_v26, %v461_v21 }
 0x216   :  { %v496_v35 = vmul.f32 %v479_v22, %v456_v27  ;;  %v497_v36 = vmul.f32 %v479_v22, %v457_v28 }
 0x217   :  { %v458_v38 = vmul.f32 %v449_v12, %v438_v29  ;;  %v459_v37 = vmul.f32 %v453_v13, %v439_v30  ;;  %v508_v39 = vadd.f32 %v500_v31, %v468_v24  ;;  %v509_v40 = vadd.f32 %v501_v32, %v469_v25 }
 0x218   :  { %v504_v43 = vadd.f32 %v496_v35, %v464_v33  ;;  %v505_v44 = vadd.f32 %v497_v36, %v465_v34 }
 0x219   :  { %v498_v47 = vmul.f32 %v484_v11, %v458_v38  ;;  %v499_v49 = vmul.f32 %v484_v11, %v459_v37  ;;  %516 = vst [vmem:[#allocation12 + $0x20] sm:$0xff] %v508_v39  ;;  %517 = vst [vmem:[#allocation12 + $0x28] sm:$0xff] %v509_v40 }
 0x21a   :  { %512 = vst [vmem:[#allocation12] sm:$0xff] %v504_v43  ;;  %513 = vst [vmem:[#allocation12 + $0x8] sm:$0xff] %v505_v44 }
 0x21b   :  { %v506_v46 = vadd.f32 %v498_v47, %v466_v41  ;;  %v507_v50 = vadd.f32 %v499_v49, %v467_v42 }
 0x21d   :  { %514 = vst [vmem:[#allocation12 + $0x10] sm:$0xff] %v506_v46  ;;  %515 = vst [vmem:[#allocation12 + $0x18] sm:$0xff] %v507_v50 }
 0x23a   :  { %v422_v51 = vpop.xlane.xlu1 %421 }
 0x23b   :  { %v427_v52 = vmul.f32 0.00390625, %v422_v51 }
 0x23d   :  { %v431_v53 = vadd.f32 1e-05, %v427_v52 }
 0x23e   :  { %v494_v61 = vpop.permute.xlu1 %493 }
 0x23f   :  { %680 = vrsqrt.f32 %v431_v53 }
 0x249   :  { %v681_v54 = vpop.eup %680 }
 0x24a   :  { %v442_v55 = vmul.f32 %v681_v54, %v949_v45  ;;  %v443_v56 = vmul.f32 %v681_v54, %v953_v48 }
 0x24c   :  { %v462_v57 = vmul.f32 %v449_v12, %v442_v55  ;;  %v463_v58 = vmul.f32 %v453_v13, %v443_v56 }
 0x24e   :  { %v502_v62 = vmul.f32 %v494_v61, %v462_v57  ;;  %v503_v63 = vmul.f32 %v494_v61, %v463_v58 }
 0x250   :  { %v510_v0 = vadd.f32 %v502_v62, %v470_v59  ;;  %v511_v1 = vadd.f32 %v503_v63, %v471_v60 }
 0x252   :  { %518 = vst [vmem:[#allocation12 + $0x30] sm:$0xff] %v510_v0  ;;  %519 = vst [vmem:[#allocation12 + $0x38] sm:$0xff] %v511_v1 }
 0x253   :  { %803 = shalt.err (!%p800_p2)
}
 0x254   :  { %s804_s7 = scalar_lea.hbm %s979_s5, 1024 }
 0x255   :  { %p805_p3 = scmp.ne.s32.totalorder %s979_s5, %s804_s7  ;;  %p808_p4 = scmp.lt.u32.totalorder %s804_s7, %s979_s5 }
 0x257   :  { %p810_p5 = pnand %p808_p4, %p805_p3 }
 0x259   :  { %813 = shalt.err (!%p810_p5)
}
 0x25a   :  { %531 = dma.vmem_to_hbm [thread:$0]  %s526_s28, 1024, %s979_s5, [#allocation5], %s828_s0, %s828_s0, %s829_s30  }
 0x25b   :  { %820 = dma.done.wait [#allocation5], 1024  }
 0x25c   :  { %821 = vsyncadd [#allocation5], 4294966272 }
 0x25d   :  { %535 = vsyncpa [#allocation4], 1 }
 0x25e   :  { %536 = vsyncpa [#allocation7], 1 }
 0x25f   :  { %537 = vsyncpa [#allocation10], 1 }
 0x260   :  { %538 = vsyncpa [#allocation5], 1 }

// kernel: transformer_block.4
= control target key start
LH: loop header
LB: loop body
LE: loop exit
PB: predicated region body
PF: predicated region fallthrough
CT: control target
= control target key end

     0   :  { %10 = vsyncpa [#allocation3], 0  ;;  %s1627_s0 = inlined_call_operand.hbm [shape: f32[32,256], index: 0, kind: input, shape index: {}]   ;;  %s1628_s1 = inlined_call_operand.hbm [shape: f32[1,256], index: 1, kind: input, shape index: {}]   ;;  %s1629_s2 = inlined_call_operand.hbm [shape: bf16[256,512], index: 2, kind: input, shape index: {}]   ;;  %s1630_s3 = inlined_call_operand.hbm [shape: f32[32,128], index: 3, kind: input, shape index: {}]   ;;  %s1631_s4 = inlined_call_operand.hbm [shape: f32[32,128], index: 4, kind: input, shape index: {}]   ;;  %s1632_s5 = inlined_call_operand.hbm [shape: bf16[32,512], index: 5, kind: output, shape index: {}]  }
   0x1   :  { %11 = vsyncpa [#allocation6], 0 }
   0x2   :  { %12 = vsyncpa [#allocation9], 0 }
   0x3   :  { %13 = vsyncpa [#allocation4], 0  ;;  %s1344_s18 = smov [#allocation5]   ;;  %s1345_s20 = smov [#allocation8]  }
   0x4   :  { %s32_s19 = sshll.u32 %s1344_s18, 4  ;;  %s53_s21 = sshll.u32 %s1345_s20, 4  ;;  %s33_s19 = int_to_ptr.vmem [resolvable:$true] %s32_s19  ;;  %s1385_s21 = int_to_ptr.vmem [resolvable:$true] %s53_s21 }
   0x5   :  { %s1204_s24 = scalar_lea.hbm %s1628_s1, 32 }
   0x6   :  { %p1205_p0 = scmp.ne.s32.totalorder %s1628_s1, %s1204_s24  ;;  %p1208_p1 = scmp.lt.u32.totalorder %s1204_s24, %s1628_s1 }
   0x8   :  { %p1210_p2 = pnand %p1208_p1, %p1205_p0 }
   0xa   :  { %1213 = shalt.err (!%p1210_p2)
}
   0xb   :  { %s1214_s29 = scalar_lea.vmem %s33_s19, 32  ;;  %p1219_p4 = scmp.lt.s32.totalorder %s33_s19, %s33_s19 }
   0xc   :  { %p1215_p3 = scmp.ne.s32.totalorder %s33_s19, %s1214_s29  ;;  %p1220_p5 = scmp.lt.s32.totalorder %s1214_s29, %s1214_s29 }
   0xe   :  { %p1221_p6 = por %p1220_p5, %p1219_p4 }
  0x10   :  { %p1222_p7 = pnand %p1221_p6, %p1215_p3 }
  0x12   :  { %1225 = shalt.err (!%p1222_p7)
}
  0x13   :  { %35 = dma.hbm_to_vmem [thread:$0]  %s1628_s1, 32, %s33_s19, [#allocation6]  }
  0x14   :  { %s1226_s9 = scalar_lea.hbm %s1630_s3, 512 }
  0x15   :  { %p1227_p8 = scmp.ne.s32.totalorder %s1630_s3, %s1226_s9  ;;  %p1230_p9 = scmp.lt.u32.totalorder %s1226_s9, %s1630_s3 }
  0x17   :  { %p1232_p10 = pnand %p1230_p9, %p1227_p8 }
  0x19   :  { %1235 = shalt.err (!%p1232_p10)
}
  0x1a   :  { %s1236_s14 = scalar_lea.vmem %s1385_s21, 512  ;;  %p1241_p12 = scmp.lt.s32.totalorder %s1385_s21, %s1385_s21 }
  0x1b   :  { %p1237_p11 = scmp.ne.s32.totalorder %s1385_s21, %s1236_s14  ;;  %p1242_p13 = scmp.lt.s32.totalorder %s1236_s14, %s1236_s14 }
  0x1d   :  { %p1243_p0 = por %p1242_p13, %p1241_p12 }
  0x1f   :  { %p1244_p1 = pnand %p1243_p0, %p1237_p11 }
  0x21   :  { %1247 = shalt.err (!%p1244_p1)
}
  0x22   :  { %s1346_s1 = smov 128   ;;  %s1347_s15 = smov 8  }
  0x23   :  { %59 = dma.hbm_to_vmem [thread:$0]  %s1630_s3, 512, %s1385_s21, [#allocation9], %s1346_s1, %s1346_s1, %s1347_s15  }
  0x24   :  { %s1348_s18 = smov [#allocation2]   ;;  %s1248_s23 = scalar_lea.hbm %s1627_s0, 1024 }
  0x25   :  { %s19_s19 = sshll.u32 %s1348_s18, 4  ;;  %p1249_p2 = scmp.ne.s32.totalorder %s1627_s0, %s1248_s23  ;;  %s20_s19 = int_to_ptr.vmem [resolvable:$true] %s19_s19 }
  0x26   :  { %p1252_p3 = scmp.lt.u32.totalorder %s1248_s23, %s1627_s0 }
  0x28   :  { %p1254_p4 = pnand %p1252_p3, %p1249_p2 }
  0x2a   :  { %1257 = shalt.err (!%p1254_p4)
}
  0x2b   :  { %s1258_s28 = scalar_lea.vmem %s20_s19, 1024  ;;  %p1263_p6 = scmp.lt.s32.totalorder %s20_s19, %s20_s19 }
  0x2c   :  { %p1259_p5 = scmp.ne.s32.totalorder %s20_s19, %s1258_s28  ;;  %p1264_p7 = scmp.lt.s32.totalorder %s1258_s28, %s1258_s28 }
  0x2e   :  { %p1265_p8 = por %p1264_p7, %p1263_p6 }
  0x30   :  { %p1266_p9 = pnand %p1265_p8, %p1259_p5 }
  0x32   :  { %1269 = shalt.err (!%p1266_p9)
}
  0x33   :  { %s1349_s3 = smov 256   ;;  %s1350_s21 = smov 16  }
  0x34   :  { %25 = dma.hbm_to_vmem [thread:$0]  %s1627_s0, 1024, %s20_s19, [#allocation3], %s1349_s3, %s1349_s3, %s1350_s21  }
  0x35   :  { %s1351_s6 = smov [#allocation7]   ;;  %s1352_s8 = smov [#allocation10]  }
  0x36   :  { %s41_s7 = sshll.u32 %s1351_s6, 4  ;;  %s65_s9 = sshll.u32 %s1352_s8, 4  ;;  %s42_s7 = int_to_ptr.vmem [resolvable:$true] %s41_s7  ;;  %s66_s9 = int_to_ptr.vmem [resolvable:$true] %s65_s9 }
  0x37   :  { %s1270_s12 = scalar_lea.hbm %s1629_s2, 8192 }
  0x38   :  { %p1271_p10 = scmp.ne.s32.totalorder %s1629_s2, %s1270_s12  ;;  %p1274_p11 = scmp.lt.u32.totalorder %s1270_s12, %s1629_s2 }
  0x3a   :  { %p1276_p12 = pnand %p1274_p11, %p1271_p10 }
  0x3c   :  { %1279 = shalt.err (!%p1276_p12)
}
  0x3d   :  { %s1280_s0 = scalar_lea.vmem %s42_s7, 8192  ;;  %p1285_p0 = scmp.lt.s32.totalorder %s42_s7, %s42_s7 }
  0x3e   :  { %p1281_p13 = scmp.ne.s32.totalorder %s42_s7, %s1280_s0  ;;  %p1286_p1 = scmp.lt.s32.totalorder %s1280_s0, %s1280_s0 }
  0x40   :  { %p1287_p2 = por %p1286_p1, %p1285_p0 }
  0x42   :  { %p1288_p3 = pnand %p1287_p2, %p1281_p13 }
  0x44   :  { %1291 = shalt.err (!%p1288_p3)
}
  0x45   :  { %47 = dma.hbm_to_vmem [thread:$0]  %s1629_s2, 8192, %s42_s7, [#allocation6], %s1349_s3, %s1349_s3, %s1350_s21  }
  0x46   :  { %s1292_s23 = scalar_lea.hbm %s1631_s4, 512 }
  0x47   :  { %p1293_p4 = scmp.ne.s32.totalorder %s1631_s4, %s1292_s23  ;;  %p1296_p5 = scmp.lt.u32.totalorder %s1292_s23, %s1631_s4 }
  0x49   :  { %p1298_p6 = pnand %p1296_p5, %p1293_p4 }
  0x4b   :  { %1301 = shalt.err (!%p1298_p6)
}
  0x4c   :  { %s1302_s28 = scalar_lea.vmem %s66_s9, 512  ;;  %p1307_p8 = scmp.lt.s32.totalorder %s66_s9, %s66_s9 }
  0x4d   :  { %p1303_p7 = scmp.ne.s32.totalorder %s66_s9, %s1302_s28  ;;  %p1308_p9 = scmp.lt.s32.totalorder %s1302_s28, %s1302_s28 }
  0x4f   :  { %p1309_p10 = por %p1308_p9, %p1307_p8 }
  0x51   :  { %p1310_p11 = pnand %p1309_p10, %p1303_p7 }
  0x53   :  { %1313 = shalt.err (!%p1310_p11)
}
  0x54   :  { %71 = dma.hbm_to_vmem [thread:$0]  %s1631_s4, 512, %s66_s9, [#allocation9], %s1346_s1, %s1346_s1, %s1347_s15  }
  0x55   :  { %1336 = dma.done.wait [#allocation3], 1024  }
  0x56   :  { %1337 = vsyncadd [#allocation3], 4294966272 }
  0x57   :  { %1338 = dma.done.wait [#allocation6], 8224  }
  0x58   :  { %1339 = vsyncadd [#allocation6], 4294959072 }
  0x59   :  { %1340 = dma.done.wait [#allocation9], 1024  }
  0x5a   :  { %1341 = vsyncadd [#allocation9], 4294966272  ;;  %v1464_v0 = vld [vmem:[#allocation2] sm:$0xff]  ;;  %v1466_v1 = vld [vmem:[#allocation2 + $0x8] sm:$0xff]  ;;  %s1353_s4 = smov 64   ;;  %vm694_vm0 = vcmask 523264  }
  0x5b   :  { %v1468_v2 = vld [vmem:[#allocation2 + $0x10] sm:$0xff]  ;;  %v95_v3 = vmul.f32 %v1464_v0, %v1464_v0  ;;  %v96_v4 = vmul.f32 %v1466_v1, %v1466_v1  ;;  %v1474_v5 = vld [vmem:[#allocation2 + $0x18] sm:$0xff]  ;;  %v1478_v7 = vld [vmem:[#allocation2 + $0x20] sm:$0xff]  ;;  %s1354_s1 = smov [#allocation11]  }
  0x5c   :  { %v97_v6 = vmul.f32 %v1468_v2, %v1468_v2  ;;  %v1480_v8 = vld [vmem:[#allocation2 + $0x28] sm:$0xff]  ;;  %v98_v9 = vmul.f32 %v1474_v5, %v1474_v5  ;;  %v99_v10 = vmul.f32 %v1478_v7, %v1478_v7  ;;  %v1488_v12 = vld [vmem:[#allocation2 + $0x30] sm:$0xff]  ;;  %v1490_v13 = vld [vmem:[#allocation2 + $0x38] sm:$0xff]  ;;  %s995_s15 = sshll.u32 %s1354_s1, 4  ;;  %s996_s15 = int_to_ptr.vmem [resolvable:$true] %s995_s15 }
  0x5d   :  { %v100_v11 = vmul.f32 %v1480_v8, %v1480_v8  ;;  %v103_v14 = vadd.f32 %v96_v4, %v95_v3  ;;  %v101_v15 = vmul.f32 %v1488_v12, %v1488_v12  ;;  %v102_v16 = vmul.f32 %v1490_v13, %v1490_v13  ;;  %v1100_v17 = vld [vmem:[#allocation7 + $0x4] ss:$16 sps:$4 sm:$0xff]   ;;  %v1102_v19 = vld [vmem:[#allocation7 + $0xc] ss:$16 sps:$4 sm:$0xff]   ;;  %v1104_v20 = vld [vmem:[#allocation7] ss:$16 sps:$4 sm:$0xff]   ;;  %p1319_p13 = scmp.lt.s32.totalorder %s996_s15, %s996_s15 }
  0x5e   :  { %v106_v21 = vadd.f32 %v98_v9, %v97_v6  ;;  %544 = vmatprep.subr.bf16.mxu0 %v1100_v17  ;;  %v1105_v22 = vld [vmem:[#allocation7 + $0x8] ss:$16 sps:$4 sm:$0xff]   ;;  %597 = vmatprep.subr.bf16.mxu1 %v1102_v19  ;;  %v1106_v24 = vld [vmem:[#allocation7 + $0x24] ss:$16 sps:$4 sm:$0xff]   ;;  %v1108_v25 = vld [vmem:[#allocation7 + $0x2c] ss:$16 sps:$4 sm:$0xff]  }
  0x5f   :  { %v109_v18 = vadd.f32 %v100_v11, %v99_v10  ;;  %104 = vadd.xlane.f32.xlu0 %v103_v14  ;;  %v112_v23 = vadd.f32 %v102_v16, %v101_v15  ;;  %545 = vmatpush1.bf16.msra.mxu0 %v1104_v20  ;;  %v1110_v26 = vld [vmem:[#allocation7 + $0x20] ss:$16 sps:$4 sm:$0xff]   ;;  %v1111_v27 = vld [vmem:[#allocation7 + $0x28] ss:$16 sps:$4 sm:$0xff]   ;;  %v1112_v28 = vld [vmem:[#allocation7 + $0x44] ss:$16 sps:$4 sm:$0xff]  }
  0x60   :  { %598 = vmatpush1.bf16.msra.mxu1 %v1105_v22  ;;  %546 = vmatprep.subr.bf16.mxu0 %v1106_v24  ;;  %v1114_v29 = vld [vmem:[#allocation7 + $0x4c] ss:$16 sps:$4 sm:$0xff]   ;;  %v1116_v30 = vld [vmem:[#allocation7 + $0x40] ss:$16 sps:$4 sm:$0xff]   ;;  %v1117_v31 = vld [vmem:[#allocation7 + $0x48] ss:$16 sps:$4 sm:$0xff]  }
  0x61   :  { %110 = vadd.xlane.f32.xlu1 %v109_v18  ;;  %599 = vmatprep.subr.bf16.mxu1 %v1108_v25  ;;  %v1118_v32 = vld [vmem:[#allocation7 + $0x64] ss:$16 sps:$4 sm:$0xff]   ;;  %v1120_v33 = vld [vmem:[#allocation7 + $0x6c] ss:$16 sps:$4 sm:$0xff]   ;;  %v1122_v34 = vld [vmem:[#allocation7 + $0x60] ss:$16 sps:$4 sm:$0xff]  }
  0x62   :  { %v1123_v35 = vld [vmem:[#allocation7 + $0x68] ss:$16 sps:$4 sm:$0xff]   ;;  %v1124_v36 = vld [vmem:[#allocation7 + $0x84] ss:$16 sps:$4 sm:$0xff]   ;;  %v1126_v37 = vld [vmem:[#allocation7 + $0x8c] ss:$16 sps:$4 sm:$0xff]  }
  0x63   :  { %107 = vadd.xlane.f32.xlu0 %v106_v21  ;;  %547 = vmatpush1.bf16.msra.mxu0 %v1110_v26  ;;  %v1128_v38 = vld [vmem:[#allocation7 + $0x80] ss:$16 sps:$4 sm:$0xff]   ;;  %v1129_v39 = vld [vmem:[#allocation7 + $0x88] ss:$16 sps:$4 sm:$0xff]   ;;  %v1130_v40 = vld [vmem:[#allocation7 + $0xa4] ss:$16 sps:$4 sm:$0xff]  }
  0x64   :  { %600 = vmatpush1.bf16.msra.mxu1 %v1111_v27  ;;  %548 = vmatprep.subr.bf16.mxu0 %v1112_v28  ;;  %v1132_v41 = vld [vmem:[#allocation7 + $0xac] ss:$16 sps:$4 sm:$0xff]   ;;  %v1134_v42 = vld [vmem:[#allocation7 + $0xa0] ss:$16 sps:$4 sm:$0xff]   ;;  %v1135_v43 = vld [vmem:[#allocation7 + $0xa8] ss:$16 sps:$4 sm:$0xff]  }
  0x65   :  { %113 = vadd.xlane.f32.xlu1 %v112_v23  ;;  %601 = vmatprep.subr.bf16.mxu1 %v1114_v29  ;;  %v1136_v44 = vld [vmem:[#allocation7 + $0xc4] ss:$16 sps:$4 sm:$0xff]   ;;  %v1138_v45 = vld [vmem:[#allocation7 + $0xcc] ss:$16 sps:$4 sm:$0xff]   ;;  %v1140_v46 = vld [vmem:[#allocation7 + $0xc0] ss:$16 sps:$4 sm:$0xff]  }
  0x66   :  { %v1141_v47 = vld [vmem:[#allocation7 + $0xc8] ss:$16 sps:$4 sm:$0xff]   ;;  %v1142_v48 = vld [vmem:[#allocation7 + $0xe4] ss:$16 sps:$4 sm:$0xff]   ;;  %v1144_v49 = vld [vmem:[#allocation7 + $0xec] ss:$16 sps:$4 sm:$0xff]  }
  0x67   :  { %549 = vmatpush1.bf16.msra.mxu0 %v1116_v30  ;;  %v1146_v50 = vld [vmem:[#allocation7 + $0xe0] ss:$16 sps:$4 sm:$0xff]   ;;  %v1147_v51 = vld [vmem:[#allocation7 + $0xe8] ss:$16 sps:$4 sm:$0xff]   ;;  %v1148_v52 = vld [vmem:[#allocation7 + $0x104] ss:$16 sps:$4 sm:$0xff]  }
  0x68   :  { %602 = vmatpush1.bf16.msra.mxu1 %v1117_v31  ;;  %550 = vmatprep.subr.bf16.mxu0 %v1118_v32  ;;  %v1150_v53 = vld [vmem:[#allocation7 + $0x10c] ss:$16 sps:$4 sm:$0xff]   ;;  %v1152_v54 = vld [vmem:[#allocation7 + $0x100] ss:$16 sps:$4 sm:$0xff]   ;;  %v1153_v55 = vld [vmem:[#allocation7 + $0x108] ss:$16 sps:$4 sm:$0xff]  }
  0x69   :  { %603 = vmatprep.subr.bf16.mxu1 %v1120_v33  ;;  %v1154_v56 = vld [vmem:[#allocation7 + $0x124] ss:$16 sps:$4 sm:$0xff]   ;;  %v1156_v57 = vld [vmem:[#allocation7 + $0x12c] ss:$16 sps:$4 sm:$0xff]   ;;  %v1158_v58 = vld [vmem:[#allocation7 + $0x120] ss:$16 sps:$4 sm:$0xff]  }
  0x6a   :  { %v1159_v59 = vld [vmem:[#allocation7 + $0x128] ss:$16 sps:$4 sm:$0xff]   ;;  %v1160_v60 = vld [vmem:[#allocation7 + $0x144] ss:$16 sps:$4 sm:$0xff]   ;;  %v1162_v61 = vld [vmem:[#allocation7 + $0x14c] ss:$16 sps:$4 sm:$0xff]  }
  0x6b   :  { %551 = vmatpush1.bf16.msra.mxu0 %v1122_v34  ;;  %v1164_v62 = vld [vmem:[#allocation7 + $0x140] ss:$16 sps:$4 sm:$0xff]   ;;  %v1165_v63 = vld [vmem:[#allocation7 + $0x148] ss:$16 sps:$4 sm:$0xff]   ;;  %v1166_v3 = vld [vmem:[#allocation7 + $0x164] ss:$16 sps:$4 sm:$0xff]  }
  0x6c   :  { %604 = vmatpush1.bf16.msra.mxu1 %v1123_v35  ;;  %552 = vmatprep.subr.bf16.mxu0 %v1124_v36  ;;  %v1168_v4 = vld [vmem:[#allocation7 + $0x16c] ss:$16 sps:$4 sm:$0xff]   ;;  %v1170_v6 = vld [vmem:[#allocation7 + $0x160] ss:$16 sps:$4 sm:$0xff]   ;;  %v1171_v9 = vld [vmem:[#allocation7 + $0x168] ss:$16 sps:$4 sm:$0xff]  }
  0x6d   :  { %605 = vmatprep.subr.bf16.mxu1 %v1126_v37  ;;  %v1172_v10 = vld [vmem:[#allocation7 + $0x184] ss:$16 sps:$4 sm:$0xff]   ;;  %v1174_v11 = vld [vmem:[#allocation7 + $0x18c] ss:$16 sps:$4 sm:$0xff]   ;;  %v1176_v14 = vld [vmem:[#allocation7 + $0x180] ss:$16 sps:$4 sm:$0xff]  }
  0x6e   :  { %v1177_v15 = vld [vmem:[#allocation7 + $0x188] ss:$16 sps:$4 sm:$0xff]   ;;  %v1178_v16 = vld [vmem:[#allocation7 + $0x1a4] ss:$16 sps:$4 sm:$0xff]   ;;  %v1180_v17 = vld [vmem:[#allocation7 + $0x1ac] ss:$16 sps:$4 sm:$0xff]  }
  0x6f   :  { %553 = vmatpush1.bf16.msra.mxu0 %v1128_v38  ;;  %v1182_v18 = vld [vmem:[#allocation7 + $0x1a0] ss:$16 sps:$4 sm:$0xff]   ;;  %v1183_v19 = vld [vmem:[#allocation7 + $0x1a8] ss:$16 sps:$4 sm:$0xff]   ;;  %v1184_v20 = vld [vmem:[#allocation7 + $0x1c4] ss:$16 sps:$4 sm:$0xff]   ;;  %v138_v38 = vlaneseq }
  0x70   :  { %606 = vmatpush1.bf16.msra.mxu1 %v1129_v39  ;;  %554 = vmatprep.subr.bf16.mxu0 %v1130_v40  ;;  %v1186_v21 = vld [vmem:[#allocation7 + $0x1cc] ss:$16 sps:$4 sm:$0xff]   ;;  %v1188_v22 = vld [vmem:[#allocation7 + $0x1c0] ss:$16 sps:$4 sm:$0xff]   ;;  %v1189_v23 = vld [vmem:[#allocation7 + $0x1c8] ss:$16 sps:$4 sm:$0xff]  }
  0x71   :  { %607 = vmatprep.subr.bf16.mxu1 %v1132_v41  ;;  %v1190_v24 = vld [vmem:[#allocation7 + $0x1e4] ss:$16 sps:$4 sm:$0xff]   ;;  %v1192_v25 = vld [vmem:[#allocation7 + $0x1ec] ss:$16 sps:$4 sm:$0xff]   ;;  %v1194_v26 = vld [vmem:[#allocation7 + $0x1e0] ss:$16 sps:$4 sm:$0xff]  }
  0x72   :  { %v1195_v27 = vld [vmem:[#allocation7 + $0x1e8] ss:$16 sps:$4 sm:$0xff]   ;;  %v139_v41 = vshrl.u32 %v138_v38, 7  ;;  %s1314_s30 = scalar_lea.vmem %s996_s15, 1024 }
  0x73   :  { %555 = vmatpush1.bf16.msra.mxu0 %v1134_v42  ;;  %p1315_p12 = scmp.ne.s32.totalorder %s996_s15, %s1314_s30  ;;  %p1320_p0 = scmp.lt.s32.totalorder %s1314_s30, %s1314_s30 }
  0x74   :  { %608 = vmatpush1.bf16.msra.mxu1 %v1135_v43  ;;  %556 = vmatprep.subr.bf16.mxu0 %v1136_v44  ;;  %v140_v42 = vsub.s32 0, %v139_v41  ;;  %v144_v43 = vsub.s32 1, %v139_v41 }
  0x75   :  { %609 = vmatprep.subr.bf16.mxu1 %v1138_v45  ;;  %v136_v45 = vld [vmem:[#allocation5] sm:$0x3]  ;;  %p1321_p1 = por %p1320_p0, %p1319_p13 }
  0x77   :  { %557 = vmatpush1.bf16.msra.mxu0 %v1140_v46  ;;  %p1322_p2 = pnand %p1321_p1, %p1315_p12 }
  0x78   :  { %610 = vmatpush1.bf16.msra.mxu1 %v1141_v47  ;;  %558 = vmatprep.subr.bf16.mxu0 %v1142_v48 }
  0x79   :  { %611 = vmatprep.subr.bf16.mxu1 %v1144_v49  ;;  %v141_v49 = vrot.slane %v136_v45, %v140_v42 }
  0x7b   :  { %559 = vmatpush1.bf16.msra.mxu0 %v1146_v50  ;;  %v145_v50 = vrot.slane %v136_v45, %v144_v43  ;;  %v650_v43 = vld [vmem:[#allocation8] sm:$0xff] }
  0x7c   :  { %612 = vmatpush1.bf16.msra.mxu1 %v1147_v51  ;;  %560 = vmatprep.subr.bf16.mxu0 %v1148_v52 }
  0x7d   :  { %613 = vmatprep.subr.bf16.mxu1 %v1150_v53 }
  0x7f   :  { %561 = vmatpush1.bf16.msra.mxu0 %v1152_v54 }
  0x80   :  { %614 = vmatpush1.bf16.msra.mxu1 %v1153_v55  ;;  %562 = vmatprep.subr.bf16.mxu0 %v1154_v56 }
  0x81   :  { %615 = vmatprep.subr.bf16.mxu1 %v1156_v57 }
  0x83   :  { %563 = vmatpush1.bf16.msra.mxu0 %v1158_v58 }
  0x84   :  { %616 = vmatpush1.bf16.msra.mxu1 %v1159_v59  ;;  %564 = vmatprep.subr.bf16.mxu0 %v1160_v60 }
  0x85   :  { %617 = vmatprep.subr.bf16.mxu1 %v1162_v61 }
  0x87   :  { %565 = vmatpush1.bf16.msra.mxu0 %v1164_v62 }
  0x88   :  { %618 = vmatpush1.bf16.msra.mxu1 %v1165_v63  ;;  %566 = vmatprep.subr.bf16.mxu0 %v1166_v3 }
  0x89   :  { %619 = vmatprep.subr.bf16.mxu1 %v1168_v4 }
  0x8b   :  { %567 = vmatpush1.bf16.msra.mxu0 %v1170_v6 }
  0x8c   :  { %620 = vmatpush1.bf16.msra.mxu1 %v1171_v9  ;;  %568 = vmatprep.subr.bf16.mxu0 %v1172_v10 }
  0x8d   :  { %621 = vmatprep.subr.bf16.mxu1 %v1174_v11 }
  0x8f   :  { %569 = vmatpush1.bf16.msra.mxu0 %v1176_v14 }
  0x90   :  { %622 = vmatpush1.bf16.msra.mxu1 %v1177_v15  ;;  %570 = vmatprep.subr.bf16.mxu0 %v1178_v16 }
  0x91   :  { %623 = vmatprep.subr.bf16.mxu1 %v1180_v17 }
  0x93   :  { %571 = vmatpush1.bf16.msra.mxu0 %v1182_v18 }
  0x94   :  { %624 = vmatpush1.bf16.msra.mxu1 %v1183_v19  ;;  %572 = vmatprep.subr.bf16.mxu0 %v1184_v20 }
  0x95   :  { %625 = vmatprep.subr.bf16.mxu1 %v1186_v21 }
  0x97   :  { %573 = vmatpush1.bf16.msra.mxu0 %v1188_v22 }
  0x98   :  { %626 = vmatpush1.bf16.msra.mxu1 %v1189_v23  ;;  %574 = vmatprep.subr.bf16.mxu0 %v1190_v24 }
  0x99   :  { %627 = vmatprep.subr.bf16.mxu1 %v1192_v25 }
  0x9b   :  { %575 = vmatpush1.bf16.msra.mxu0 %v1194_v26 }
  0x9c   :  { %628 = vmatpush1.bf16.msra.mxu1 %v1195_v27 }
  0xec   :  { %v105_v28 = vpop.xlane.xlu0 %104 }
  0xed   :  { %v116_v29 = vmul.f32 0.00390625, %v105_v28 }
  0xee   :  { %v111_v30 = vpop.xlane.xlu1 %110 }
  0xef   :  { %v118_v31 = vmul.f32 0.00390625, %v111_v30  ;;  %v120_v32 = vadd.f32 1e-05, %v116_v29 }
  0xf0   :  { %v108_v33 = vpop.xlane.xlu0 %107 }
  0xf1   :  { %v122_v34 = vadd.f32 1e-05, %v118_v31  ;;  %1196 = vrsqrt.f32 %v120_v32  ;;  %v117_v35 = vmul.f32 0.00390625, %v108_v33 }
  0xf2   :  { %v114_v36 = vpop.xlane.xlu1 %113 }
  0xf3   :  { %1198 = vrsqrt.f32 %v122_v34  ;;  %v119_v37 = vmul.f32 0.00390625, %v114_v36  ;;  %v121_v39 = vadd.f32 1e-05, %v117_v35 }
  0xf5   :  { %v123_v40 = vadd.f32 1e-05, %v119_v37  ;;  %1200 = vrsqrt.f32 %v121_v39 }
  0xf7   :  { %1202 = vrsqrt.f32 %v123_v40 }
  0xfb   :  { %v1197_v44 = vpop.eup %1196 }
  0xfc   :  { %v129_v48 = vmul.f32 %v1197_v44, %v1466_v1  ;;  %v128_v51 = vmul.f32 %v1197_v44, %v1464_v0  ;;  %v654_v44 = vld [vmem:[#allocation10] sm:$0xff] }
  0xfd   :  { %v1199_v46 = vpop.eup %1198 }
  0xfe   :  { %v133_v47 = vmul.f32 %v1199_v46, %v1480_v8  ;;  %v149_v58 = vmul.f32 %v145_v50, %v129_v48  ;;  %v148_v60 = vmul.f32 %v141_v49, %v128_v51  ;;  %v132_v1 = vmul.f32 %v1199_v46, %v1478_v7  ;;  %v655_v48 = vld [vmem:[#allocation10 + $0x8] sm:$0xff] }
  0xff   :  { %v1201_v52 = vpop.eup %1200 }
 0x100   :  { %v131_v54 = vmul.f32 %v1201_v52, %v1474_v5  ;;  %v130_v55 = vmul.f32 %v1201_v52, %v1468_v2  ;;  %v153_v57 = vmul.f32 %v145_v50, %v133_v47  ;;  %v152_v2 = vmul.f32 %v141_v49, %v132_v1  ;;  %v651_v47 = vld [vmem:[#allocation8 + $0x8] sm:$0xff] }
 0x101   :  { %v1203_v53 = vpop.eup %1202 }
 0x102   :  { %v135_v56 = vmul.f32 %v1203_v53, %v1490_v13  ;;  %v151_v59 = vmul.f32 %v145_v50, %v131_v54  ;;  %v150_v61 = vmul.f32 %v141_v49, %v130_v55  ;;  %v134_v62 = vmul.f32 %v1203_v53, %v1488_v12 }
 0x104   :  { %v155_v8 = vmul.f32 %v145_v50, %v135_v56  ;;  %v157_v63 = vpack.c.bf16 %v151_v59, %v149_v58  ;;  %v156_v0 = vpack.c.bf16 %v150_v61, %v148_v60  ;;  %v154_v5 = vmul.f32 %v141_v49, %v134_v62 }
 0x106   :  { %v159_v3 = vpack.c.bf16 %v155_v8, %v153_v57  ;;  %576 = vmatprep.mubr.bf16.mxu0 %v157_v63  ;;  %629 = vmatprep.mubr.bf16.mxu1 %v157_v63  ;;  %v158_v13 = vpack.c.bf16 %v154_v5, %v152_v2 }
 0x107   :  { %577 = vmatmul.mubr.bf16.vlgmr.msra.gmra.mrb[0].mxu0 %v156_v0  ;;  %630 = vmatmul.mubr.bf16.vlgmr.msra.gmra.mrb[0].mxu1 %v156_v0 }
 0x108   :  { %586 = vmatprep.mubr.bf16.mxu0 %v159_v3  ;;  %639 = vmatprep.mubr.bf16.mxu1 %v159_v3 }
 0x10f   :  { %587 = vmatmul.mubr.bf16.gmra.mrb[4].mxu0 %v158_v13  ;;  %640 = vmatmul.mubr.bf16.gmra.mrb[4].mxu1 %v158_v13 }
 0x1da   :  { %v1504_v4 = vpop.f32.mrb[0].mxu0  ;;  %v1506_v6 = vpop.f32.mrb[0].mxu1 }
 0x1db   :  { %v1508_v7 = vpop.f32.mrb[1].mxu1  ;;  %682 = vrot.lane.b32.xlu0 %v1504_v4, %s1353_s4  ;;  %v1512_v12 = vpop.f32.mrb[1].mxu0  ;;  %v658_v21 = vsub.f32 0.0, %v1504_v4  ;;  %v739_v25 = vsub.f32 0.0, %v1506_v6  ;;  %v821_v51 = vmul.f32 %v650_v43, %v1506_v6  ;;  %v819_v55 = vmul.f32 %v650_v43, %v1504_v4 }
 0x1dc   :  { %v1514_v9 = vpop.f32.mrb[2].mxu0  ;;  %v1516_v10 = vpop.f32.mrb[2].mxu1  ;;  %v699_v27 = vsub.f32 0.0, %v1512_v12  ;;  %v820_v8 = vmul.f32 %v650_v43, %v1512_v12 }
 0x1dd   :  { %v1518_v11 = vpop.f32.mrb[3].mxu1  ;;  %684 = vrot.lane.b32.xlu1 %v1514_v9, %s1353_s4  ;;  %v1522_v14 = vpop.f32.mrb[3].mxu0  ;;  %v659_v24 = vsub.f32 0.0, %v1514_v9  ;;  %v740_v26 = vsub.f32 0.0, %v1516_v10  ;;  %v825_v57 = vmul.f32 %v651_v47, %v1516_v10  ;;  %v823_v1 = vmul.f32 %v651_v47, %v1514_v9 }
 0x1de   :  { %v700_v28 = vsub.f32 0.0, %v1522_v14  ;;  %v824_v13 = vmul.f32 %v651_v47, %v1522_v14 }
 0x1df   :  { %763 = vrot.lane.b32.xlu0 %v1506_v6, %s1353_s4 }
 0x1e1   :  { %765 = vrot.lane.b32.xlu1 %v1516_v10, %s1353_s4 }
 0x1e2   :  { %v1528_v15 = vpop.f32.mrb[4].mxu0  ;;  %v1530_v16 = vpop.f32.mrb[4].mxu1 }
 0x1e3   :  { %723 = vrot.lane.b32.xlu0 %v1512_v12, %s1353_s4  ;;  %v1534_v17 = vpop.f32.mrb[5].mxu1  ;;  %v1536_v18 = vpop.f32.mrb[5].mxu0  ;;  %v660_v29 = vsub.f32 0.0, %v1528_v15  ;;  %v741_v30 = vsub.f32 0.0, %v1530_v16 }
 0x1e4   :  { %v1538_v19 = vpop.f32.mrb[6].mxu0  ;;  %v1540_v20 = vpop.f32.mrb[6].mxu1  ;;  %v701_v31 = vsub.f32 0.0, %v1536_v18 }
 0x1e5   :  { %725 = vrot.lane.b32.xlu1 %v1522_v14, %s1353_s4  ;;  %v1545_v22 = vpop.f32.mrb[7].mxu1  ;;  %v1547_v23 = vpop.f32.mrb[7].mxu0  ;;  %v661_v32 = vsub.f32 0.0, %v1538_v19  ;;  %v742_v33 = vsub.f32 0.0, %v1540_v20 }
 0x1e6   :  { %v702_v34 = vsub.f32 0.0, %v1547_v23 }
 0x1e7   :  { %666 = vrot.lane.b32.xlu0 %v658_v21, %s1353_s4 }
 0x1e9   :  { %668 = vrot.lane.b32.xlu1 %v659_v24, %s1353_s4 }
 0x1eb   :  { %747 = vrot.lane.b32.xlu0 %v739_v25, %s1353_s4 }
 0x1ed   :  { %749 = vrot.lane.b32.xlu1 %v740_v26, %s1353_s4 }
 0x1ef   :  { %707 = vrot.lane.b32.xlu0 %v699_v27, %s1353_s4 }
 0x1f1   :  { %709 = vrot.lane.b32.xlu1 %v700_v28, %s1353_s4 }
 0x1f3   :  { %686 = vrot.lane.b32.xlu0 %v1528_v15, %s1353_s4 }
 0x1f5   :  { %670 = vrot.lane.b32.xlu1 %v660_v29, %s1353_s4 }
 0x1f7   :  { %727 = vrot.lane.b32.xlu0 %v1536_v18, %s1353_s4 }
 0x1f9   :  { %688 = vrot.lane.b32.xlu1 %v1538_v19, %s1353_s4 }
 0x1fb   :  { %751 = vrot.lane.b32.xlu0 %v741_v30, %s1353_s4 }
 0x1fd   :  { %729 = vrot.lane.b32.xlu1 %v1547_v23, %s1353_s4 }
 0x1ff   :  { %711 = vrot.lane.b32.xlu0 %v701_v31, %s1353_s4 }
 0x201   :  { %672 = vrot.lane.b32.xlu1 %v661_v32, %s1353_s4  ;;  %v656_v32 = vld [vmem:[#allocation10 + $0x10] sm:$0xff] }
 0x203   :  { %767 = vrot.lane.b32.xlu0 %v1530_v16, %s1353_s4 }
 0x205   :  { %753 = vrot.lane.b32.xlu1 %v742_v33, %s1353_s4 }
 0x209   :  { %713 = vrot.lane.b32.xlu1 %v702_v34, %s1353_s4  ;;  %v652_v34 = vld [vmem:[#allocation8 + $0x10] sm:$0xff] }
 0x20d   :  { %769 = vrot.lane.b32.xlu1 %v1540_v20, %s1353_s4 }
 0x24d   :  { %v683_v35 = vpop.permute.xlu0 %682 }
 0x24f   :  { %v685_v36 = vpop.permute.xlu1 %684 }
 0x251   :  { %v764_v37 = vpop.permute.xlu0 %763 }
 0x253   :  { %v766_v38 = vpop.permute.xlu1 %765 }
 0x255   :  { %v724_v39 = vpop.permute.xlu0 %723 }
 0x257   :  { %v726_v40 = vpop.permute.xlu1 %725 }
 0x259   :  { %v667_v41 = vpop.permute.xlu0 %666 }
 0x25a   :  { %v695_v45 = vsel %vm694_vm0, %v667_v41, %v683_v35 }
 0x25b   :  { %v669_v42 = vpop.permute.xlu1 %668  ;;  %v835_v52 = vmul.f32 %v695_v45, %v654_v44 }
 0x25c   :  { %v696_v49 = vsel %vm694_vm0, %v669_v42, %v685_v36 }
 0x25d   :  { %v748_v46 = vpop.permute.xlu0 %747  ;;  %v839_v58 = vmul.f32 %v696_v49, %v655_v48  ;;  %v851_v63 = vadd.f32 %v835_v52, %v819_v55  ;;  %v829_v49 = vmul.f32 %v652_v34, %v1530_v16 }
 0x25e   :  { %v775_v50 = vsel %vm694_vm0, %v748_v46, %v764_v37  ;;  %v827_v37 = vmul.f32 %v652_v34, %v1528_v15  ;;  %v657_v46 = vld [vmem:[#allocation10 + $0x18] sm:$0xff] }
 0x25f   :  { %v837_v53 = vmul.f32 %v775_v50, %v654_v44  ;;  %v750_v54 = vpop.permute.xlu1 %749  ;;  %v855_v6 = vadd.f32 %v839_v58, %v823_v1  ;;  %v902_v9 = vmul.f32 0.088388346, %v851_v63 }
 0x260   :  { %v776_v56 = vsel %vm694_vm0, %v750_v54, %v766_v38 }
 0x261   :  { %v853_v59 = vadd.f32 %v837_v53, %v821_v51  ;;  %v841_v60 = vmul.f32 %v776_v56, %v655_v48  ;;  %v708_v61 = vpop.permute.xlu0 %707  ;;  %v653_v53 = vld [vmem:[#allocation8 + $0x18] sm:$0xff] }
 0x262   :  { %v735_v62 = vsel %vm694_vm0, %v708_v61, %v724_v39  ;;  %v831_v56 = vmul.f32 %v653_v53, %v1538_v19  ;;  %v833_v63 = vmul.f32 %v653_v53, %v1540_v20 }
 0x263   :  { %v1082_v0 = vpack.c.bf16 %v1508_v7, %v853_v59  ;;  %v857_v3 = vadd.f32 %v841_v60, %v825_v57  ;;  %v836_v2 = vmul.f32 %v735_v62, %v654_v44  ;;  %v710_v5 = vpop.permute.xlu1 %709  ;;  %v906_v7 = vmul.f32 0.088388346, %v855_v6 }
 0x264   :  { %v736_v4 = vsel %vm694_vm0, %v710_v5, %v726_v40  ;;  %v828_v40 = vmul.f32 %v652_v34, %v1536_v18  ;;  %v832_v60 = vmul.f32 %v653_v53, %v1547_v23 }
 0x265   :  { %983 = vst [vmem:[#allocation11 + $0x8] sm:$0xff] %v1082_v0  ;;  %v1084_v10 = vpack.c.bf16 %v1518_v11, %v857_v3  ;;  %v852_v21 = vadd.f32 %v836_v2, %v820_v8  ;;  %v840_v12 = vmul.f32 %v736_v4, %v655_v48  ;;  %v687_v24 = vpop.permute.xlu0 %686 }
 0x267   :  { %985 = vst [vmem:[#allocation11 + $0x18] sm:$0xff] %v1084_v10  ;;  %v903_v25 = vmul.f32 0.088388346, %v852_v21  ;;  %v856_v26 = vadd.f32 %v840_v12, %v824_v13  ;;  %v671_v27 = vpop.permute.xlu1 %670 }
 0x268   :  { %v697_v33 = vsel %vm694_vm0, %v671_v27, %v687_v24 }
 0x269   :  { %v1081_v28 = vpack.c.bf16 %v903_v25, %v902_v9  ;;  %v907_v29 = vmul.f32 0.088388346, %v856_v26  ;;  %v728_v30 = vpop.permute.xlu0 %727  ;;  %v843_v35 = vmul.f32 %v697_v33, %v656_v32 }
 0x26b   :  { %982 = vst [vmem:[#allocation11] sm:$0xff] %v1081_v28  ;;  %v1083_v14 = vpack.c.bf16 %v907_v29, %v906_v7  ;;  %v689_v31 = vpop.permute.xlu1 %688  ;;  %v859_v41 = vadd.f32 %v843_v35, %v827_v37 }
 0x26d   :  { %984 = vst [vmem:[#allocation11 + $0x10] sm:$0xff] %v1083_v14  ;;  %v752_v11 = vpop.permute.xlu0 %751  ;;  %v910_v50 = vmul.f32 0.088388346, %v859_v41 }
 0x26f   :  { %v730_v36 = vpop.permute.xlu1 %729 }
 0x271   :  { %v712_v38 = vpop.permute.xlu0 %711 }
 0x272   :  { %v737_v39 = vsel %vm694_vm0, %v712_v38, %v728_v30 }
 0x273   :  { %v844_v42 = vmul.f32 %v737_v39, %v656_v32  ;;  %v673_v43 = vpop.permute.xlu1 %672 }
 0x274   :  { %v698_v47 = vsel %vm694_vm0, %v673_v43, %v689_v31 }
 0x275   :  { %v860_v44 = vadd.f32 %v844_v42, %v828_v40  ;;  %v768_v45 = vpop.permute.xlu0 %767  ;;  %v847_v55 = vmul.f32 %v698_v47, %v657_v46 }
 0x276   :  { %v777_v48 = vsel %vm694_vm0, %v752_v11, %v768_v45 }
 0x277   :  { %v911_v51 = vmul.f32 0.088388346, %v860_v44  ;;  %v845_v15 = vmul.f32 %v777_v48, %v656_v32  ;;  %v754_v52 = vpop.permute.xlu1 %753  ;;  %v863_v61 = vadd.f32 %v847_v55, %v831_v56 }
 0x279   :  { %v1085_v54 = vpack.c.bf16 %v911_v51, %v910_v50  ;;  %v861_v18 = vadd.f32 %v845_v15, %v829_v49  ;;  %v914_v0 = vmul.f32 0.088388346, %v863_v61 }
 0x27b   :  { %986 = vst [vmem:[#allocation11 + $0x20] sm:$0xff] %v1085_v54  ;;  %v1086_v57 = vpack.c.bf16 %v1534_v17, %v861_v18  ;;  %v714_v58 = vpop.permute.xlu1 %713 }
 0x27c   :  { %v738_v59 = vsel %vm694_vm0, %v714_v58, %v730_v36 }
 0x27d   :  { %987 = vst [vmem:[#allocation11 + $0x28] sm:$0xff] %v1086_v57  ;;  %v848_v16 = vmul.f32 %v738_v59, %v657_v46 }
 0x27f   :  { %v864_v8 = vadd.f32 %v848_v16, %v832_v60  ;;  %v770_v1 = vpop.permute.xlu1 %769 }
 0x280   :  { %v778_v62 = vsel %vm694_vm0, %v754_v52, %v770_v1 }
 0x281   :  { %v915_v3 = vmul.f32 0.088388346, %v864_v8  ;;  %v849_v19 = vmul.f32 %v778_v62, %v657_v46 }
 0x283   :  { %v1087_v17 = vpack.c.bf16 %v915_v3, %v914_v0  ;;  %v865_v2 = vadd.f32 %v849_v19, %v833_v63 }
 0x285   :  { %988 = vst [vmem:[#allocation11 + $0x30] sm:$0xff] %v1087_v17  ;;  %v1088_v5 = vpack.c.bf16 %v1545_v22, %v865_v2 }
 0x287   :  { %989 = vst [vmem:[#allocation11 + $0x38] sm:$0xff] %v1088_v5 }
 0x288   :  { %1325 = shalt.err (!%p1322_p2)
}
 0x289   :  { %s1326_s8 = scalar_lea.hbm %s1632_s5, 1024 }
 0x28a   :  { %p1327_p3 = scmp.ne.s32.totalorder %s1632_s5, %s1326_s8  ;;  %p1330_p4 = scmp.lt.u32.totalorder %s1326_s8, %s1632_s5 }
 0x28c   :  { %p1332_p5 = pnand %p1330_p4, %p1327_p3 }
 0x28e   :  { %1335 = shalt.err (!%p1332_p5)
}
 0x28f   :  { %1001 = dma.vmem_to_hbm [thread:$0]  %s996_s15, 1024, %s1632_s5, [#allocation4], %s1349_s3, %s1349_s3, %s1350_s21  }
 0x290   :  { %1342 = dma.done.wait [#allocation4], 1024  }
 0x291   :  { %1343 = vsyncadd [#allocation4], 4294966272 }
 0x292   :  { %1005 = vsyncpa [#allocation3], 1 }
 0x293   :  { %1006 = vsyncpa [#allocation6], 1 }
 0x294   :  { %1007 = vsyncpa [#allocation9], 1 }
 0x295   :  { %1008 = vsyncpa [#allocation4], 1 }

// kernel: transformer_block.7
= control target key start
LH: loop header
LB: loop body
LE: loop exit
PB: predicated region body
PF: predicated region fallthrough
CT: control target
= control target key end

     0   :  { %s2979_s0 = inlined_call_operand.hbm [shape: f32[32,256], index: 0, kind: input, shape index: {}]   ;;  %s2980_s1 = inlined_call_operand.hbm [shape: f32[32,1], index: 1, kind: input, shape index: {}]   ;;  %s2981_s2 = inlined_call_operand.hbm [shape: f32[1,256], index: 2, kind: input, shape index: {}]   ;;  %s2982_s3 = inlined_call_operand.hbm [shape: bf16[256,768], index: 3, kind: input, shape index: {}]   ;;  %s2983_s4 = inlined_call_operand.hbm [shape: bf16[256,768], index: 4, kind: input, shape index: {}]   ;;  %s2984_s5 = inlined_call_operand.hbm [shape: bf16[768,256], index: 5, kind: input, shape index: {}]   ;;  %s2985_s6 = inlined_call_operand.hbm [shape: f32[1,256], index: 6, kind: input, shape index: {}]   ;;  %s2986_s7 = inlined_call_operand.hbm [shape: f32[32,256], index: 7, kind: output, shape index: {}]  }
   0x1   :  { %3014 = sst [smem:[#allocation31_spill]] %s2980_s1 }
   0x2   :  { %3015 = sst [smem:[#allocation32_spill]] %s2982_s3 }
   0x3   :  { %3016 = sst [smem:[#allocation33_spill]] %s2985_s6 }
   0x4   :  { %3017 = sst [smem:[#allocation34_spill]] %s2986_s7 }
   0x5   :  { %12 = vsyncpa [#allocation5], 0 }
   0x6   :  { %13 = vsyncpa [#allocation8], 0 }
   0x7   :  { %14 = vsyncpa [#allocation11], 0 }
   0x8   :  { %16 = vsyncpa [#allocation11 + $0x1], 0 }
   0x9   :  { %17 = vsyncpa [#allocation14], 0 }
   0xa   :  { %19 = vsyncpa [#allocation14 + $0x1], 0 }
   0xb   :  { %20 = vsyncpa [#allocation6], 0  ;;  %s2511_s24 = smov 0   ;;  %s2513_s25 = smov 0  }
   0xc   :  { %s2515_s26 = smov 0   ;;  %s2517_s27 = smov 0  }
   0xd   :  { %s2519_s28 = smov 0   ;;  %s2521_s29 = smov 0  }
   0xe LB: > { %3018 = sst [smem:[#allocation23_spill]] %s2436_s25  ;;  %s2540_s30 = sadd.s32 4294967295, %s2452_s29   ;;  %s2452_s29 = sphi %s2521_s29, %s26_s29   ;;  %s2448_s28 = sphi %s2519_s28, %s3064_s28   ;;  %s2444_s27 = sphi %s2517_s27, %s3063_s27   ;;  %s2440_s26 = sphi %s2515_s26, %s3061_s26   ;;  %s2436_s25 = sphi %s2513_s25, %s3060_s25   ;;  %s2432_s24 = sphi %s2511_s24, %s3059_s24  }
   0xf   : > { %3019 = sst [smem:[#allocation24_spill]] %s2440_s26  ;;  %p131_p0 = scmp.ne.s32.totalorder %s2436_s25, %s2432_s24 }
  0x10   : > { %3020 = sst [smem:[#allocation25_spill]] %s2444_s27  ;;  %p2987_p1 = scmp.eq.s32.totalorder %s2540_s30, 0 }
  0x11   : > { %3021 = sst [smem:[#allocation26_spill]] %s2540_s30  ;;  %p1668_p2 = scmp.ge.s32.totalorder %s2452_s29, 1 }
  0x12   : > { %p241_p3 = scmp.lt.s32.totalorder %s2452_s29, 4  ;;  %p2548_p4 = por %p2987_p1, %p131_p0 }
  0x13   : > { %s2454_s10 = smov [#allocation7]   ;;  %s2455_s13 = smov [#allocation15]  }
  0x14   : > { %s3022_s8 = scalar_select %p2548_p4, 1, 0 }
  0x15   : > { %p2552_p5 = pnand %p1668_p2, %p241_p3  ;;  %s273_s11 = sshll.u32 %s2454_s10, 4  ;;  %s274_s11 = int_to_ptr.vmem [resolvable:$true] %s273_s11 }
  0x16   : > { %3023 = sst [smem:[#allocation27_spill]] %s3022_s8  ;;  %s298_s14 = sshll.u32 %s2455_s13, 4  ;;  %s2564_s14 = int_to_ptr.vmem [resolvable:$true] %s298_s14 }
  0x17   : > { %s3024_s9 = scalar_select %p2552_p5, 1, 0 }
  0x18   : > { %p1864_p6 = pneg %p2552_p5  ;;  %s3027_s1 = sld [smem:[#allocation31_spill]] }
  0x19   : > { %3025 = sst [smem:[#allocation28_spill]] %s3024_s9 }
  0x1a   : > { %p2560_p7 = pnand %p1864_p6, %p2987_p1 }
  0x1c   : > { %s3026_s12 = scalar_select %p2560_p7, 1, 0 }
  0x1d   : > { %p2574_p9 = pneg %p2560_p7 }
  0x1e   : > { %s2154_s17 = scalar_lea.hbm %s3027_s1, 512 }
  0x1f   : > { %p2155_p8 = scmp.ne.s32.totalorder %s3027_s1, %s2154_s17  ;;  %p2161_p12 = scmp.lt.u32.totalorder %s2154_s17, %s3027_s1 }
  0x20   : > { %s3028_s20 = scalar_select %p2574_p9, 1, 0 }
  0x21   : > { %p2157_p10 = pnand %p2574_p9, %p2155_p8 }
  0x23   : > { %p2158_p11 = pneg %p2157_p10 }
  0x25   : > { %p2163_p13 = pnand %p2161_p12, %p2158_p11 }
  0x27   : > { %2166 = shalt.err (!%p2163_p13)
}
  0x28   : > { %s2167_s23 = scalar_lea.vmem %s274_s11, 512  ;;  %p2175_p6 = scmp.lt.s32.totalorder %s274_s11, %s274_s11 }
  0x29   : > { %p2168_p0 = scmp.ne.s32.totalorder %s274_s11, %s2167_s23  ;;  %p2176_p1 = scmp.lt.s32.totalorder %s2167_s23, %s2167_s23 }
  0x2b   : > { %p2170_p2 = pnand %p2168_p0, %p2574_p9  ;;  %p2177_p4 = por %p2176_p1, %p2175_p6 }
  0x2d   : > { %p2171_p3 = pneg %p2170_p2 }
  0x2f   : > { %p2178_p5 = pnand %p2177_p4, %p2171_p3 }
  0x31   : > { %2181 = shalt.err (!%p2178_p5)
}
  0x32   : > { %s2990_s24 = smov 128   ;;  %s2992_s10 = smov 8  }
  0x33   : > { %1870 = dma.hbm_to_vmem [thread:$0]  (!%p2560_p7), %s3027_s1, 512, %s274_s11, [#allocation8], %s2990_s24, %s2990_s24, %s2992_s10  }
  0x34   : > { %s3029_s6 = sld [smem:[#allocation33_spill]] }
  0x3a   : > { %s2182_s18 = scalar_lea.hbm %s3029_s6, 32 }
  0x3b   : > { %p2183_p1 = scmp.ne.s32.totalorder %s3029_s6, %s2182_s18  ;;  %p2189_p8 = scmp.lt.u32.totalorder %s2182_s18, %s3029_s6 }
  0x3d   : > { %p2185_p4 = pnand %p2183_p1, %p2574_p9 }
  0x3f   : > { %p2186_p5 = pneg %p2185_p4 }
  0x41   : > { %p2191_p10 = pnand %p2189_p8, %p2186_p5 }
  0x43   : > { %2194 = shalt.err (!%p2191_p10)
}
  0x44   : > { %s2195_s11 = scalar_lea.vmem %s2564_s14, 32  ;;  %p2203_p0 = scmp.lt.s32.totalorder %s2564_s14, %s2564_s14 }
  0x45   : > { %p2196_p11 = scmp.ne.s32.totalorder %s2564_s14, %s2195_s11  ;;  %p2204_p2 = scmp.lt.s32.totalorder %s2195_s11, %s2195_s11 }
  0x47   : > { %p2198_p12 = pnand %p2196_p11, %p2574_p9  ;;  %p2205_p3 = por %p2204_p2, %p2203_p0 }
  0x49   : > { %p2199_p13 = pneg %p2198_p12 }
  0x4b   : > { %p2206_p6 = pnand %p2205_p3, %p2199_p13 }
  0x4d   : > { %2209 = shalt.err (!%p2206_p6)
}
  0x4e   : > { %1876 = dma.hbm_to_vmem [thread:$0]  (!%p2560_p7), %s3029_s6, 32, %s2564_s14, [#allocation14]  }
  0x4f   : > { %s35_s16 = sadd.s32 1, %s2448_s28  ;;  %s118_s17 = sadd.s32 1, %s2440_s26 }
  0x50   : > { %p36_p1 = scmp.ge.s32.totalorder %s35_s16, 3  ;;  %p125_p4 = scmp.ne.s32.totalorder %s2440_s26, %s2436_s25 }
  0x51   : > { %p126_p5 = scmp.eq.s32.totalorder %s2452_s29, 0  ;;  %p1891_p8 = scmp.lt.s32.totalorder %s2452_s29, 3 }
  0x52   : > { %s3066_s16 = smov (%p36_p1, %s35_s16), 0  ;;  %s2995_s18 = sand.u32 1, %s2452_s29  }
  0x53   : > { %3030 = sst [smem:[#allocation29_spill]] %s3066_s16  ;;  %p127_p10 = por %p126_p5, %p125_p4 }
  0x54   : > { %s115_s19 = ssub.s32 %s2448_s28, %s3066_s16  ;;  %s311_s21 = sand.u32 1, %s2440_s26  }
  0x55   : > { %p116_p11 = scmp.eq.s32.totalorder %s115_s19, 0  ;;  %s2628_s22 = sshll.u32 %s311_s21, 8 }
  0x56   : > { %s1802_s14 = sshll.u32 %s2448_s28, 7  ;;  %s3032_s3 = sld [smem:[#allocation32_spill]] }
  0x57   : > { %s2632_s23 = scalar_select %p116_p11, %s2440_s26, %s118_s17  }
  0x58   : > { %s313_s24 = scalar_lea.vmem [#allocation10], %s2628_s22  ;;  %p2642_p12 = pnand %p1891_p8, %p127_p10 }
  0x59   : > { %3031 = sst [smem:[#allocation30_spill]] %s2632_s23  ;;  %s320_s10 = sshll.u32 %s313_s24, 4  ;;  %s2646_s10 = int_to_ptr.vmem [resolvable:$true] %s320_s10 }
  0x5a   : > { %s3033_s19 = scalar_select %p2642_p12, 1, 0 }
  0x5b   : > { %s2651_s11 = scalar_lea.hbm %s2983_s4, %s1802_s14  ;;  %s2655_s13 = scalar_lea.sflag [#allocation11], %s2995_s18 }
  0x5c   : > { %s2637_s15 = scalar_lea.hbm %s3032_s3, %s1802_s14  ;;  %p2661_p0 = pneg %p2642_p12 }
  0x5d   : > { %s2210_s1 = scalar_lea.hbm %s2637_s15, 4096  ;;  %s2215_s17 = scalar_lea.hbm %s3032_s3, 12288 }
  0x5e   : > { %p2211_p13 = scmp.ne.s32.totalorder %s2637_s15, %s2210_s1  ;;  %p2216_p6 = scmp.lt.u32.totalorder %s2637_s15, %s3032_s3 }
  0x5f   : > { %s3034_s24 = scalar_select %p2661_p0, 1, 0 }
  0x60   : > { %p2213_p2 = pnand %p2661_p0, %p2211_p13  ;;  %p2217_p1 = scmp.lt.u32.totalorder %s2215_s17, %s2210_s1 }
  0x61   : > { %p2219_p5 = scmp.lt.u32.totalorder %s2210_s1, %s2637_s15 }
  0x62   : > { %p2214_p3 = pneg %p2213_p2  ;;  %p2218_p4 = por %p2217_p1, %p2216_p6 }
  0x64   : > { %p2220_p8 = por %p2219_p5, %p2218_p4 }
  0x66   : > { %p2221_p10 = pnand %p2220_p8, %p2214_p3 }
  0x68   : > { %2224 = shalt.err (!%p2221_p10)
}
  0x69   : > { %s2225_s18 = scalar_lea.vmem %s2646_s10, 4096  ;;  %s2458_s6 = smov [#allocation10]  }
  0x6a   : > { %p2226_p11 = scmp.ne.s32.totalorder %s2646_s10, %s2225_s18  ;;  %s2230_s16 = sshll.u32 %s2458_s6, 4  ;;  %s2231_s16 = int_to_ptr.vmem [resolvable:$false] %s2230_s16 }
  0x6b   : > { %s2232_s14 = scalar_lea.vmem %s2231_s16, 8192  ;;  %p2233_p7 = scmp.lt.s32.totalorder %s2646_s10, %s2231_s16 }
  0x6c   : > { %p2228_p13 = pnand %p2226_p11, %p2661_p0  ;;  %p2234_p9 = scmp.lt.s32.totalorder %s2232_s14, %s2225_s18 }
  0x6e   : > { %p2229_p2 = pneg %p2228_p13  ;;  %p2235_p6 = por %p2234_p9, %p2233_p7 }
  0x70   : > { %p2236_p1 = pnand %p2235_p6, %p2229_p2 }
  0x72   : > { %2239 = shalt.err (!%p2236_p1)
}
  0x73   : > { %s3004_s1 = smov 384   ;;  %s3035_s17 = smov 8  }
  0x74   : > { %s3036_s21 = smov 128   ;;  %s2460_s3 = smov [#allocation4]  }
  0x75   : > { %1880 = dma.hbm_to_vmem [thread:$0]  (!%p2642_p12), %s2637_s15, 4096, %s2646_s10, %s2655_s13, %s3004_s1, %s3036_s21, %s3035_s17  }
  0x76   : > { %s257_s6 = sshll.u32 %s2460_s3, 4  ;;  %s2240_s18 = scalar_lea.hbm %s2979_s0, 1024  ;;  %s258_s6 = int_to_ptr.vmem [resolvable:$true] %s257_s6 }
  0x77   : > { %p2241_p7 = scmp.ne.s32.totalorder %s2979_s0, %s2240_s18  ;;  %p3037_p9 = scmp.ne.s32.totalorder %s3028_s20, 0 }
  0x78   : > { %p2247_p5 = scmp.lt.u32.totalorder %s2240_s18, %s2979_s0 }
  0x79   : > { %p2243_p3 = pnand %p2241_p7, %p3037_p9 }
  0x7b   : > { %p2244_p4 = pneg %p2243_p3 }
  0x7d   : > { %p2249_p8 = pnand %p2247_p5, %p2244_p4 }
  0x7f   : > { %2252 = shalt.err (!%p2249_p8)
}
  0x80   : > { %s2253_s10 = scalar_lea.vmem %s258_s6, 1024  ;;  %p2261_p2 = scmp.lt.s32.totalorder %s258_s6, %s258_s6 }
  0x81   : > { %p2254_p10 = scmp.ne.s32.totalorder %s258_s6, %s2253_s10  ;;  %p2262_p6 = scmp.lt.s32.totalorder %s2253_s10, %s2253_s10 }
  0x83   : > { %p2256_p11 = pnand %p2254_p10, %p3037_p9  ;;  %p2263_p1 = por %p2262_p6, %p2261_p2 }
  0x85   : > { %p2257_p13 = pneg %p2256_p11 }
  0x87   : > { %p2264_p12 = pnand %p2263_p1, %p2257_p13 }
  0x89   : > { %2267 = shalt.err (!%p2264_p12)
}
  0x8a   : > { %s2461_s3 = smov 256   ;;  %s2462_s26 = smov 16  }
  0x8b   : > { %p3038_p7 = scmp.ne.s32.totalorder %s3026_s12, 0  ;;  %s2463_s23 = smov [#allocation9]  }
  0x8c   : > { %s287_s15 = sshll.u32 %s2463_s23, 4  ;;  %s334_s16 = scalar_lea.vmem [#allocation12], %s2628_s22  ;;  %s288_s15 = int_to_ptr.vmem [resolvable:$true] %s287_s15 }
  0x8d   : > { %1867 = dma.hbm_to_vmem [thread:$0]  (!%p3038_p7), %s2979_s0, 1024, %s258_s6, [#allocation5], %s2461_s3, %s2461_s3, %s2462_s26  }
  0x8e   : > { %s341_s18 = sshll.u32 %s334_s16, 4  ;;  %s2268_s1 = scalar_lea.hbm %s2981_s2, 32  ;;  %s2725_s18 = int_to_ptr.vmem [resolvable:$true] %s341_s18 }
  0x8f   : > { %p2269_p12 = scmp.ne.s32.totalorder %s2981_s2, %s2268_s1  ;;  %p2275_p5 = scmp.lt.u32.totalorder %s2268_s1, %s2981_s2 }
  0x91   : > { %p2271_p3 = pnand %p2269_p12, %p3037_p9 }
  0x93   : > { %p2272_p4 = pneg %p2271_p3 }
  0x95   : > { %p2277_p8 = pnand %p2275_p5, %p2272_p4 }
  0x97   : > { %2280 = shalt.err (!%p2277_p8)
}
  0x98   : > { %s2281_s6 = scalar_lea.vmem %s288_s15, 32  ;;  %p2289_p2 = scmp.lt.s32.totalorder %s288_s15, %s288_s15 }
  0x99   : > { %p2282_p10 = scmp.ne.s32.totalorder %s288_s15, %s2281_s6  ;;  %p2290_p6 = scmp.lt.s32.totalorder %s2281_s6, %s2281_s6 }
  0x9b   : > { %p2284_p11 = pnand %p2282_p10, %p3037_p9  ;;  %p2291_p1 = por %p2290_p6, %p2289_p2 }
  0x9d   : > { %p2285_p13 = pneg %p2284_p11 }
  0x9f   : > { %p2292_p0 = pnand %p2291_p1, %p2285_p13 }
  0xa1   : > { %2295 = shalt.err (!%p2292_p0)
}
  0xa2   : > { %1873 = dma.hbm_to_vmem [thread:$0]  (!%p3038_p7), %s2981_s2, 32, %s288_s15, [#allocation8]  }
  0xa3   : > { %s2296_s30 = scalar_lea.hbm %s2651_s11, 4096  ;;  %p3039_p12 = scmp.ne.s32.totalorder %s3034_s24, 0 }
  0xa4   : > { %p2297_p9 = scmp.ne.s32.totalorder %s2651_s11, %s2296_s30  ;;  %s2301_s12 = scalar_lea.hbm %s2983_s4, 12288 }
  0xa5   : > { %p2302_p0 = scmp.lt.u32.totalorder %s2651_s11, %s2983_s4  ;;  %p2303_p5 = scmp.lt.u32.totalorder %s2301_s12, %s2296_s30 }
  0xa6   : > { %p2299_p3 = pnand %p2297_p9, %p3039_p12  ;;  %p2305_p10 = scmp.lt.u32.totalorder %s2296_s30, %s2651_s11 }
  0xa7   : > { %p2304_p8 = por %p2303_p5, %p2302_p0 }
  0xa8   : > { %p2300_p4 = pneg %p2299_p3 }
  0xa9   : > { %p2306_p11 = por %p2305_p10, %p2304_p8 }
  0xab   : > { %p2307_p7 = pnand %p2306_p11, %p2300_p4 }
  0xad   : > { %2310 = shalt.err (!%p2307_p7)
}
  0xae   : > { %s2311_s26 = scalar_lea.vmem %s2725_s18, 4096  ;;  %s2464_s7 = smov [#allocation12]  }
  0xaf   : > { %p2312_p13 = scmp.ne.s32.totalorder %s2725_s18, %s2311_s26  ;;  %s2316_s27 = sshll.u32 %s2464_s7, 4  ;;  %s2317_s27 = int_to_ptr.vmem [resolvable:$false] %s2316_s27 }
  0xb0   : > { %s2318_s23 = scalar_lea.vmem %s2317_s27, 8192  ;;  %p2319_p1 = scmp.lt.s32.totalorder %s2725_s18, %s2317_s27 }
  0xb1   : > { %p2314_p2 = pnand %p2312_p13, %p3039_p12  ;;  %p2320_p9 = scmp.lt.s32.totalorder %s2318_s23, %s2311_s26 }
  0xb3   : > { %p2315_p6 = pneg %p2314_p2  ;;  %p2321_p3 = por %p2320_p9, %p2319_p1 }
  0xb5   : > { %p2322_p0 = pnand %p2321_p3, %p2315_p6 }
  0xb7   : > { %2325 = shalt.err (!%p2322_p0)
}
  0xb8   : > { %p3040_p4 = scmp.ne.s32.totalorder %s3033_s19, 0  ;;  %s3041_s15 = smov 384  }
  0xb9   : > { %s1805_s16 = sshll.u32 %s2448_s28, 12  ;;  %s355_s25 = scalar_lea.vmem [#allocation13], %s2628_s22 }
  0xba   : > { %1883 = dma.hbm_to_vmem [thread:$0]  (!%p3040_p4), %s2651_s11, 4096, %s2725_s18, %s2655_s13, %s3041_s15, %s3036_s21, %s3035_s17  }
  0xbb   : > { %s2756_s6 = scalar_lea.hbm %s2984_s5, %s1805_s16  ;;  %s363_s8 = sshll.u32 %s355_s25, 4  ;;  %s2759_s8 = int_to_ptr.vmem [resolvable:$true] %s363_s8 }
  0xbc   : > { %s3042_s30 = sand.u32 1, %s2452_s29   ;;  %s2326_s20 = scalar_lea.hbm %s2756_s6, 4096 }
  0xbd   : > { %s2763_s9 = scalar_lea.sflag [#allocation14], %s3042_s30  ;;  %p2327_p5 = scmp.ne.s32.totalorder %s2756_s6, %s2326_s20 }
  0xbe   : > { %s2331_s18 = scalar_lea.hbm %s2984_s5, 12288  ;;  %p2332_p11 = scmp.lt.u32.totalorder %s2756_s6, %s2984_s5 }
  0xbf   : > { %p2329_p8 = pnand %p2327_p5, %p3039_p12  ;;  %p2333_p7 = scmp.lt.u32.totalorder %s2331_s18, %s2326_s20 }
  0xc0   : > { %p2335_p2 = scmp.lt.u32.totalorder %s2326_s20, %s2756_s6 }
  0xc1   : > { %p2330_p10 = pneg %p2329_p8  ;;  %p2334_p13 = por %p2333_p7, %p2332_p11 }
  0xc3   : > { %p2336_p6 = por %p2335_p2, %p2334_p13 }
  0xc5   : > { %p2337_p1 = pnand %p2336_p6, %p2330_p10 }
  0xc7   : > { %2340 = shalt.err (!%p2337_p1)
}
  0xc8   : > { %s2341_s22 = scalar_lea.vmem %s2759_s8, 4096  ;;  %s2465_s3 = smov [#allocation13]  }
  0xc9   : > { %p2342_p9 = scmp.ne.s32.totalorder %s2759_s8, %s2341_s22  ;;  %s2346_s26 = sshll.u32 %s2465_s3, 4  ;;  %s2347_s26 = int_to_ptr.vmem [resolvable:$false] %s2346_s26 }
  0xca   : > { %s2348_s7 = scalar_lea.vmem %s2347_s26, 8192  ;;  %p2349_p5 = scmp.lt.s32.totalorder %s2759_s8, %s2347_s26 }
  0xcb   : > { %p2344_p3 = pnand %p2342_p9, %p3039_p12  ;;  %p2350_p8 = scmp.lt.s32.totalorder %s2348_s7, %s2341_s22 }
  0xcd   : > { %p2345_p0 = pneg %p2344_p3  ;;  %p2351_p11 = por %p2350_p8, %p2349_p5 }
  0xcf   : > { %p2352_p7 = pnand %p2351_p11, %p2345_p0 }
  0xd1   : > { %2355 = shalt.err (!%p2352_p7)
}
  0xd2   : > { %1886 = dma.hbm_to_vmem [thread:$0]  (!%p3040_p4), %s2756_s6, 4096, %s2759_s8, %s2763_s9, %s3036_s21, %s3036_s21, %s3035_s17  }
  0xd3   : > { %s3043_s24 = sld [smem:[#allocation28_spill]] }
  0xd9   : > { %p3044_p12 = scmp.ne.s32.totalorder %s3043_s24, 0 }
  0xda   : > { %s3045_s27 = sld [smem:[#allocation26_spill]] (!%p3044_p12) }
  0xdb   : > { %375 = sbr.rel (%p3044_p12) target bundleno = 1181 (0x49d), region = 48 }
  0xe0   : > { %p3046_p10 = scmp.eq.s32.totalorder (!%p3044_p12), %s3045_s27, 0 }
  0xe2   : > { %2407 = dma.done.wait (%p3046_p10), [#allocation5], 1024   ;;  %p3047_p13 = pmov %p3046_p10 }
  0xe3   : > { %p3048_p2 = pmov %p3046_p10 }
  0xe4   : > { %2409 = vsyncadd (%p3047_p13), [#allocation5], 4294966272 }
  0xe5   : > { %2411 = dma.done.wait (%p3048_p2), [#allocation8], 544   ;;  %p3049_p6 = pmov %p3048_p2 }
  0xe6   : > { %s3050_s19 = sld [smem:[#allocation23_spill]]  ;;  %s3051_s23 = sld [smem:[#allocation27_spill]] }
  0xe7   : > { %2413 = vsyncadd (%p3049_p6), [#allocation8], 4294966752  ;;  %s389_s15 = sand.u32 1, %s3045_s27  }
  0xe8   : > { %s390_s16 = scalar_lea.sflag [#allocation11], %s389_s15 }
  0xec   : > { %s391_s17 = sand.u32 1, %s3050_s19   ;;  %p3052_p4 = scmp.ne.s32.totalorder %s3051_s23, 0 }
  0xed   : > { %s1688_s21 = sshll.u32 %s391_s17, 8 }
  0xee   : > { %s2802_s14 = scalar_lea.vmem [#allocation10], %s1688_s21 }
  0xef   : > { %2415 = dma.done.wait (%p3052_p4), %s390_s16, 8192  }
  0xf0   : > { %2417 = vsyncadd (%p3052_p4), %s390_s16, 4294959104  ;;  %s2808_s10 = scalar_lea.vmem [#allocation12], %s1688_s21  ;;  %s408_s6 = scalar_lea.sflag [#allocation14], %s389_s15 }
  0xf1   : > { %s2810_s25 = scalar_lea.vmem [#allocation13], %s1688_s21 }
  0xf2   : > { %2419 = dma.done.wait (%p3052_p4), %s408_s6, 4096  }
  0xf3   : > { %2421 = vsyncadd (%p3052_p4), %s408_s6, 4294963200  ;;  %p3053_p1 = pmov %p3048_p2 }
  0xf5   : > { %2423 = dma.done.wait (%p3053_p1), [#allocation14], 32   ;;  %p3054_p9 = pmov %p3053_p1 }
  0xf6   : > { %s3055_s8 = sld [smem:[#allocation25_spill]] }
  0xf7   : > { %2425 = vsyncadd (%p3054_p9), [#allocation14], 4294967264 }
  0xfc   : > { %p1692_p3 = scmp.ne.s32.totalorder %s3055_s8, 0 }
  0xfd   : > { %v465_v0 = vld [vmem:[#allocation4 + $0x20] sm:$0xff] (!%p1692_p3)  ;;  %v466_v1 = vld [vmem:[#allocation4 + $0x28] sm:$0xff] (!%p1692_p3)  ;;  %v467_v7 = vld [vmem:[#allocation4 + $0x30] sm:$0xff] (!%p1692_p3)  ;;  %v2466_v20 = vmov (!%p1692_p3), 0.0   ;;  %v512_v30 = vlaneseq (!%p1692_p3) }
  0xfe   : > { %460 = sbr.rel (%p1692_p3) target bundleno = 427 (0x1ab), region = 80  ;;  %v461_v2 = vld [vmem:[#allocation4] sm:$0xff] (!%p1692_p3)  ;;  %v473_v3 = vmul.f32 (!%p1692_p3), %v465_v0, %v465_v0  ;;  %v474_v4 = vmul.f32 (!%p1692_p3), %v466_v1, %v466_v1  ;;  %v462_v5 = vld [vmem:[#allocation4 + $0x8] sm:$0xff] (!%p1692_p3)  ;;  %v468_v8 = vld [vmem:[#allocation4 + $0x38] sm:$0xff] (!%p1692_p3)  ;;  %v475_v10 = vmul.f32 (!%p1692_p3), %v467_v7, %v467_v7  ;;  %538 = vst [vmem:[#allocation2] sm:$0xff] (!%p1692_p3), %v2466_v20 }
  0xff   : > { %v469_v6 = vmul.f32 (!%p1692_p3), %v461_v2, %v461_v2  ;;  %v470_v9 = vmul.f32 (!%p1692_p3), %v462_v5, %v462_v5  ;;  %v476_v11 = vmul.f32 (!%p1692_p3), %v468_v8, %v468_v8  ;;  %v463_v12 = vld [vmem:[#allocation4 + $0x10] sm:$0xff] (!%p1692_p3)  ;;  %v464_v13 = vld [vmem:[#allocation4 + $0x18] sm:$0xff] (!%p1692_p3)  ;;  %539 = vst [vmem:[#allocation2 + $0x8] sm:$0xff] (!%p1692_p3), %v2466_v20  ;;  %540 = vst [vmem:[#allocation2 + $0x10] sm:$0xff] (!%p1692_p3), %v2466_v20  ;;  %v513_v34 = vshrl.u32 (!%p1692_p3), %v512_v30, 7 }
 0x100   : > { %v483_v14 = vadd.f32 (!%p1692_p3), %v474_v4, %v473_v3  ;;  %v471_v15 = vmul.f32 (!%p1692_p3), %v463_v12, %v463_v12  ;;  %v472_v16 = vmul.f32 (!%p1692_p3), %v464_v13, %v464_v13  ;;  %541 = vst [vmem:[#allocation2 + $0x18] sm:$0xff] (!%p1692_p3), %v2466_v20  ;;  %542 = vst [vmem:[#allocation2 + $0x20] sm:$0xff] (!%p1692_p3), %v2466_v20  ;;  %v510_v38 = vld [vmem:[#allocation9] sm:$0x3] (!%p1692_p3) }
 0x101   : > { %v477_v17 = vadd.f32 (!%p1692_p3), %v470_v9, %v469_v6  ;;  %v486_v18 = vadd.f32 (!%p1692_p3), %v476_v11, %v475_v10  ;;  %543 = vst [vmem:[#allocation2 + $0x28] sm:$0xff] (!%p1692_p3), %v2466_v20  ;;  %544 = vst [vmem:[#allocation2 + $0x30] sm:$0xff] (!%p1692_p3), %v2466_v20  ;;  %v514_v35 = vsub.s32 (!%p1692_p3), 0, %v513_v34  ;;  %v518_v36 = vsub.s32 (!%p1692_p3), 1, %v513_v34 }
 0x102   : > { %484 = vadd.xlane.f32.xlu1 (!%p1692_p3), %v483_v14  ;;  %v480_v19 = vadd.f32 (!%p1692_p3), %v472_v16, %v471_v15  ;;  %545 = vst [vmem:[#allocation2 + $0x38] sm:$0xff] (!%p1692_p3), %v2466_v20 }
 0x103   : > { %478 = vadd.xlane.f32.xlu0 (!%p1692_p3), %v477_v17  ;;  %v515_v40 = vrot.slane (!%p1692_p3), %v510_v38, %v514_v35  ;;  %v519_v41 = vrot.slane (!%p1692_p3), %v510_v38, %v518_v36 }
 0x106   : > { %487 = vadd.xlane.f32.xlu1 %v486_v18 }
 0x107   : > { %481 = vadd.xlane.f32.xlu0 %v480_v19 }
 0x18f   : > { %v485_v21 = vpop.xlane.xlu1 %484 }
 0x190   : > { %v492_v22 = vmul.f32 0.00390625, %v485_v21  ;;  %v479_v23 = vpop.xlane.xlu0 %478 }
 0x191   : > { %v490_v24 = vmul.f32 0.00390625, %v479_v23 }
 0x192   : > { %v496_v25 = vadd.f32 1e-05, %v492_v22 }
 0x193   : > { %v494_v26 = vadd.f32 1e-05, %v490_v24  ;;  %v488_v27 = vpop.xlane.xlu1 %487 }
 0x194   : > { %1960 = vrsqrt.f32 %v496_v25  ;;  %v493_v28 = vmul.f32 0.00390625, %v488_v27  ;;  %v482_v29 = vpop.xlane.xlu0 %481 }
 0x195   : > { %1962 = vrsqrt.f32 %v494_v26  ;;  %v491_v31 = vmul.f32 0.00390625, %v482_v29 }
 0x196   : > { %v497_v32 = vadd.f32 1e-05, %v493_v28 }
 0x197   : > { %v495_v33 = vadd.f32 1e-05, %v491_v31 }
 0x198   : > { %1964 = vrsqrt.f32 %v497_v32 }
 0x199   : > { %1966 = vrsqrt.f32 %v495_v33 }
 0x19e   : > { %v1961_v37 = vpop.eup %1960 }
 0x19f   : > { %v1963_v39 = vpop.eup %1962  ;;  %v506_v42 = vmul.f32 %v1961_v37, %v465_v0  ;;  %v507_v43 = vmul.f32 %v1961_v37, %v466_v1 }
 0x1a0   : > { %v502_v45 = vmul.f32 %v1963_v39, %v461_v2  ;;  %v503_v46 = vmul.f32 %v1963_v39, %v462_v5 }
 0x1a1   : > { %v526_v52 = vmul.f32 %v515_v40, %v506_v42  ;;  %v527_v53 = vmul.f32 %v519_v41, %v507_v43 }
 0x1a2   : > { %v1965_v44 = vpop.eup %1964  ;;  %v522_v56 = vmul.f32 %v515_v40, %v502_v45  ;;  %v523_v57 = vmul.f32 %v519_v41, %v503_v46 }
 0x1a3   : > { %v1967_v47 = vpop.eup %1966  ;;  %v508_v48 = vmul.f32 %v1965_v44, %v467_v7  ;;  %v509_v49 = vmul.f32 %v1965_v44, %v468_v8 }
 0x1a4   : > { %v504_v50 = vmul.f32 %v1967_v47, %v463_v12  ;;  %v505_v51 = vmul.f32 %v1967_v47, %v464_v13 }
 0x1a5   : > { %v528_v54 = vmul.f32 %v515_v40, %v508_v48  ;;  %v529_v55 = vmul.f32 %v519_v41, %v509_v49 }
 0x1a6   : > { %v524_v58 = vmul.f32 %v515_v40, %v504_v50  ;;  %v525_v59 = vmul.f32 %v519_v41, %v505_v51 }
 0x1a7   : > { %v532_v60 = vpack.c.bf16 %v528_v54, %v526_v52  ;;  %v533_v61 = vpack.c.bf16 %v529_v55, %v527_v53 }
 0x1a8   : > { %v530_v62 = vpack.c.bf16 %v524_v58, %v522_v56  ;;  %v531_v63 = vpack.c.bf16 %v525_v59, %v523_v57 }
 0x1a9   : > { %536 = vst [vmem:[#allocation3 + $0x10] sm:$0xff] %v532_v60  ;;  %537 = vst [vmem:[#allocation3 + $0x18] sm:$0xff] %v533_v61 }
 0x1aa   : > { %534 = vst [vmem:[#allocation3] sm:$0xff] %v530_v62  ;;  %535 = vst [vmem:[#allocation3 + $0x8] sm:$0xff] %v531_v63 }
 0x1ab PF: > { %v1968_v0 = vld [vmem:[%s2802_s14 + $0x4] ss:$8 sps:$4 sm:$0xff]   ;;  %v1970_v1 = vld [vmem:[%s2802_s14] ss:$8 sps:$4 sm:$0xff]   ;;  %v1971_v2 = vld [vmem:[%s2802_s14 + $0x14] ss:$8 sps:$4 sm:$0xff]  }
 0x1ac   : > { %742 = vmatprep.subr.bf16.mxu0 %v1968_v0  ;;  %v1973_v3 = vld [vmem:[%s2802_s14 + $0x10] ss:$8 sps:$4 sm:$0xff]   ;;  %v1974_v4 = vld [vmem:[%s2802_s14 + $0x24] ss:$8 sps:$4 sm:$0xff]   ;;  %v1976_v5 = vld [vmem:[%s2802_s14 + $0x20] ss:$8 sps:$4 sm:$0xff]  }
 0x1ad   : > { %743 = vmatpush1.bf16.msra.mxu0 %v1970_v1  ;;  %v1977_v6 = vld [vmem:[%s2802_s14 + $0x34] ss:$8 sps:$4 sm:$0xff]   ;;  %v1989_v7 = vld [vmem:[%s2808_s10 + $0x4] ss:$8 sps:$4 sm:$0xff]   ;;  %v1991_v8 = vld [vmem:[%s2808_s10] ss:$8 sps:$4 sm:$0xff]  }
 0x1ae   : > { %744 = vmatprep.subr.bf16.mxu0 %v1971_v2  ;;  %v1979_v9 = vld [vmem:[%s2802_s14 + $0x30] ss:$8 sps:$4 sm:$0xff]   ;;  %v1980_v10 = vld [vmem:[%s2802_s14 + $0x44] ss:$8 sps:$4 sm:$0xff]   ;;  %987 = vmatprep.subr.bf16.mxu1 %v1989_v7  ;;  %v1995_v11 = vld [vmem:[%s2808_s10 + $0x14] ss:$8 sps:$4 sm:$0xff]  }
 0x1af   : > { %988 = vmatpush1.bf16.msra.mxu1 %v1991_v8  ;;  %v1997_v12 = vld [vmem:[%s2808_s10 + $0x10] ss:$8 sps:$4 sm:$0xff]   ;;  %v1982_v13 = vld [vmem:[%s2802_s14 + $0x40] ss:$8 sps:$4 sm:$0xff]   ;;  %v2001_v14 = vld [vmem:[%s2808_s10 + $0x24] ss:$8 sps:$4 sm:$0xff]  }
 0x1b0   : > { %989 = vmatprep.subr.bf16.mxu1 %v1995_v11  ;;  %v1983_v15 = vld [vmem:[%s2802_s14 + $0x54] ss:$8 sps:$4 sm:$0xff]   ;;  %v2003_v16 = vld [vmem:[%s2808_s10 + $0x20] ss:$8 sps:$4 sm:$0xff]   ;;  %v1985_v18 = vld [vmem:[%s2802_s14 + $0x50] ss:$8 sps:$4 sm:$0xff]  }
 0x1b1   : > { %745 = vmatpush1.bf16.msra.mxu0 %v1973_v3  ;;  %v2007_v17 = vld [vmem:[%s2808_s10 + $0x34] ss:$8 sps:$4 sm:$0xff]   ;;  %v1986_v19 = vld [vmem:[%s2802_s14 + $0x64] ss:$8 sps:$4 sm:$0xff]   ;;  %v2009_v20 = vld [vmem:[%s2808_s10 + $0x30] ss:$8 sps:$4 sm:$0xff]  }
 0x1b2   : > { %746 = vmatprep.subr.bf16.mxu0 %v1974_v4  ;;  %v2013_v21 = vld [vmem:[%s2808_s10 + $0x44] ss:$8 sps:$4 sm:$0xff]   ;;  %v1988_v22 = vld [vmem:[%s2802_s14 + $0x60] ss:$8 sps:$4 sm:$0xff]   ;;  %v1992_v23 = vld [vmem:[%s2802_s14 + $0x74] ss:$8 sps:$4 sm:$0xff]  }
 0x1b3   : > { %990 = vmatpush1.bf16.msra.mxu1 %v1997_v12  ;;  %v2015_v24 = vld [vmem:[%s2808_s10 + $0x40] ss:$8 sps:$4 sm:$0xff]   ;;  %v2019_v25 = vld [vmem:[%s2808_s10 + $0x54] ss:$8 sps:$4 sm:$0xff]   ;;  %v1994_v26 = vld [vmem:[%s2802_s14 + $0x70] ss:$8 sps:$4 sm:$0xff]  }
 0x1b4   : > { %991 = vmatprep.subr.bf16.mxu1 %v2001_v14  ;;  %v1998_v27 = vld [vmem:[%s2802_s14 + $0x84] ss:$8 sps:$4 sm:$0xff]   ;;  %v2021_v28 = vld [vmem:[%s2808_s10 + $0x50] ss:$8 sps:$4 sm:$0xff]   ;;  %v2000_v30 = vld [vmem:[%s2802_s14 + $0x80] ss:$8 sps:$4 sm:$0xff]  }
 0x1b5   : > { %747 = vmatpush1.bf16.msra.mxu0 %v1976_v5  ;;  %v2025_v29 = vld [vmem:[%s2808_s10 + $0x64] ss:$8 sps:$4 sm:$0xff]   ;;  %v2004_v31 = vld [vmem:[%s2802_s14 + $0x94] ss:$8 sps:$4 sm:$0xff]   ;;  %v2027_v32 = vld [vmem:[%s2808_s10 + $0x60] ss:$8 sps:$4 sm:$0xff]  }
 0x1b6   : > { %748 = vmatprep.subr.bf16.mxu0 %v1977_v6  ;;  %v2031_v33 = vld [vmem:[%s2808_s10 + $0x74] ss:$8 sps:$4 sm:$0xff]   ;;  %v547_v34 = vld [vmem:[#allocation3 + $0x8] sm:$0xff]  ;;  %v2006_v35 = vld [vmem:[%s2802_s14 + $0x90] ss:$8 sps:$4 sm:$0xff]   ;;  %s3056_s30 = sld [smem:[#allocation25_spill]] }
 0x1b7   : > { %992 = vmatpush1.bf16.msra.mxu1 %v2003_v16  ;;  %774 = vmatprep.mubr.bf16.mxu0 %v547_v34  ;;  %v2010_v36 = vld [vmem:[%s2802_s14 + $0xa4] ss:$8 sps:$4 sm:$0xff]   ;;  %v2033_v37 = vld [vmem:[%s2808_s10 + $0x70] ss:$8 sps:$4 sm:$0xff]   ;;  %v2012_v39 = vld [vmem:[%s2802_s14 + $0xa0] ss:$8 sps:$4 sm:$0xff]  }
 0x1b8   : > { %993 = vmatprep.subr.bf16.mxu1 %v2007_v17  ;;  %1019 = vmatprep.mubr.bf16.mxu1 %v547_v34  ;;  %v2037_v38 = vld [vmem:[%s2808_s10 + $0x84] ss:$8 sps:$4 sm:$0xff]   ;;  %v2016_v40 = vld [vmem:[%s2802_s14 + $0xb4] ss:$8 sps:$4 sm:$0xff]   ;;  %v2039_v41 = vld [vmem:[%s2808_s10 + $0x80] ss:$8 sps:$4 sm:$0xff]  }
 0x1b9   : > { %749 = vmatpush1.bf16.msra.mxu0 %v1979_v9  ;;  %v2043_v42 = vld [vmem:[%s2808_s10 + $0x94] ss:$8 sps:$4 sm:$0xff]   ;;  %v2018_v43 = vld [vmem:[%s2802_s14 + $0xb0] ss:$8 sps:$4 sm:$0xff]   ;;  %v2022_v44 = vld [vmem:[%s2802_s14 + $0xc4] ss:$8 sps:$4 sm:$0xff]  }
 0x1ba   : > { %750 = vmatprep.subr.bf16.mxu0 %v1980_v10  ;;  %v2045_v45 = vld [vmem:[%s2808_s10 + $0x90] ss:$8 sps:$4 sm:$0xff]   ;;  %v2046_v46 = vld [vmem:[%s2808_s10 + $0xa4] ss:$8 sps:$4 sm:$0xff]   ;;  %v2024_v47 = vld [vmem:[%s2802_s14 + $0xc0] ss:$8 sps:$4 sm:$0xff]  }
 0x1bb   : > { %994 = vmatpush1.bf16.msra.mxu1 %v2009_v20  ;;  %v2028_v48 = vld [vmem:[%s2802_s14 + $0xd4] ss:$8 sps:$4 sm:$0xff]   ;;  %v2048_v49 = vld [vmem:[%s2808_s10 + $0xa0] ss:$8 sps:$4 sm:$0xff]   ;;  %v2030_v51 = vld [vmem:[%s2802_s14 + $0xd0] ss:$8 sps:$4 sm:$0xff]  }
 0x1bc   : > { %995 = vmatprep.subr.bf16.mxu1 %v2013_v21  ;;  %v2049_v50 = vld [vmem:[%s2808_s10 + $0xb4] ss:$8 sps:$4 sm:$0xff]   ;;  %v2034_v52 = vld [vmem:[%s2802_s14 + $0xe4] ss:$8 sps:$4 sm:$0xff]   ;;  %v2051_v53 = vld [vmem:[%s2808_s10 + $0xb0] ss:$8 sps:$4 sm:$0xff]  }
 0x1bd   : > { %751 = vmatpush1.bf16.msra.mxu0 %v1982_v13  ;;  %v2036_v54 = vld [vmem:[%s2802_s14 + $0xe0] ss:$8 sps:$4 sm:$0xff]   ;;  %v2052_v55 = vld [vmem:[%s2808_s10 + $0xc4] ss:$8 sps:$4 sm:$0xff]   ;;  %v2040_v56 = vld [vmem:[%s2802_s14 + $0xf4] ss:$8 sps:$4 sm:$0xff]  }
 0x1be   : > { %752 = vmatprep.subr.bf16.mxu0 %v1983_v15  ;;  %v2054_v57 = vld [vmem:[%s2808_s10 + $0xc0] ss:$8 sps:$4 sm:$0xff]   ;;  %v2055_v58 = vld [vmem:[%s2808_s10 + $0xd4] ss:$8 sps:$4 sm:$0xff]   ;;  %v2042_v59 = vld [vmem:[%s2802_s14 + $0xf0] ss:$8 sps:$4 sm:$0xff]  }
 0x1bf   : > { %996 = vmatpush1.bf16.msra.mxu1 %v2015_v24  ;;  %v2066_v60 = vld [vmem:[%s2810_s25 + $0x4] ss:$8 sps:$4 sm:$0xff]   ;;  %v2057_v61 = vld [vmem:[%s2808_s10 + $0xd0] ss:$8 sps:$4 sm:$0xff]   ;;  %v2064_v0 = vld [vmem:[%s2810_s25] ss:$8 sps:$4 sm:$0xff]  }
 0x1c0   : > { %997 = vmatprep.subr.bf16.mxu1 %v2019_v25  ;;  %v2058_v62 = vld [vmem:[%s2808_s10 + $0xe4] ss:$8 sps:$4 sm:$0xff]   ;;  %v549_v1 = vld [vmem:[#allocation3 + $0x18] sm:$0xff]  ;;  %v2060_v3 = vld [vmem:[%s2808_s10 + $0xe0] ss:$8 sps:$4 sm:$0xff]   ;;  %p1797_p0 = scmp.ne.s32.totalorder %s3056_s30, 2 }
 0x1c1   : > { %753 = vmatpush1.bf16.msra.mxu0 %v1985_v18  ;;  %v546_v63 = vld [vmem:[#allocation3] sm:$0xff]  ;;  %v2067_v5 = vld [vmem:[%s2810_s25 + $0x10] ss:$8 sps:$4 sm:$0xff]  }
 0x1c2   : > { %754 = vmatprep.subr.bf16.mxu0 %v1986_v19  ;;  %v2069_v2 = vld [vmem:[%s2810_s25 + $0x14] ss:$8 sps:$4 sm:$0xff]   ;;  %v2072_v6 = vld [vmem:[%s2810_s25 + $0x24] ss:$8 sps:$4 sm:$0xff]   ;;  %v2063_v7 = vld [vmem:[%s2808_s10 + $0xf0] ss:$8 sps:$4 sm:$0xff]  }
 0x1c3   : > { %998 = vmatpush1.bf16.msra.mxu1 %v2021_v28  ;;  %v2061_v4 = vld [vmem:[%s2808_s10 + $0xf4] ss:$8 sps:$4 sm:$0xff]   ;;  %v2070_v9 = vld [vmem:[%s2810_s25 + $0x20] ss:$8 sps:$4 sm:$0xff]   ;;  %v2073_v11 = vld [vmem:[%s2810_s25 + $0x30] ss:$8 sps:$4 sm:$0xff]  }
 0x1c4   : > { %999 = vmatprep.subr.bf16.mxu1 %v2025_v29  ;;  %v548_v8 = vld [vmem:[#allocation3 + $0x10] sm:$0xff]  ;;  %v2076_v13 = vld [vmem:[%s2810_s25 + $0x40] ss:$8 sps:$4 sm:$0xff]  }
 0x1c5   : > { %755 = vmatpush1.bf16.msra.mxu0 %v1988_v22  ;;  %v2075_v10 = vld [vmem:[%s2810_s25 + $0x34] ss:$8 sps:$4 sm:$0xff]   ;;  %v2078_v12 = vld [vmem:[%s2810_s25 + $0x44] ss:$8 sps:$4 sm:$0xff]   ;;  %v2079_v15 = vld [vmem:[%s2810_s25 + $0x50] ss:$8 sps:$4 sm:$0xff]  }
 0x1c6   : > { %756 = vmatprep.subr.bf16.mxu0 %v1992_v23  ;;  %v2081_v14 = vld [vmem:[%s2810_s25 + $0x54] ss:$8 sps:$4 sm:$0xff]   ;;  %v2084_v16 = vld [vmem:[%s2810_s25 + $0x64] ss:$8 sps:$4 sm:$0xff]   ;;  %v2082_v17 = vld [vmem:[%s2810_s25 + $0x60] ss:$8 sps:$4 sm:$0xff]  }
 0x1c7   : > { %1000 = vmatpush1.bf16.msra.mxu1 %v2027_v32  ;;  %v2087_v18 = vld [vmem:[%s2810_s25 + $0x74] ss:$8 sps:$4 sm:$0xff]   ;;  %v2085_v19 = vld [vmem:[%s2810_s25 + $0x70] ss:$8 sps:$4 sm:$0xff]   ;;  %v2090_v20 = vld [vmem:[%s2810_s25 + $0x84] ss:$8 sps:$4 sm:$0xff]  }
 0x1c8   : > { %1001 = vmatprep.subr.bf16.mxu1 %v2031_v33  ;;  %v2088_v21 = vld [vmem:[%s2810_s25 + $0x80] ss:$8 sps:$4 sm:$0xff]   ;;  %v2093_v22 = vld [vmem:[%s2810_s25 + $0x94] ss:$8 sps:$4 sm:$0xff]   ;;  %v2091_v23 = vld [vmem:[%s2810_s25 + $0x90] ss:$8 sps:$4 sm:$0xff]  }
 0x1c9   : > { %757 = vmatpush1.bf16.msra.mxu0 %v1994_v26  ;;  %v2096_v24 = vld [vmem:[%s2810_s25 + $0xa4] ss:$8 sps:$4 sm:$0xff]   ;;  %v2094_v25 = vld [vmem:[%s2810_s25 + $0xa0] ss:$8 sps:$4 sm:$0xff]   ;;  %v2099_v26 = vld [vmem:[%s2810_s25 + $0xb4] ss:$8 sps:$4 sm:$0xff]  }
 0x1ca   : > { %758 = vmatprep.subr.bf16.mxu0 %v1998_v27  ;;  %v2097_v27 = vld [vmem:[%s2810_s25 + $0xb0] ss:$8 sps:$4 sm:$0xff]   ;;  %v2102_v28 = vld [vmem:[%s2810_s25 + $0xc4] ss:$8 sps:$4 sm:$0xff]   ;;  %v2100_v29 = vld [vmem:[%s2810_s25 + $0xc0] ss:$8 sps:$4 sm:$0xff]  }
 0x1cb   : > { %1002 = vmatpush1.bf16.msra.mxu1 %v2033_v37  ;;  %v2108_v32 = vld [vmem:[%s2810_s25 + $0xe4] ss:$8 sps:$4 sm:$0xff]   ;;  %v2106_v33 = vld [vmem:[%s2810_s25 + $0xe0] ss:$8 sps:$4 sm:$0xff]   ;;  %v2111_v34 = vld [vmem:[%s2810_s25 + $0xf4] ss:$8 sps:$4 sm:$0xff]  }
 0x1cc   : > { %1003 = vmatprep.subr.bf16.mxu1 %v2037_v38 }
 0x1cd   : > { %759 = vmatpush1.bf16.msra.mxu0 %v2000_v30  ;;  %v2105_v30 = vld [vmem:[%s2810_s25 + $0xd4] ss:$8 sps:$4 sm:$0xff]  }
 0x1ce   : > { %760 = vmatprep.subr.bf16.mxu0 %v2004_v31  ;;  %v2103_v31 = vld [vmem:[%s2810_s25 + $0xd0] ss:$8 sps:$4 sm:$0xff]  }
 0x1cf   : > { %1004 = vmatpush1.bf16.msra.mxu1 %v2039_v41 }
 0x1d0   : > { %1005 = vmatprep.subr.bf16.mxu1 %v2043_v42 }
 0x1d1   : > { %761 = vmatpush1.bf16.msra.mxu0 %v2006_v35  ;;  %v2109_v35 = vld [vmem:[%s2810_s25 + $0xf0] ss:$8 sps:$4 sm:$0xff]  }
 0x1d2   : > { %762 = vmatprep.subr.bf16.mxu0 %v2010_v36 }
 0x1d3   : > { %1006 = vmatpush1.bf16.msra.mxu1 %v2045_v45 }
 0x1d4   : > { %1007 = vmatprep.subr.bf16.mxu1 %v2046_v46 }
 0x1d5   : > { %763 = vmatpush1.bf16.msra.mxu0 %v2012_v39 }
 0x1d6   : > { %764 = vmatprep.subr.bf16.mxu0 %v2016_v40 }
 0x1d7   : > { %1008 = vmatpush1.bf16.msra.mxu1 %v2048_v49 }
 0x1d8   : > { %1009 = vmatprep.subr.bf16.mxu1 %v2049_v50 }
 0x1d9   : > { %765 = vmatpush1.bf16.msra.mxu0 %v2018_v43 }
 0x1da   : > { %766 = vmatprep.subr.bf16.mxu0 %v2022_v44 }
 0x1db   : > { %1010 = vmatpush1.bf16.msra.mxu1 %v2051_v53 }
 0x1dc   : > { %1011 = vmatprep.subr.bf16.mxu1 %v2052_v55 }
 0x1dd   : > { %767 = vmatpush1.bf16.msra.mxu0 %v2024_v47 }
 0x1de   : > { %768 = vmatprep.subr.bf16.mxu0 %v2028_v48 }
 0x1df   : > { %1012 = vmatpush1.bf16.msra.mxu1 %v2054_v57 }
 0x1e0   : > { %1013 = vmatprep.subr.bf16.mxu1 %v2055_v58 }
 0x1e1   : > { %769 = vmatpush1.bf16.msra.mxu0 %v2030_v51 }
 0x1e2   : > { %770 = vmatprep.subr.bf16.mxu0 %v2034_v52 }
 0x1e3   : > { %1014 = vmatpush1.bf16.msra.mxu1 %v2057_v61 }
 0x1e4   : > { %1015 = vmatprep.subr.bf16.mxu1 %v2058_v62 }
 0x1e5   : > { %771 = vmatpush1.bf16.msra.mxu0 %v2036_v54 }
 0x1e6   : > { %772 = vmatprep.subr.bf16.mxu0 %v2040_v56 }
 0x1e7   : > { %1016 = vmatpush1.bf16.msra.mxu1 %v2060_v3 }
 0x1e8   : > { %1017 = vmatprep.subr.bf16.mxu1 %v2061_v4 }
 0x1e9   : > { %773 = vmatpush1.bf16.msra.mxu0 %v2042_v59 }
 0x1ea   : > { %1308 = vmatprep.subr.bf16.mxu0 %v2066_v60 }
 0x1eb   : > { %1018 = vmatpush1.bf16.msra.mxu1 %v2063_v7 }
 0x1ec   : > { %775 = vmatmul.mubr.bf16.vlgmr.msra.gmra.mrb[0].mxu0 %v546_v63  ;;  %1806 = vmatprep.subr.bf16.mxu1 %v2066_v60 }
 0x1ed   : > { %784 = vmatprep.mubr.bf16.mxu0 %v549_v1  ;;  %1309 = vmatpush1.bf16.msra.mxu0 %v2064_v0 }
 0x1ee   : > { %1310 = vmatprep.subr.bf16.mxu0 %v2069_v2  ;;  %1020 = vmatmul.mubr.bf16.vlgmr.msra.gmra.mrb[0].mxu1 %v546_v63 }
 0x1ef   : > { %1029 = vmatprep.mubr.bf16.mxu1 %v549_v1  ;;  %1822 = vmatpush1.bf16.msra.mxu1 %v2064_v0 }
 0x1f0   : > { %1807 = vmatprep.subr.bf16.mxu1 %v2069_v2 }
 0x1f1   : > { %1311 = vmatpush1.bf16.msra.mxu0 %v2067_v5 }
 0x1f2   : > { %1312 = vmatprep.subr.bf16.mxu0 %v2072_v6 }
 0x1f3   : > { %1823 = vmatpush1.bf16.msra.mxu1 %v2067_v5 }
 0x1f4   : > { %785 = vmatmul.mubr.bf16.gmra.mrb[4].mxu0 %v548_v8  ;;  %1808 = vmatprep.subr.bf16.mxu1 %v2072_v6 }
 0x1f5   : > { %1313 = vmatpush1.bf16.msra.mxu0 %v2070_v9 }
 0x1f6   : > { %1314 = vmatprep.subr.bf16.mxu0 %v2075_v10  ;;  %1030 = vmatmul.mubr.bf16.gmra.mrb[4].mxu1 %v548_v8 }
 0x1f7   : > { %1824 = vmatpush1.bf16.msra.mxu1 %v2070_v9 }
 0x1f8   : > { %1809 = vmatprep.subr.bf16.mxu1 %v2075_v10 }
 0x1f9   : > { %1315 = vmatpush1.bf16.msra.mxu0 %v2073_v11 }
 0x1fa   : > { %1316 = vmatprep.subr.bf16.mxu0 %v2078_v12 }
 0x1fb   : > { %1825 = vmatpush1.bf16.msra.mxu1 %v2073_v11 }
 0x1fc   : > { %1810 = vmatprep.subr.bf16.mxu1 %v2078_v12 }
 0x1fd   : > { %1317 = vmatpush1.bf16.msra.mxu0 %v2076_v13 }
 0x1fe   : > { %1318 = vmatprep.subr.bf16.mxu0 %v2081_v14 }
 0x1ff   : > { %1826 = vmatpush1.bf16.msra.mxu1 %v2076_v13 }
 0x200   : > { %1811 = vmatprep.subr.bf16.mxu1 %v2081_v14 }
 0x201   : > { %1319 = vmatpush1.bf16.msra.mxu0 %v2079_v15 }
 0x202   : > { %1320 = vmatprep.subr.bf16.mxu0 %v2084_v16 }
 0x203   : > { %1827 = vmatpush1.bf16.msra.mxu1 %v2079_v15 }
 0x204   : > { %1812 = vmatprep.subr.bf16.mxu1 %v2084_v16 }
 0x205   : > { %1321 = vmatpush1.bf16.msra.mxu0 %v2082_v17 }
 0x206   : > { %1322 = vmatprep.subr.bf16.mxu0 %v2087_v18 }
 0x207   : > { %1828 = vmatpush1.bf16.msra.mxu1 %v2082_v17 }
 0x208   : > { %1813 = vmatprep.subr.bf16.mxu1 %v2087_v18 }
 0x209   : > { %1323 = vmatpush1.bf16.msra.mxu0 %v2085_v19 }
 0x20a   : > { %1324 = vmatprep.subr.bf16.mxu0 %v2090_v20 }
 0x20b   : > { %1829 = vmatpush1.bf16.msra.mxu1 %v2085_v19 }
 0x20c   : > { %1814 = vmatprep.subr.bf16.mxu1 %v2090_v20 }
 0x20d   : > { %1325 = vmatpush1.bf16.msra.mxu0 %v2088_v21 }
 0x20e   : > { %1326 = vmatprep.subr.bf16.mxu0 %v2093_v22 }
 0x20f   : > { %1830 = vmatpush1.bf16.msra.mxu1 %v2088_v21 }
 0x210   : > { %1815 = vmatprep.subr.bf16.mxu1 %v2093_v22 }
 0x211   : > { %1327 = vmatpush1.bf16.msra.mxu0 %v2091_v23 }
 0x212   : > { %1328 = vmatprep.subr.bf16.mxu0 %v2096_v24 }
 0x213   : > { %1831 = vmatpush1.bf16.msra.mxu1 %v2091_v23 }
 0x214   : > { %1816 = vmatprep.subr.bf16.mxu1 %v2096_v24 }
 0x215   : > { %1329 = vmatpush1.bf16.msra.mxu0 %v2094_v25 }
 0x216   : > { %1330 = vmatprep.subr.bf16.mxu0 %v2099_v26 }
 0x217   : > { %1832 = vmatpush1.bf16.msra.mxu1 %v2094_v25 }
 0x218   : > { %1817 = vmatprep.subr.bf16.mxu1 %v2099_v26 }
 0x219   : > { %1331 = vmatpush1.bf16.msra.mxu0 %v2097_v27 }
 0x21a   : > { %1332 = vmatprep.subr.bf16.mxu0 %v2102_v28 }
 0x21b   : > { %1833 = vmatpush1.bf16.msra.mxu1 %v2097_v27 }
 0x21c   : > { %1818 = vmatprep.subr.bf16.mxu1 %v2102_v28 }
 0x21d   : > { %1333 = vmatpush1.bf16.msra.mxu0 %v2100_v29 }
 0x21e   : > { %1334 = vmatprep.subr.bf16.mxu0 %v2105_v30 }
 0x21f   : > { %1834 = vmatpush1.bf16.msra.mxu1 %v2100_v29 }
 0x220   : > { %1819 = vmatprep.subr.bf16.mxu1 %v2105_v30 }
 0x221   : > { %1335 = vmatpush1.bf16.msra.mxu0 %v2103_v31 }
 0x222   : > { %1336 = vmatprep.subr.bf16.mxu0 %v2108_v32 }
 0x223   : > { %1835 = vmatpush1.bf16.msra.mxu1 %v2103_v31 }
 0x224   : > { %1820 = vmatprep.subr.bf16.mxu1 %v2108_v32 }
 0x225   : > { %1337 = vmatpush1.bf16.msra.mxu0 %v2106_v33 }
 0x226   : > { %1338 = vmatprep.subr.bf16.mxu0 %v2111_v34 }
 0x227   : > { %1836 = vmatpush1.bf16.msra.mxu1 %v2106_v33 }
 0x228   : > { %1821 = vmatprep.subr.bf16.mxu1 %v2111_v34 }
 0x229   : > { %1339 = vmatpush1.bf16.msra.mxu0 %v2109_v35 }
 0x22b   : > { %1837 = vmatpush1.bf16.msra.mxu1 %v2109_v35 }
 0x2bf   : > { %v776_v36 = vpop.f32.mrb[0].mxu0 }
 0x2c0   : > { %v1757_v37 = vmul.f32 -1.442695, %v776_v36  ;;  %v778_v38 = vpop.f32.mrb[1].mxu0 }
 0x2c1   : > { %v1758_v39 = vmul.f32 -1.442695, %v778_v38  ;;  %v780_v40 = vpop.f32.mrb[2].mxu0  ;;  %v1021_v49 = vpop.f32.mrb[0].mxu1 }
 0x2c2   : > { %2112 = vpow2.f32 %v1757_v37  ;;  %v1759_v41 = vmul.f32 -1.442695, %v780_v40  ;;  %v782_v42 = vpop.f32.mrb[3].mxu0  ;;  %v1023_v52 = vpop.f32.mrb[1].mxu1 }
 0x2c3   : > { %2114 = vpow2.f32 %v1758_v39  ;;  %v1760_v43 = vmul.f32 -1.442695, %v782_v42  ;;  %v1025_v54 = vpop.f32.mrb[2].mxu1 }
 0x2c4   : > { %2116 = vpow2.f32 %v1759_v41  ;;  %v1027_v56 = vpop.f32.mrb[3].mxu1  ;;  %v1105_v41 = vld [vmem:[#allocation2 + $0x8] sm:$0xff] }
 0x2c5   : > { %2118 = vpow2.f32 %v1760_v43  ;;  %v1106_v43 = vld [vmem:[#allocation2 + $0x10] sm:$0xff] }
 0x2c7   : > { %v786_v44 = vpop.f32.mrb[4].mxu0 }
 0x2c8   : > { %v1761_v45 = vmul.f32 -1.442695, %v786_v44  ;;  %v788_v46 = vpop.f32.mrb[5].mxu0 }
 0x2c9   : > { %v1762_v47 = vmul.f32 -1.442695, %v788_v46  ;;  %v790_v48 = vpop.f32.mrb[6].mxu0  ;;  %v1031_v0 = vpop.f32.mrb[4].mxu1 }
 0x2ca   : > { %2120 = vpow2.f32 %v1761_v45  ;;  %v1763_v50 = vmul.f32 -1.442695, %v790_v48  ;;  %v792_v51 = vpop.f32.mrb[7].mxu0  ;;  %v1033_v1 = vpop.f32.mrb[5].mxu1 }
 0x2cb   : > { %2122 = vpow2.f32 %v1762_v47  ;;  %v1764_v53 = vmul.f32 -1.442695, %v792_v51  ;;  %v1035_v2 = vpop.f32.mrb[6].mxu1 }
 0x2cc   : > { %v2113_v55 = vpop.eup %2112  ;;  %2124 = vpow2.f32 %v1763_v50  ;;  %v1037_v4 = vpop.f32.mrb[7].mxu1 }
 0x2cd   : > { %v2115_v57 = vpop.eup %2114  ;;  %v1064_v58 = vadd.f32 1.0, %v2113_v55  ;;  %2126 = vpow2.f32 %v1764_v53  ;;  %v1109_v53 = vld [vmem:[#allocation2 + $0x28] sm:$0xff]  ;;  %v1110_v55 = vld [vmem:[#allocation2 + $0x30] sm:$0xff] }
 0x2ce   : > { %v2117_v59 = vpop.eup %2116  ;;  %v1065_v60 = vadd.f32 1.0, %v2115_v57 }
 0x2cf   : > { %v2119_v61 = vpop.eup %2118  ;;  %2128 = vrcp.f32 %v1064_v58  ;;  %v1066_v62 = vadd.f32 1.0, %v2117_v59  ;;  %v1111_v58 = vld [vmem:[#allocation2 + $0x38] sm:$0xff] }
 0x2d0   : > { %2130 = vrcp.f32 %v1065_v60  ;;  %v1067_v63 = vadd.f32 1.0, %v2119_v61 }
 0x2d1   : > { %2132 = vrcp.f32 %v1066_v62 }
 0x2d2   : > { %2134 = vrcp.f32 %v1067_v63 }
 0x2d4   : > { %v2121_v3 = vpop.eup %2120 }
 0x2d5   : > { %v2123_v5 = vpop.eup %2122  ;;  %v1068_v6 = vadd.f32 1.0, %v2121_v3 }
 0x2d6   : > { %v2125_v7 = vpop.eup %2124  ;;  %v1069_v8 = vadd.f32 1.0, %v2123_v5 }
 0x2d7   : > { %v2127_v9 = vpop.eup %2126  ;;  %2136 = vrcp.f32 %v1068_v6  ;;  %v1070_v10 = vadd.f32 1.0, %v2125_v7 }
 0x2d8   : > { %2138 = vrcp.f32 %v1069_v8  ;;  %v1071_v11 = vadd.f32 1.0, %v2127_v9  ;;  %v2467_v9 = vmov (!%p1797_p0), 0  }
 0x2d9   : > { %v2129_v12 = vpop.eup %2128  ;;  %2140 = vrcp.f32 %v1070_v10  ;;  %2145 = vset.pattern.permute.xlu1 (!%p1797_p0), %v2467_v9  ;;  %2144 = vset.pattern.permute.xlu0 (!%p1797_p0), %v2467_v9 }
 0x2da   : > { %v2131_v13 = vpop.eup %2130  ;;  %v1088_v14 = vmul.f32 %v2129_v12, %v776_v36  ;;  %2142 = vrcp.f32 %v1071_v11 }
 0x2db   : > { %v2133_v15 = vpop.eup %2132  ;;  %v1089_v16 = vmul.f32 %v2131_v13, %v778_v38 }
 0x2dc   : > { %v2135_v17 = vpop.eup %2134  ;;  %v1090_v18 = vmul.f32 %v2133_v15, %v780_v40  ;;  %v1096_v19 = vmul.f32 %v1088_v14, %v1021_v49  ;;  %v1104_v40 = vld [vmem:[#allocation2] sm:$0xff] }
 0x2dd   : > { %v1091_v20 = vmul.f32 %v2135_v17, %v782_v42  ;;  %v1097_v21 = vmul.f32 %v1089_v16, %v1023_v52  ;;  %v1108_v52 = vld [vmem:[#allocation2 + $0x20] sm:$0xff] }
 0x2de   : > { %v1098_v22 = vmul.f32 %v1090_v18, %v1025_v54 }
 0x2df   : > { %v1099_v23 = vmul.f32 %v1091_v20, %v1027_v56 }
 0x2e0   : > { %v1112_v24 = vpack.c.bf16 %v1098_v22, %v1096_v19  ;;  %v1460_v22 = vld [vmem:[#allocation7 + $0x10] sm:$0xff] (!%p1797_p0) }
 0x2e1   : > { %v2137_v25 = vpop.eup %2136  ;;  %v1113_v26 = vpack.c.bf16 %v1099_v23, %v1097_v21  ;;  %v1459_v21 = vld [vmem:[#allocation7 + $0x8] sm:$0xff] (!%p1797_p0)  ;;  %v1458_v23 = vld [vmem:[#allocation7] sm:$0xff] (!%p1797_p0) }
 0x2e2   : > { %v2139_v27 = vpop.eup %2138  ;;  %v1092_v28 = vmul.f32 %v2137_v25, %v786_v44 }
 0x2e3   : > { %v2141_v29 = vpop.eup %2140  ;;  %v1093_v30 = vmul.f32 %v2139_v27, %v788_v46  ;;  %1340 = vmatprep.mubr.bf16.mxu0 %v1113_v26  ;;  %v1107_v46 = vld [vmem:[#allocation2 + $0x18] sm:$0xff] }
 0x2e4   : > { %v2143_v31 = vpop.eup %2142  ;;  %v1094_v32 = vmul.f32 %v2141_v29, %v790_v48  ;;  %v1100_v33 = vmul.f32 %v1092_v28, %v1031_v0  ;;  %1341 = vmatmul.mubr.bf16.vlgmr.msra.gmra.mrb[8].mxu0 %v1112_v24  ;;  %v1461_v24 = vld [vmem:[#allocation7 + $0x18] sm:$0xff] (!%p1797_p0)  ;;  %v1432_v29 = vlaneseq (!%p1797_p0) }
 0x2e5   : > { %v1095_v34 = vmul.f32 %v2143_v31, %v792_v51  ;;  %v1101_v35 = vmul.f32 %v1093_v30, %v1033_v1 }
 0x2e6   : > { %v1102_v36 = vmul.f32 %v1094_v32, %v1035_v2 }
 0x2e7   : > { %v1103_v37 = vmul.f32 %v1095_v34, %v1037_v4 }
 0x2e8   : > { %v1114_v38 = vpack.c.bf16 %v1102_v36, %v1100_v33  ;;  %v1433_v36 = vshrl.u32 (!%p1797_p0), %v1432_v29, 7 }
 0x2e9   : > { %v1115_v39 = vpack.c.bf16 %v1103_v37, %v1101_v35 }
 0x2eb   : > { %1350 = vmatprep.mubr.bf16.mxu1 %v1115_v39  ;;  %v1434_v39 = vsub.s32 (!%p1797_p0), 0, %v1433_v36 }
 0x2ec   : > { %1351 = vmatmul.mubr.bf16.vlgmr.msra.gmra.mrb[8].mxu1 %v1114_v38 }
 0x3b7   : > { %v1342_v42 = vpop.f32.mrb[8].mxu0 }
 0x3b8   : > { %v1361_v44 = vadd.f32 %v1342_v42, %v1104_v40  ;;  %v1344_v45 = vpop.f32.mrb[9].mxu0  ;;  %v1438_v40 = vsub.s32 (!%p1797_p0), 1, %v1433_v36 }
 0x3b9   : > { %v1362_v47 = vadd.f32 %v1344_v45, %v1105_v41  ;;  %v1346_v49 = vpop.f32.mrb[10].mxu0  ;;  %v1430_v41 = vld [vmem:[#allocation15] sm:$0x3] (!%p1797_p0) }
 0x3ba   : > { %1369 = vst [vmem:[#allocation2] sm:$0xff] %v1361_v44  ;;  %v1363_v48 = vadd.f32 %v1346_v49, %v1106_v43  ;;  %v1348_v50 = vpop.f32.mrb[11].mxu0  ;;  %v1435_v43 = vrot.slane (!%p1797_p0), %v1430_v41, %v1434_v39  ;;  %v1439_v44 = vrot.slane (!%p1797_p0), %v1430_v41, %v1438_v40 }
 0x3bb   : > { %1370 = vst [vmem:[#allocation2 + $0x8] sm:$0xff] %v1362_v47  ;;  %v1364_v51 = vadd.f32 %v1348_v50, %v1107_v46 }
 0x3bc   : > { %1371 = vst [vmem:[#allocation2 + $0x10] sm:$0xff] %v1363_v48 }
 0x3bd   : > { %1372 = vst [vmem:[#allocation2 + $0x18] sm:$0xff] %v1364_v51 }
 0x3bf   : > { %v1352_v54 = vpop.f32.mrb[8].mxu1  ;;  %1380 = sbr.rel (%p1797_p0) target bundleno = 1146 (0x47a), region = 84 }
 0x3c0   : > { %v1365_v56 = vadd.f32 %v1352_v54, %v1108_v52  ;;  %v1354_v57 = vpop.f32.mrb[9].mxu1 }
 0x3c1   : > { %v1366_v59 = vadd.f32 %v1354_v57, %v1109_v53  ;;  %v1356_v60 = vpop.f32.mrb[10].mxu1  ;;  %v1381_v2 = vld [vmem:[#allocation2] sm:$0xff] (!%p1797_p0)  ;;  %v1455_v57 = vld [vmem:[#allocation4 + $0x28] sm:$0xff] (!%p1797_p0) }
 0x3c2   : > { %1373 = vst [vmem:[#allocation2 + $0x20] sm:$0xff] %v1365_v56  ;;  %v1367_v61 = vadd.f32 %v1356_v60, %v1110_v55  ;;  %v1358_v62 = vpop.f32.mrb[11].mxu1  ;;  %v1382_v5 = vld [vmem:[#allocation2 + $0x8] sm:$0xff] (!%p1797_p0)  ;;  %v1389_v6 = vmul.f32 (!%p1797_p0), %v1381_v2, %v1381_v2  ;;  %v1454_v56 = vld [vmem:[#allocation4 + $0x20] sm:$0xff] (!%p1797_p0) }
 0x3c3   : > { %1374 = vst [vmem:[#allocation2 + $0x28] sm:$0xff] %v1366_v59  ;;  %v1368_v63 = vadd.f32 %v1358_v62, %v1111_v58  ;;  %v1390_v10 = vmul.f32 (!%p1797_p0), %v1382_v5, %v1382_v5  ;;  %v2926_v13 = vld [vmem:[#allocation2 + $0x10] sm:$0xff] (!%p1797_p0) }
 0x3c4   : > { %1375 = vst [vmem:[#allocation2 + $0x30] sm:$0xff] %v1367_v61  ;;  %v2928_v14 = vld [vmem:[#allocation2 + $0x18] sm:$0xff] (!%p1797_p0)  ;;  %v1391_v16 = vmul.f32 (!%p1797_p0), %v2926_v13, %v2926_v13 }
 0x3c5   : > { %1376 = vst [vmem:[#allocation2 + $0x38] sm:$0xff] %v1368_v63  ;;  %v1392_v17 = vmul.f32 (!%p1797_p0), %v2928_v14, %v2928_v14  ;;  %v1397_v18 = vadd.f32 (!%p1797_p0), %v1390_v10, %v1389_v6 }
 0x3c7   : > { %1398 = vadd.xlane.f32.xlu0 %v1397_v18  ;;  %v1400_v20 = vadd.f32 %v1392_v17, %v1391_v16  ;;  %v1456_v17 = vld [vmem:[#allocation4 + $0x30] sm:$0xff]  ;;  %v1457_v18 = vld [vmem:[#allocation4 + $0x38] sm:$0xff] }
 0x3c9   : > { %v1385_v0 = vld [vmem:[#allocation2 + $0x20] sm:$0xff] }
 0x3ca   : > { %v1386_v1 = vld [vmem:[#allocation2 + $0x28] sm:$0xff]  ;;  %v1393_v3 = vmul.f32 %v1385_v0, %v1385_v0 }
 0x3cb   : > { %v1394_v4 = vmul.f32 %v1386_v1, %v1386_v1  ;;  %v2918_v7 = vld [vmem:[#allocation2 + $0x30] sm:$0xff]  ;;  %1401 = vadd.xlane.f32.xlu0 %v1400_v20 }
 0x3cc   : > { %v2920_v8 = vld [vmem:[#allocation2 + $0x38] sm:$0xff]  ;;  %v1395_v11 = vmul.f32 %v2918_v7, %v2918_v7 }
 0x3cd   : > { %v1396_v12 = vmul.f32 %v2920_v8, %v2920_v8  ;;  %v1403_v15 = vadd.f32 %v1394_v4, %v1393_v3 }
 0x3cf   : > { %1404 = vadd.xlane.f32.xlu1 %v1403_v15  ;;  %v1406_v19 = vadd.f32 %v1396_v12, %v1395_v11 }
 0x3d3   : > { %1407 = vadd.xlane.f32.xlu1 %v1406_v19 }
 0x3e1   : > { %1464 = vperm.xlu0 %2144, %v1458_v23  }
 0x3e4   : > { %1469 = vperm.xlu1 %2145, %v1459_v21   ;;  %v1453_v21 = vld [vmem:[#allocation4 + $0x18] sm:$0xff] }
 0x3e8   : > { %1474 = vperm.xlu1 %2145, %v1460_v22  }
 0x3ec   : > { %1479 = vperm.xlu1 %2145, %v1461_v24  }
 0x454   : > { %v1399_v27 = vpop.xlane.xlu0 %1398 }
 0x455   : > { %v1410_v28 = vmul.f32 0.00390625, %v1399_v27 }
 0x457   : > { %v1414_v31 = vadd.f32 1e-05, %v1410_v28 }
 0x458   : > { %v1402_v34 = vpop.xlane.xlu0 %1401 }
 0x459   : > { %v1411_v35 = vmul.f32 0.00390625, %v1402_v34 }
 0x45b   : > { %v1415_v38 = vadd.f32 1e-05, %v1411_v35 }
 0x45c   : > { %v1405_v25 = vpop.xlane.xlu1 %1404 }
 0x45d   : > { %v1412_v26 = vmul.f32 0.00390625, %v1405_v25 }
 0x45f   : > { %v1416_v30 = vadd.f32 1e-05, %v1412_v26 }
 0x460   : > { %v1408_v32 = vpop.xlane.xlu1 %1407  ;;  %v1465_v54 = vpop.permute.xlu0 %1464 }
 0x461   : > { %2146 = vrsqrt.f32 %v1416_v30  ;;  %v1413_v33 = vmul.f32 0.00390625, %v1408_v32 }
 0x462   : > { %2148 = vrsqrt.f32 %v1414_v31 }
 0x463   : > { %v1417_v37 = vadd.f32 1e-05, %v1413_v33 }
 0x464   : > { %v1470_v42 = vpop.permute.xlu1 %1469 }
 0x465   : > { %2150 = vrsqrt.f32 %v1417_v37 }
 0x466   : > { %2152 = vrsqrt.f32 %v1415_v38 }
 0x468   : > { %v1475_v48 = vpop.permute.xlu1 %1474 }
 0x46b   : > { %v2147_v45 = vpop.eup %2146 }
 0x46c   : > { %v2149_v46 = vpop.eup %2148  ;;  %v1426_v47 = vmul.f32 %v2147_v45, %v1385_v0  ;;  %v1427_v49 = vmul.f32 %v2147_v45, %v1386_v1  ;;  %v1450_v0 = vld [vmem:[#allocation4] sm:$0xff]  ;;  %v1451_v1 = vld [vmem:[#allocation4 + $0x8] sm:$0xff]  ;;  %v1480_v19 = vpop.permute.xlu1 %1479 }
 0x46d   : > { %v1422_v50 = vmul.f32 %v2149_v46, %v1381_v2  ;;  %v1423_v51 = vmul.f32 %v2149_v46, %v1382_v5 }
 0x46e   : > { %v1446_v52 = vmul.f32 %v1435_v43, %v1426_v47  ;;  %v1447_v53 = vmul.f32 %v1439_v44, %v1427_v49 }
 0x46f   : > { %v2151_v55 = vpop.eup %2150  ;;  %v1442_v58 = vmul.f32 %v1435_v43, %v1422_v50  ;;  %v1443_v59 = vmul.f32 %v1439_v44, %v1423_v51 }
 0x470   : > { %v2153_v60 = vpop.eup %2152  ;;  %v1486_v61 = vmul.f32 %v1475_v48, %v1446_v52  ;;  %v1487_v62 = vmul.f32 %v1475_v48, %v1447_v53  ;;  %v1428_v63 = vmul.f32 %v2151_v55, %v2918_v7  ;;  %v1429_v3 = vmul.f32 %v2151_v55, %v2920_v8  ;;  %v1452_v8 = vld [vmem:[#allocation4 + $0x10] sm:$0xff] }
 0x471   : > { %v1424_v2 = vmul.f32 %v2153_v60, %v2926_v13  ;;  %v1425_v4 = vmul.f32 %v2153_v60, %v2928_v14  ;;  %v1482_v5 = vmul.f32 %v1465_v54, %v1442_v58  ;;  %v1483_v6 = vmul.f32 %v1465_v54, %v1443_v59 }
 0x472   : > { %v1494_v9 = vadd.f32 %v1486_v61, %v1454_v56  ;;  %v1495_v10 = vadd.f32 %v1487_v62, %v1455_v57  ;;  %v1448_v11 = vmul.f32 %v1435_v43, %v1428_v63  ;;  %v1449_v12 = vmul.f32 %v1439_v44, %v1429_v3 }
 0x473   : > { %v1444_v15 = vmul.f32 %v1435_v43, %v1424_v2  ;;  %v1445_v16 = vmul.f32 %v1439_v44, %v1425_v4  ;;  %v1490_v7 = vadd.f32 %v1482_v5, %v1450_v0  ;;  %v1491_v20 = vadd.f32 %v1483_v6, %v1451_v1 }
 0x474   : > { %1502 = vst [vmem:[#allocation16 + $0x20] sm:$0xff] %v1494_v9  ;;  %1503 = vst [vmem:[#allocation16 + $0x28] sm:$0xff] %v1495_v10  ;;  %v1488_v13 = vmul.f32 %v1480_v19, %v1448_v11  ;;  %v1489_v22 = vmul.f32 %v1480_v19, %v1449_v12 }
 0x475   : > { %v1484_v14 = vmul.f32 %v1470_v42, %v1444_v15  ;;  %v1485_v23 = vmul.f32 %v1470_v42, %v1445_v16  ;;  %1498 = vst [vmem:[#allocation16] sm:$0xff] %v1490_v7  ;;  %1499 = vst [vmem:[#allocation16 + $0x8] sm:$0xff] %v1491_v20 }
 0x476   : > { %v1496_v24 = vadd.f32 %v1488_v13, %v1456_v17  ;;  %v1497_v25 = vadd.f32 %v1489_v22, %v1457_v18 }
 0x477   : > { %v1492_v26 = vadd.f32 %v1484_v14, %v1452_v8  ;;  %v1493_v27 = vadd.f32 %v1485_v23, %v1453_v21 }
 0x478   : > { %1504 = vst [vmem:[#allocation16 + $0x30] sm:$0xff] %v1496_v24  ;;  %1505 = vst [vmem:[#allocation16 + $0x38] sm:$0xff] %v1497_v25 }
 0x479   : > { %1500 = vst [vmem:[#allocation16 + $0x10] sm:$0xff] %v1492_v26  ;;  %1501 = vst [vmem:[#allocation16 + $0x18] sm:$0xff] %v1493_v27 }
 0x47a PF: > { %s3057_s9 = sld [smem:[#allocation26_spill]]  ;;  %s2468_s20 = smov [#allocation16]  }
 0x47b   : > { %s1516_s11 = sshll.u32 %s2468_s20, 4  ;;  %s1517_s11 = int_to_ptr.vmem [resolvable:$true] %s1516_s11 }
 0x47c   : > { %s2356_s13 = scalar_lea.vmem %s1517_s11, 1024  ;;  %p2363_p12 = scmp.lt.s32.totalorder %s1517_s11, %s1517_s11 }
 0x47d   : > { %p2357_p8 = scmp.ne.s32.totalorder %s1517_s11, %s2356_s13  ;;  %p2364_p10 = scmp.lt.s32.totalorder %s2356_s13, %s2356_s13 }
 0x47f   : > { %p2365_p13 = por %p2364_p10, %p2363_p12 }
 0x480   : > { %p1896_p5 = scmp.eq.s32.totalorder %s3057_s9, 2 }
 0x482   : > { %p2358_p11 = pnand %p2357_p8, %p1896_p5 }
 0x484   : > { %p2359_p7 = pneg %p2358_p11 }
 0x486   : > { %p2366_p2 = pnand %p2365_p13, %p2359_p7 }
 0x488   : > { %2369 = shalt.err (!%p2366_p2)
}
 0x489   : > { %s3058_s1 = sld [smem:[#allocation34_spill]] }
 0x48f   : > { %s2370_s22 = scalar_lea.hbm %s3058_s1, 1024 }
 0x490   : > { %p2371_p6 = scmp.ne.s32.totalorder %s3058_s1, %s2370_s22  ;;  %p2376_p9 = scmp.lt.u32.totalorder %s2370_s22, %s3058_s1 }
 0x492   : > { %p2372_p4 = pnand %p2371_p6, %p1896_p5 }
 0x494   : > { %p2373_p1 = pneg %p2372_p4 }
 0x496   : > { %p2378_p3 = pnand %p2376_p9, %p2373_p1 }
 0x498   : > { %2381 = shalt.err (!%p2378_p3)
}
 0x499   : > { %s2469_s27 = smov 256   ;;  %s2470_s19 = smov 16  }
 0x49a   : > { %1861 = dma.vmem_to_hbm [thread:$0]  (%p1896_p5), %s1517_s11, 1024, %s3058_s1, [#allocation6], %s2469_s27, %s2469_s27, %s2470_s19  }
 0x49b   : > { %2427 = dma.done.wait (%p1896_p5), [#allocation6], 1024  }
 0x49c   : > { %2429 = vsyncadd (%p1896_p5), [#allocation6], 4294966272 }
 0x49d PF: > { %s26_s29 = sadd.s32 1, %s2452_s29   ;;  %s3059_s24 = sld [smem:[#allocation23_spill]] }
 0x49e   : > { %p23_p0 = scmp.ge.s32.totalorder %s26_s29, 5   ;;  %s3060_s25 = sld [smem:[#allocation24_spill]] }
 0x49f   : > { %s3061_s26 = sld [smem:[#allocation30_spill]]  ;;  %s3062_s17 = sld [smem:[#allocation29_spill]] }
 0x4a0   : > { %s3063_s27 = smov %s2448_s28  ;;  %25 = sbr.rel (!%p23_p0) target bundleno = 14 (0xe), region = 137 }
 0x4a5   : > { %s3064_s28 = smov %s3062_s17 }
 0x4a7   :  { %1532 = vsyncpa [#allocation5], 1 }
 0x4a8   :  { %1534 = vsyncpa [#allocation5 + $0x1], 1 }
 0x4a9   :  { %1535 = vsyncpa [#allocation8], 1 }
 0x4aa   :  { %1536 = vsyncpa [#allocation11], 1 }
 0x4ab   :  { %1538 = vsyncpa [#allocation11 + $0x1], 1 }
 0x4ac   :  { %1539 = vsyncpa [#allocation14], 1 }
 0x4ad   :  { %1541 = vsyncpa [#allocation14 + $0x1], 1 }
 0x4ae   :  { %1542 = vsyncpa [#allocation6], 1 }
 0x4af   :  { %1544 = vsyncpa [#allocation6 + $0x1], 1 }

</bundles_post_ra>
